<compile_context>
chip_gen: v7x
topology: tpu7x:2x2x1
jax: 0.10.0
libtpu: 0.0.40
codegen_flags: <defaults>
</compile_context>

<pallas_src>
import functools

import jax
import jax.numpy as jnp
from jax import lax
from jax.experimental import pallas as pl
from jax.experimental.pallas import tpu as pltpu

# ---- model dims (small, consistent with the forward pass) -------------------
CIN = 4       # input channels per frame
H = W = 16    # spatial size
CF = 32       # conv output channels == CNN feature dim fed to the LSTM
HD = 32       # LSTM hidden size
OD = 16       # fc1 output dim
B, T = 2, 8   # batch, timesteps

KPAD = 128                 # lane-dense contraction dim for the conv matmul
SLAB_ROWS = CF + HD + 5    # rows of the coalesced f32 parameter slab

# slab layout (rows x 128 lanes, f32):
#   [0, CF)        cols [0, 3*HD) : w_ih / (H*W)    gate blocks [i | g | o]
#   [CF, CF+HD)    cols [0, OD)   : w_fc1
#   CF+HD          cols [0, CF)   : conv_b
#   CF+HD+1        cols [0, 3*HD) : b_gates (b_ih + b_hh), gate order [i|g|o]
#   CF+HD+2        cols [0, HD)   : w_attn
#   CF+HD+3        cols [0, OD)   : b_fc1
#   CF+HD+4        col 0          : b_attn


# ---------------------------------------------------------------------------
# Fused kernel: conv3x3 (lane-dense bf16 im2col matmul) + ReLU + GAP
#               -> LSTM-cell-from-zero -> attention (tanh + softmax over time)
#               -> weighted sum -> fc1
# ---------------------------------------------------------------------------
def _fused_kernel(taps_ref, cw_ref, slab_ref, out_ref, *, b, t, hw, cf, hd, od):
    # taps_ref: (B*T*HW, 128) bf16  im2col patches, cols 36.. are zero padding
    # cw_ref:   (128, CF)     bf16  conv weight, rows (dh, dw, cin), 36.. zero
    # slab_ref: (SLAB_ROWS, 128) f32  all remaining parameters (see layout)
    # out_ref:  (B, OD) f32
    slab = slab_ref[...]

    # --- conv: one lane-dense bf16 matmul (f32 accumulate) + bias + ReLU -----
    y = jnp.dot(taps_ref[...], cw_ref[...], preferred_element_type=jnp.float32)
    conv_b = slab[cf + hd:cf + hd + 1, 0:cf]                 # (1, CF)
    y = jnp.maximum(y + conv_b, 0.0)                         # (B*T*HW, CF)

    # --- global average pool per frame (1/(H*W) folded into w_ih) ------------
    feat = jnp.sum(y.reshape(b * t, hw, cf), axis=1)         # (B*T, CF)

    # --- LSTM cell from zero state: all three live gates in one matmul -------
    w_ih = slab[0:cf, :]                                     # (CF, 128), 96.. zero
    b_g = slab[cf + hd + 1:cf + hd + 2, :]                   # (1, 128)
    gates = (jnp.dot(feat, w_ih, preferred_element_type=jnp.float32)
             + b_g)                                          # (B*T, 128)
    i_g = jax.nn.sigmoid(gates[:, 0:hd])
    g_g = jnp.tanh(gates[:, hd:2 * hd])
    o_g = jax.nn.sigmoid(gates[:, 2 * hd:3 * hd])
    h = (o_g * jnp.tanh(i_g * g_g)).reshape(b, t, hd)        # (B, T, HD)

    # --- attention: tanh(<h, wa> + ba), softmax over time, weighted sum ------
    # VPU multiply + lane reduce instead of a 1-lane-wide MXU matmul.
    w_attn = slab[cf + hd + 2:cf + hd + 3, 0:hd]             # (1, HD)
    b_attn = slab[cf + hd + 4:cf + hd + 5, 0:1]              # (1, 1)
    scores = jnp.tanh(jnp.sum(h * w_attn, axis=-1, keepdims=True)
                      + b_attn)                              # (B, T, 1)
    m = jnp.max(scores, axis=1, keepdims=True)
    e = jnp.exp(scores - m)
    a = e / jnp.sum(e, axis=1, keepdims=True)                # (B, T, 1)
    weighted = jnp.sum(a * h, axis=1)                        # (B, HD)

    # --- fc1 ------------------------------------------------------------------
    w1 = slab[cf:cf + hd, 0:od]                              # (HD, OD)
    b1 = slab[cf + hd + 3:cf + hd + 4, 0:od]                 # (1, OD)
    out_ref[...] = (jnp.dot(weighted, w1, preferred_element_type=jnp.float32)
                    + b1)                                    # (B, OD)


# ---------------------------------------------------------------------------
# Wrapper (layout transforms + parameter packing in plain JAX, jitted)
# ---------------------------------------------------------------------------
@jax.jit
def gradcam_forward(x, params):
    b_z, ts, c, hx, wx = x.shape
    n = b_z * ts
    hw = hx * wx
    k9 = 9 * c

    # NCHW per frame -> NHWC (bf16), merge (B, T), pad for 3x3/SAME, im2col.
    # Column order (dh, dw, cin) matches conv_w.reshape(9*Cin, CF); columns are
    # zero-padded to 128 so the dominant taps DMA is fully contiguous.
    xn = jnp.transpose(x, (0, 1, 3, 4, 2)).reshape(n, hx, wx, c)
    xn = xn.astype(jnp.bfloat16)
    xp = jnp.pad(xn, ((0, 0), (1, 1), (1, 1), (0, 0)))
    taps = jnp.concatenate(
        [xp[:, dh:dh + hx, dw:dw + wx, :] for dh in range(3) for dw in range(3)],
        axis=-1).reshape(n * hw, k9)
    taps = jnp.pad(taps, ((0, 0), (0, KPAD - k9)))           # (N*HW, 128) bf16

    # Conv weight: (3,3,Cin,CF) -> (9*Cin, CF), zero-pad K to 128, bf16.
    cw = jnp.pad(params["conv_w"].reshape(k9, CF), ((0, KPAD - k9), (0, 0)))
    cw = cw.astype(jnp.bfloat16)                             # (128, CF)

    # All remaining parameters coalesced into ONE lane-dense f32 slab (one DMA).
    w_ih = (jnp.transpose(params["w_ih"], (1, 0, 2)).reshape(CF, 3 * HD)
            / float(hw))                                     # fold GAP 1/(H*W)
    b_g = jnp.transpose(params["b_gates"], (1, 0, 2)).reshape(3 * HD)
    slab = jnp.zeros((SLAB_ROWS, 128), jnp.float32)
    slab = slab.at[0:CF, 0:3 * HD].set(w_ih)
    slab = slab.at[CF:CF + HD, 0:OD].set(params["w_fc1"])
    slab = slab.at[CF + HD, 0:CF].set(params["conv_b"])
    slab = slab.at[CF + HD + 1, 0:3 * HD].set(b_g)
    slab = slab.at[CF + HD + 2, 0:HD].set(params["w_attn"][:, 0])
    slab = slab.at[CF + HD + 3, 0:OD].set(params["b_fc1"][0])
    slab = slab.at[CF + HD + 4, 0].set(params["b_attn"][0, 0])

    kernel = functools.partial(_fused_kernel, b=b_z, t=ts, hw=hw,
                               cf=CF, hd=HD, od=OD)

    def full(shape):
        return pl.BlockSpec(shape, lambda i: (0,) * len(shape))

    return pl.pallas_call(
        kernel,
        out_shape=jax.ShapeDtypeStruct((b_z, OD), jnp.float32),
        grid=(1,),
        in_specs=[
            full((n * hw, KPAD)),        # taps (bf16, contiguous)
            full((KPAD, CF)),            # conv weight (bf16)
            full((SLAB_ROWS, 128)),      # coalesced f32 parameter slab
        ],
        out_specs=full((b_z, OD)),
        compiler_params=pltpu.CompilerParams(
            dimension_semantics=("arbitrary",)),
    )(taps, cw, slab)


# ---------------------------------------------------------------------------
# Pure-JAX reference (for correctness checking only)
# ---------------------------------------------------------------------------
def ref_forward(x, params):
    b_z, ts, c, hx, wx = x.shape
    xn = jnp.transpose(x, (0, 1, 3, 4, 2)).reshape(b_z * ts, hx, wx, c)
    y = lax.conv_general_dilated(xn, params["conv_w"], (1, 1), "SAME",
                                 dimension_numbers=("NHWC", "HWIO", "NHWC"))
    y = jnp.maximum(y + params["conv_b"].reshape(1, 1, 1, CF), 0.0)
    feat = y.mean(axis=(1, 2)).reshape(b_z, ts, CF)

    gi = feat @ params["w_ih"][0] + params["b_gates"][0]
    gg = feat @ params["w_ih"][1] + params["b_gates"][1]
    go = feat @ params["w_ih"][2] + params["b_gates"][2]
    h = jax.nn.sigmoid(go) * jnp.tanh(jax.nn.sigmoid(gi) * jnp.tanh(gg))

    scores = jnp.tanh(h @ params["w_attn"] + params["b_attn"])[..., 0]  # (B, T)
    a = jax.nn.softmax(scores, axis=1)
    weighted = jnp.einsum("bt,bth->bh", a, h)
    return weighted @ params["w_fc1"] + params["b_fc1"]


def init_params():
    keys = jax.random.split(jax.random.PRNGKey(42), 8)
    s = 0.1
    return {
        "conv_w":  s * jax.random.normal(keys[0], (3, 3, CIN, CF), jnp.float32),
        "conv_b":  s * jax.random.normal(keys[1], (CF,), jnp.float32),
        # (gate, CF, HD) with gate order (i, g, o); forget gate is dropped
        # because the LSTM is restarted from h0=c0=0 for every frame.
        "w_ih":    s * jax.random.normal(keys[2], (3, CF, HD), jnp.float32),
        # combined b_ih + b_hh per gate
        "b_gates": s * jax.random.normal(keys[3], (3, 1, HD), jnp.float32),
        "w_attn":  s * jax.random.normal(keys[4], (HD, 1), jnp.float32),
        "b_attn":  s * jax.random.normal(keys[5], (1, 1), jnp.float32),
        "w_fc1":   s * jax.random.normal(keys[6], (HD, OD), jnp.float32),
        "b_fc1":   s * jax.random.normal(keys[7], (1, OD), jnp.float32),
    }


if __name__ == "__main__":
    x = jax.random.normal(jax.random.PRNGKey(0), (B, T, CIN, H, W), jnp.float32)
    params = init_params()

    # Round the conv-path inputs to bf16 once so the kernel's bf16 MXU matmul
    # (exact bf16 products, f32 accumulate) and the f32 reference see identical
    # values and differ only by accumulation rounding.
    x = x.astype(jnp.bfloat16).astype(jnp.float32)
    params["conv_w"] = params["conv_w"].astype(jnp.bfloat16).astype(jnp.float32)

    out = jax.block_until_ready(gradcam_forward(x, params))
    ref = ref_forward(x, params)

    assert out.shape == (B, OD), out.shape
    if not jnp.allclose(out, ref, rtol=5e-3, atol=5e-3):
        raise SystemExit("mismatch vs reference")
    print("KERNEL_OK")
</pallas_src>

<mosaic_0001>
module attributes {stable_mosaic.version = 11 : i64} {
  func.func @_fused_kernel(%arg0: i32, %arg1: memref<4096x128xbf16, #tpu.memory_space<vmem>>, %arg2: memref<128x32xbf16, #tpu.memory_space<vmem>>, %arg3: memref<69x128xf32, #tpu.memory_space<vmem>>, %arg4: memref<2x16xf32, #tpu.memory_space<vmem>>) attributes {dimension_semantics = [#tpu.dimension_semantics<arbitrary>], iteration_bounds = array<i64: 1>, scalar_prefetch = 0 : i64, scratch_operands = 0 : i64, tpu.core_type = #tpu.core_type<tc>, window_params = [{pipeline_mode = #tpu.pipeline_mode<synchronous>, transform_indices = @transform_0, window_bounds = array<i64: 4096, 128>}, {pipeline_mode = #tpu.pipeline_mode<synchronous>, transform_indices = @transform_1, window_bounds = array<i64: 128, 32>}, {pipeline_mode = #tpu.pipeline_mode<synchronous>, transform_indices = @transform_2, window_bounds = array<i64: 69, 128>}, {pipeline_mode = #tpu.pipeline_mode<synchronous>, transform_indices = @transform_3, window_bounds = array<i64: 2, 16>}]} {
    %c0 = arith.constant 0 : index
    %c0_0 = arith.constant 0 : index
    %0 = vector.load %arg3[%c0, %c0_0] : memref<69x128xf32, #tpu.memory_space<vmem>>, vector<69x128xf32>
    %c0_1 = arith.constant 0 : index
    %c0_2 = arith.constant 0 : index
    %1 = vector.load %arg1[%c0_1, %c0_2] : memref<4096x128xbf16, #tpu.memory_space<vmem>>, vector<4096x128xbf16>
    %c0_3 = arith.constant 0 : index
    %c0_4 = arith.constant 0 : index
    %2 = vector.load %arg2[%c0_3, %c0_4] : memref<128x32xbf16, #tpu.memory_space<vmem>>, vector<128x32xbf16>
    %cst = arith.constant dense<0.000000e+00> : vector<4096x32xf32>
    %3 = tpu.matmul %1, %2, %cst {dimension_numbers = #tpu.dot_dimension_numbers<[1], [0], [0], [1], [0, 0, 1, 1], [], []>} : vector<4096x128xbf16>, vector<128x32xbf16>, vector<4096x32xf32> -> vector<4096x32xf32>
    %4 = vector.extract_strided_slice %0 {offsets = [64, 0], sizes = [1, 32], strides = [1, 1]} : vector<69x128xf32> to vector<1x32xf32>
    %5 = vector.broadcast %4 : vector<1x32xf32> to vector<4096x32xf32>
    %6 = arith.addf %3, %5 : vector<4096x32xf32>
    %cst_5 = arith.constant 0.000000e+00 : f32
    %7 = vector.broadcast %cst_5 : f32 to vector<4096x32xf32>
    %8 = arith.maximumf %6, %7 : vector<4096x32xf32>
    %9 = vector.shape_cast %8 : vector<4096x32xf32> to vector<16x256x32xf32>
    %cst_6 = arith.constant dense<0.000000e+00> : vector<16x32xf32>
    %10 = vector.multi_reduction <add>, %9, %cst_6 [1] : vector<16x256x32xf32> to vector<16x32xf32>
    %11 = vector.extract_strided_slice %0 {offsets = [0, 0], sizes = [32, 128], strides = [1, 1]} : vector<69x128xf32> to vector<32x128xf32>
    %12 = vector.extract_strided_slice %0 {offsets = [65, 0], sizes = [1, 128], strides = [1, 1]} : vector<69x128xf32> to vector<1x128xf32>
    %cst_7 = arith.constant dense<0.000000e+00> : vector<16x128xf32>
    %13 = tpu.matmul %10, %11, %cst_7 {dimension_numbers = #tpu.dot_dimension_numbers<[1], [0], [0], [1], [0, 0, 1, 1], [], []>} : vector<16x32xf32>, vector<32x128xf32>, vector<16x128xf32> -> vector<16x128xf32>
    %14 = vector.broadcast %12 : vector<1x128xf32> to vector<16x128xf32>
    %15 = arith.addf %13, %14 : vector<16x128xf32>
    %16 = vector.extract_strided_slice %15 {offsets = [0, 0], sizes = [16, 32], strides = [1, 1]} : vector<16x128xf32> to vector<16x32xf32>
    %17 = arith.negf %16 : vector<16x32xf32>
    %18 = math.exp %17 : vector<16x32xf32>
    %cst_8 = arith.constant 1.000000e+00 : f32
    %19 = vector.broadcast %cst_8 : f32 to vector<16x32xf32>
    %20 = arith.addf %19, %18 : vector<16x32xf32>
    %21 = arith.divf %19, %20 : vector<16x32xf32>
    %22 = vector.extract_strided_slice %15 {offsets = [0, 32], sizes = [16, 32], strides = [1, 1]} : vector<16x128xf32> to vector<16x32xf32>
    %23 = math.tanh %22 : vector<16x32xf32>
    %24 = vector.extract_strided_slice %15 {offsets = [0, 64], sizes = [16, 32], strides = [1, 1]} : vector<16x128xf32> to vector<16x32xf32>
    %25 = arith.negf %24 : vector<16x32xf32>
    %26 = math.exp %25 : vector<16x32xf32>
    %cst_9 = arith.constant 1.000000e+00 : f32
    %27 = vector.broadcast %cst_9 : f32 to vector<16x32xf32>
    %28 = arith.addf %27, %26 : vector<16x32xf32>
    %29 = arith.divf %27, %28 : vector<16x32xf32>
    %30 = arith.mulf %21, %23 : vector<16x32xf32>
    %31 = math.tanh %30 : vector<16x32xf32>
    %32 = arith.mulf %29, %31 : vector<16x32xf32>
    %33 = vector.shape_cast %32 : vector<16x32xf32> to vector<2x8x32xf32>
    %34 = vector.extract_strided_slice %0 {offsets = [66, 0], sizes = [1, 32], strides = [1, 1]} : vector<69x128xf32> to vector<1x32xf32>
    %35 = vector.extract_strided_slice %0 {offsets = [68, 0], sizes = [1, 1], strides = [1, 1]} : vector<69x128xf32> to vector<1x1xf32>
    %36 = vector.shape_cast %34 : vector<1x32xf32> to vector<1x1x32xf32>
    %37 = vector.broadcast %36 : vector<1x1x32xf32> to vector<2x8x32xf32>
    %38 = arith.mulf %33, %37 : vector<2x8x32xf32>
    %cst_10 = arith.constant dense<0.000000e+00> : vector<2x8xf32>
    %39 = vector.multi_reduction <add>, %38, %cst_10 [2] : vector<2x8x32xf32> to vector<2x8xf32>
    %40 = vector.shape_cast %39 : vector<2x8xf32> to vector<2x8x1xf32>
    %41 = vector.shape_cast %35 : vector<1x1xf32> to vector<1x1x1xf32>
    %42 = vector.broadcast %41 : vector<1x1x1xf32> to vector<2x8x1xf32>
    %43 = arith.addf %40, %42 : vector<2x8x1xf32>
    %44 = math.tanh %43 : vector<2x8x1xf32>
    %cst_11 = arith.constant dense<0xFF800000> : vector<2x1xf32>
    %45 = vector.multi_reduction <maximumf>, %44, %cst_11 [1] : vector<2x8x1xf32> to vector<2x1xf32>
    %46 = vector.shape_cast %45 : vector<2x1xf32> to vector<2x1x1xf32>
    %47 = vector.broadcast %46 : vector<2x1x1xf32> to vector<2x8x1xf32>
    %48 = arith.subf %44, %47 : vector<2x8x1xf32>
    %49 = math.exp %48 : vector<2x8x1xf32>
    %cst_12 = arith.constant dense<0.000000e+00> : vector<2x1xf32>
    %50 = vector.multi_reduction <add>, %49, %cst_12 [1] : vector<2x8x1xf32> to vector<2x1xf32>
    %51 = vector.shape_cast %50 : vector<2x1xf32> to vector<2x1x1xf32>
    %52 = vector.broadcast %51 : vector<2x1x1xf32> to vector<2x8x1xf32>
    %53 = arith.divf %49, %52 : vector<2x8x1xf32>
    %54 = vector.broadcast %53 : vector<2x8x1xf32> to vector<2x8x32xf32>
    %55 = arith.mulf %54, %33 : vector<2x8x32xf32>
    %cst_13 = arith.constant dense<0.000000e+00> : vector<2x32xf32>
    %56 = vector.multi_reduction <add>, %55, %cst_13 [1] : vector<2x8x32xf32> to vector<2x32xf32>
    %57 = vector.extract_strided_slice %0 {offsets = [32, 0], sizes = [32, 16], strides = [1, 1]} : vector<69x128xf32> to vector<32x16xf32>
    %58 = vector.extract_strided_slice %0 {offsets = [67, 0], sizes = [1, 16], strides = [1, 1]} : vector<69x128xf32> to vector<1x16xf32>
    %cst_14 = arith.constant dense<0.000000e+00> : vector<2x16xf32>
    %59 = tpu.matmul %56, %57, %cst_14 {dimension_numbers = #tpu.dot_dimension_numbers<[1], [0], [0], [1], [0, 0, 1, 1], [], []>} : vector<2x32xf32>, vector<32x16xf32>, vector<2x16xf32> -> vector<2x16xf32>
    %60 = vector.broadcast %58 : vector<1x16xf32> to vector<2x16xf32>
    %61 = arith.addf %59, %60 : vector<2x16xf32>
    %c0_15 = arith.constant 0 : index
    %c0_16 = arith.constant 0 : index
    %62 = vector.load %arg4[%c0_15, %c0_16] : memref<2x16xf32, #tpu.memory_space<vmem>>, vector<2x16xf32>
    tpu.vector_store %arg4[%c0_15, %c0_16], %61 {strides = array<i32>} : memref<2x16xf32, #tpu.memory_space<vmem>>, vector<2x16xf32>,
    return
  }
  func.func @transform_0(%arg0: i32) -> (i32, i32) {
    %c0_i32 = arith.constant 0 : i32
    %c0_i32_0 = arith.constant 0 : i32
    %c0_i32_1 = arith.constant 0 : i32
    return %c0_i32, %c0_i32_0 : i32, i32
  }
  func.func @transform_1(%arg0: i32) -> (i32, i32) {
    %c0_i32 = arith.constant 0 : i32
    %c0_i32_0 = arith.constant 0 : i32
    %c0_i32_1 = arith.constant 0 : i32
    return %c0_i32, %c0_i32_0 : i32, i32
  }
  func.func @transform_2(%arg0: i32) -> (i32, i32) {
    %c0_i32 = arith.constant 0 : i32
    %c0_i32_0 = arith.constant 0 : i32
    %c0_i32_1 = arith.constant 0 : i32
    return %c0_i32, %c0_i32_0 : i32, i32
  }
  func.func @transform_3(%arg0: i32) -> (i32, i32) {
    %c0_i32 = arith.constant 0 : i32
    %c0_i32_0 = arith.constant 0 : i32
    %c0_i32_1 = arith.constant 0 : i32
    return %c0_i32, %c0_i32_0 : i32, i32
  }
}

</mosaic_0001>

<bundles_post_ra>
// kernel: gradcam_forward.1
= control target key start
LH: loop header
LB: loop body
LE: loop exit
PB: predicated region body
PF: predicated region fallthrough
CT: control target
= control target key end

     0   :  { %s10343_s0 = inlined_call_operand.vmem [shape: bf16[4096,128], index: 0, kind: input, shape index: {}]   ;;  %s10344_s1 = inlined_call_operand.vmem [shape: bf16[128,32], index: 1, kind: input, shape index: {}]   ;;  %s10345_s2 = inlined_call_operand.vmem [shape: f32[69,128], index: 2, kind: input, shape index: {}]   ;;  %s10346_s3 = inlined_call_operand.hbm [shape: f32[2,16], index: 3, kind: output, shape index: {}]  }
   0x1   :  { %v7323_v0 = vld [vmem:[%s10344_s1] sm:$0xff]   ;;  %v7324_v1 = vld [vmem:[%s10344_s1 + $0x8] sm:$0xff]   ;;  %v7325_v2 = vld [vmem:[%s10344_s1 + $0x10] sm:$0xff]  }
   0x2   :  { %6734 = vmatprep.subr.bf16.mxu0 %v7323_v0  ;;  %7298 = vmatprep.subr.bf16.mxu1 %v7323_v0  ;;  %v7326_v3 = vld [vmem:[%s10344_s1 + $0x18] sm:$0xff]   ;;  %v7331_v4 = vld [vmem:[%s10343_s0] sm:$0xff]   ;;  %v7328_v6 = vld [vmem:[%s10344_s1 + $0x28] sm:$0xff]  }
   0x3   :  { %6735 = vmatpush3.bf16.msra.mxu0 %v7323_v0  ;;  %7306 = vmatpush3.bf16.msra.mxu1 %v7323_v0  ;;  %v7327_v5 = vld [vmem:[%s10344_s1 + $0x20] sm:$0xff]   ;;  %v7329_v7 = vld [vmem:[%s10344_s1 + $0x30] sm:$0xff]   ;;  %v7330_v8 = vld [vmem:[%s10344_s1 + $0x38] sm:$0xff]  }
   0x4   :  { %6736 = vmatprep.subr.bf16.mxu0 %v7324_v1  ;;  %7299 = vmatprep.subr.bf16.mxu1 %v7324_v1  ;;  %v7349_v9 = vld [vmem:[%s10343_s0 + $0x410] sm:$0xff]   ;;  %v7332_v10 = vld [vmem:[%s10343_s0 + $0x8] sm:$0xff]   ;;  %v7350_v12 = vld [vmem:[%s10343_s0 + $0x418] sm:$0xff]  }
   0x5   :  { %6750 = vmatprep.mubr.bf16.mxu0 %v7331_v4  ;;  %v7333_v11 = vld [vmem:[%s10343_s0 + $0x10] sm:$0xff]   ;;  %7010 = vmatprep.mubr.bf16.mxu1 %v7349_v9  ;;  %v7353_v13 = vld [vmem:[%s10343_s0 + $0x420] sm:$0xff]   ;;  %v7334_v14 = vld [vmem:[%s10343_s0 + $0x18] sm:$0xff]  }
   0x6   :  { %v7335_v15 = vld [vmem:[%s10343_s0 + $0x20] sm:$0xff]   ;;  %v7354_v16 = vld [vmem:[%s10343_s0 + $0x428] sm:$0xff]   ;;  %v7357_v17 = vld [vmem:[%s10343_s0 + $0x430] sm:$0xff]  }
   0x7   :  { %6737 = vmatpush3.bf16.msra.mxu0 %v7324_v1  ;;  %7307 = vmatpush3.bf16.msra.mxu1 %v7324_v1  ;;  %v7336_v18 = vld [vmem:[%s10343_s0 + $0x28] sm:$0xff]   ;;  %v7337_v19 = vld [vmem:[%s10343_s0 + $0x30] sm:$0xff]   ;;  %v7358_v20 = vld [vmem:[%s10343_s0 + $0x438] sm:$0xff]  }
   0x8   :  { %6738 = vmatprep.subr.bf16.mxu0 %v7325_v2  ;;  %7300 = vmatprep.subr.bf16.mxu1 %v7325_v2  ;;  %v7361_v21 = vld [vmem:[%s10343_s0 + $0x440] sm:$0xff]   ;;  %v7338_v22 = vld [vmem:[%s10343_s0 + $0x38] sm:$0xff]   ;;  %v7362_v24 = vld [vmem:[%s10343_s0 + $0x448] sm:$0xff]  }
   0x9   :  { %v7339_v23 = vld [vmem:[%s10343_s0 + $0x40] sm:$0xff]   ;;  %v7365_v25 = vld [vmem:[%s10343_s0 + $0x450] sm:$0xff]   ;;  %v7340_v26 = vld [vmem:[%s10343_s0 + $0x48] sm:$0xff]  }
   0xa   :  { %v7341_v27 = vld [vmem:[%s10343_s0 + $0x50] sm:$0xff]   ;;  %v7366_v28 = vld [vmem:[%s10343_s0 + $0x458] sm:$0xff]   ;;  %v7369_v29 = vld [vmem:[%s10343_s0 + $0x460] sm:$0xff]  }
   0xb   :  { %6739 = vmatpush3.bf16.msra.mxu0 %v7325_v2  ;;  %7308 = vmatpush3.bf16.msra.mxu1 %v7325_v2  ;;  %v7342_v30 = vld [vmem:[%s10343_s0 + $0x58] sm:$0xff]   ;;  %v7343_v31 = vld [vmem:[%s10343_s0 + $0x60] sm:$0xff]   ;;  %v7370_v32 = vld [vmem:[%s10343_s0 + $0x468] sm:$0xff]  }
   0xc   :  { %6740 = vmatprep.subr.bf16.mxu0 %v7326_v3  ;;  %7301 = vmatprep.subr.bf16.mxu1 %v7326_v3  ;;  %v7373_v33 = vld [vmem:[%s10343_s0 + $0x470] sm:$0xff]   ;;  %v7344_v34 = vld [vmem:[%s10343_s0 + $0x68] sm:$0xff]   ;;  %v7374_v36 = vld [vmem:[%s10343_s0 + $0x478] sm:$0xff]  }
   0xd   :  { %v7345_v35 = vld [vmem:[%s10343_s0 + $0x70] sm:$0xff]   ;;  %v7377_v37 = vld [vmem:[%s10343_s0 + $0x480] sm:$0xff]   ;;  %v7346_v38 = vld [vmem:[%s10343_s0 + $0x78] sm:$0xff]  }
   0xe   :  { %v7378_v39 = vld [vmem:[%s10343_s0 + $0x488] sm:$0xff]   ;;  %v7347_v40 = vld [vmem:[%s10343_s0 + $0x80] sm:$0xff]   ;;  %v7381_v41 = vld [vmem:[%s10343_s0 + $0x490] sm:$0xff]  }
   0xf   :  { %6741 = vmatpush3.bf16.msra.mxu0 %v7326_v3  ;;  %7309 = vmatpush3.bf16.msra.mxu1 %v7326_v3  ;;  %v7348_v42 = vld [vmem:[%s10343_s0 + $0x88] sm:$0xff]   ;;  %v7382_v43 = vld [vmem:[%s10343_s0 + $0x498] sm:$0xff]   ;;  %v7351_v44 = vld [vmem:[%s10343_s0 + $0x90] sm:$0xff]  }
  0x10   :  { %6742 = vmatprep.subr.bf16.mxu0 %v7327_v5  ;;  %7302 = vmatprep.subr.bf16.mxu1 %v7327_v5  ;;  %v7385_v45 = vld [vmem:[%s10343_s0 + $0x4a0] sm:$0xff]   ;;  %v7352_v46 = vld [vmem:[%s10343_s0 + $0x98] sm:$0xff]   ;;  %v7386_v47 = vld [vmem:[%s10343_s0 + $0x4a8] sm:$0xff]  }
  0x11   :  { %v7355_v48 = vld [vmem:[%s10343_s0 + $0xa0] sm:$0xff]   ;;  %v7389_v49 = vld [vmem:[%s10343_s0 + $0x4b0] sm:$0xff]   ;;  %v7356_v50 = vld [vmem:[%s10343_s0 + $0xa8] sm:$0xff]  }
  0x12   :  { %v7390_v51 = vld [vmem:[%s10343_s0 + $0x4b8] sm:$0xff]   ;;  %v7359_v52 = vld [vmem:[%s10343_s0 + $0xb0] sm:$0xff]   ;;  %v7393_v53 = vld [vmem:[%s10343_s0 + $0x4c0] sm:$0xff]  }
  0x13   :  { %6743 = vmatpush3.bf16.msra.mxu0 %v7327_v5  ;;  %7310 = vmatpush3.bf16.msra.mxu1 %v7327_v5  ;;  %v7360_v54 = vld [vmem:[%s10343_s0 + $0xb8] sm:$0xff]   ;;  %v7394_v55 = vld [vmem:[%s10343_s0 + $0x4c8] sm:$0xff]   ;;  %v7363_v56 = vld [vmem:[%s10343_s0 + $0xc0] sm:$0xff]  }
  0x14   :  { %6744 = vmatprep.subr.bf16.mxu0 %v7328_v6  ;;  %7303 = vmatprep.subr.bf16.mxu1 %v7328_v6  ;;  %v7397_v57 = vld [vmem:[%s10343_s0 + $0x4d0] sm:$0xff]   ;;  %v7364_v58 = vld [vmem:[%s10343_s0 + $0xc8] sm:$0xff]   ;;  %v7398_v59 = vld [vmem:[%s10343_s0 + $0x4d8] sm:$0xff]  }
  0x15   :  { %v7367_v60 = vld [vmem:[%s10343_s0 + $0xd0] sm:$0xff]   ;;  %v7401_v61 = vld [vmem:[%s10343_s0 + $0x4e0] sm:$0xff]   ;;  %v7368_v62 = vld [vmem:[%s10343_s0 + $0xd8] sm:$0xff]  }
  0x16   :  { %v7402_v63 = vld [vmem:[%s10343_s0 + $0x4e8] sm:$0xff]   ;;  %v7371_v0 = vld [vmem:[%s10343_s0 + $0xe0] sm:$0xff]   ;;  %v7405_v1 = vld [vmem:[%s10343_s0 + $0x4f0] sm:$0xff]  }
  0x17   :  { %6745 = vmatpush3.bf16.msra.mxu0 %v7328_v6  ;;  %7311 = vmatpush3.bf16.msra.mxu1 %v7328_v6  ;;  %v7372_v2 = vld [vmem:[%s10343_s0 + $0xe8] sm:$0xff]   ;;  %v7406_v3 = vld [vmem:[%s10343_s0 + $0x4f8] sm:$0xff]   ;;  %v7375_v4 = vld [vmem:[%s10343_s0 + $0xf0] sm:$0xff]  }
  0x18   :  { %6746 = vmatprep.subr.bf16.mxu0 %v7329_v7  ;;  %7304 = vmatprep.subr.bf16.mxu1 %v7329_v7  ;;  %v7409_v5 = vld [vmem:[%s10343_s0 + $0x500] sm:$0xff]   ;;  %v7376_v6 = vld [vmem:[%s10343_s0 + $0xf8] sm:$0xff]   ;;  %v7413_v9 = vld [vmem:[%s10343_s0 + $0x510] sm:$0xff]  }
  0x1b   :  { %6747 = vmatpush3.bf16.msra.mxu0 %v7329_v7  ;;  %7312 = vmatpush3.bf16.msra.mxu1 %v7329_v7  ;;  %v7410_v7 = vld [vmem:[%s10343_s0 + $0x508] sm:$0xff]  }
  0x1c   :  { %6748 = vmatprep.subr.bf16.mxu0 %v7330_v8  ;;  %7305 = vmatprep.subr.bf16.mxu1 %v7330_v8 }
  0x1f   :  { %6749 = vmatpush3.bf16.msra.mxu0 %v7330_v8  ;;  %7313 = vmatpush3.bf16.msra.mxu1 %v7330_v8  ;;  %v7379_v8 = vld [vmem:[%s10343_s0 + $0x100] sm:$0xff]  }
  0x22   :  { %6751 = vmatmul.mubr.bf16.vlgmr.msra.gmra.mrb[0].mxu0 %v7332_v10  ;;  %7011 = vmatmul.mubr.bf16.vlgmr.msra.gmra.mrb[0].mxu1 %v7350_v12  ;;  %v7380_v10 = vld [vmem:[%s10343_s0 + $0x108] sm:$0xff]   ;;  %v7383_v12 = vld [vmem:[%s10343_s0 + $0x110] sm:$0xff]  }
  0x23   :  { %6754 = vmatprep.mubr.bf16.mxu0 %v7333_v11  ;;  %7014 = vmatprep.mubr.bf16.mxu1 %v7353_v13  ;;  %v7414_v11 = vld [vmem:[%s10343_s0 + $0x518] sm:$0xff]   ;;  %v7417_v13 = vld [vmem:[%s10343_s0 + $0x520] sm:$0xff]  }
  0x2a   :  { %6755 = vmatmul.mubr.bf16.gmra.mrb[4].mxu0 %v7334_v14  ;;  %7015 = vmatmul.mubr.bf16.gmra.mrb[4].mxu1 %v7354_v16  ;;  %v7384_v14 = vld [vmem:[%s10343_s0 + $0x118] sm:$0xff]   ;;  %v7387_v16 = vld [vmem:[%s10343_s0 + $0x120] sm:$0xff]  }
  0x2b   :  { %6758 = vmatprep.mubr.bf16.mxu0 %v7335_v15  ;;  %7018 = vmatprep.mubr.bf16.mxu1 %v7357_v17  ;;  %v7418_v15 = vld [vmem:[%s10343_s0 + $0x528] sm:$0xff]   ;;  %v7421_v17 = vld [vmem:[%s10343_s0 + $0x530] sm:$0xff]  }
  0x32   :  { %6759 = vmatmul.mubr.bf16.gmra.mrb[8].mxu0 %v7336_v18  ;;  %7019 = vmatmul.mubr.bf16.gmra.mrb[8].mxu1 %v7358_v20  ;;  %v7388_v18 = vld [vmem:[%s10343_s0 + $0x128] sm:$0xff]   ;;  %v7391_v20 = vld [vmem:[%s10343_s0 + $0x130] sm:$0xff]  }
  0x33   :  { %6762 = vmatprep.mubr.bf16.mxu0 %v7337_v19  ;;  %7022 = vmatprep.mubr.bf16.mxu1 %v7361_v21  ;;  %v7422_v19 = vld [vmem:[%s10343_s0 + $0x538] sm:$0xff]   ;;  %v7425_v21 = vld [vmem:[%s10343_s0 + $0x540] sm:$0xff]  }
  0x3a   :  { %6763 = vmatmul.mubr.bf16.gmra.mrb[12].mxu0 %v7338_v22  ;;  %7023 = vmatmul.mubr.bf16.gmra.mrb[12].mxu1 %v7362_v24  ;;  %v7392_v22 = vld [vmem:[%s10343_s0 + $0x138] sm:$0xff]   ;;  %v7395_v24 = vld [vmem:[%s10343_s0 + $0x140] sm:$0xff]  }
  0x3b   :  { %6766 = vmatprep.mubr.bf16.mxu0 %v7339_v23  ;;  %7026 = vmatprep.mubr.bf16.mxu1 %v7365_v25  ;;  %v7426_v23 = vld [vmem:[%s10343_s0 + $0x548] sm:$0xff]   ;;  %v7429_v25 = vld [vmem:[%s10343_s0 + $0x550] sm:$0xff]  }
  0x42   :  { %6767 = vmatmul.mubr.bf16.gmra.mrb[16].mxu0 %v7340_v26  ;;  %7027 = vmatmul.mubr.bf16.gmra.mrb[16].mxu1 %v7366_v28  ;;  %v7396_v26 = vld [vmem:[%s10343_s0 + $0x148] sm:$0xff]   ;;  %v7399_v28 = vld [vmem:[%s10343_s0 + $0x150] sm:$0xff]  }
  0x43   :  { %6770 = vmatprep.mubr.bf16.mxu0 %v7341_v27  ;;  %7030 = vmatprep.mubr.bf16.mxu1 %v7369_v29  ;;  %v7430_v27 = vld [vmem:[%s10343_s0 + $0x558] sm:$0xff]   ;;  %v7433_v29 = vld [vmem:[%s10343_s0 + $0x560] sm:$0xff]  }
  0x4a   :  { %6771 = vmatmul.mubr.bf16.gmra.mrb[20].mxu0 %v7342_v30  ;;  %7031 = vmatmul.mubr.bf16.gmra.mrb[20].mxu1 %v7370_v32  ;;  %v7400_v30 = vld [vmem:[%s10343_s0 + $0x158] sm:$0xff]   ;;  %v7403_v32 = vld [vmem:[%s10343_s0 + $0x160] sm:$0xff]  }
  0x4b   :  { %6774 = vmatprep.mubr.bf16.mxu0 %v7343_v31  ;;  %7034 = vmatprep.mubr.bf16.mxu1 %v7373_v33  ;;  %v7434_v31 = vld [vmem:[%s10343_s0 + $0x568] sm:$0xff]   ;;  %v7437_v33 = vld [vmem:[%s10343_s0 + $0x570] sm:$0xff]  }
  0x52   :  { %6775 = vmatmul.mubr.bf16.gmra.mrb[24].mxu0 %v7344_v34  ;;  %7035 = vmatmul.mubr.bf16.gmra.mrb[24].mxu1 %v7374_v36  ;;  %v7404_v34 = vld [vmem:[%s10343_s0 + $0x168] sm:$0xff]   ;;  %v7407_v36 = vld [vmem:[%s10343_s0 + $0x170] sm:$0xff]  }
  0x53   :  { %6778 = vmatprep.mubr.bf16.mxu0 %v7345_v35  ;;  %7038 = vmatprep.mubr.bf16.mxu1 %v7377_v37  ;;  %v7438_v35 = vld [vmem:[%s10343_s0 + $0x578] sm:$0xff]   ;;  %v7441_v37 = vld [vmem:[%s10343_s0 + $0x580] sm:$0xff]  }
  0x5a   :  { %6779 = vmatmul.mubr.bf16.gmra.mrb[28].mxu0 %v7346_v38  ;;  %7039 = vmatmul.mubr.bf16.gmra.mrb[28].mxu1 %v7378_v39  ;;  %v7408_v38 = vld [vmem:[%s10343_s0 + $0x178] sm:$0xff]   ;;  %v7442_v39 = vld [vmem:[%s10343_s0 + $0x588] sm:$0xff]  }
  0x5b   :  { %6782 = vmatprep.mubr.bf16.mxu0 %v7347_v40  ;;  %7042 = vmatprep.mubr.bf16.mxu1 %v7381_v41  ;;  %v7411_v40 = vld [vmem:[%s10343_s0 + $0x180] sm:$0xff]   ;;  %v7445_v41 = vld [vmem:[%s10343_s0 + $0x590] sm:$0xff]  }
  0x62   :  { %6783 = vmatmul.mubr.bf16.gmra.mrb[32].mxu0 %v7348_v42  ;;  %7043 = vmatmul.mubr.bf16.gmra.mrb[32].mxu1 %v7382_v43  ;;  %v7412_v42 = vld [vmem:[%s10343_s0 + $0x188] sm:$0xff]   ;;  %v7446_v43 = vld [vmem:[%s10343_s0 + $0x598] sm:$0xff]  }
  0x63   :  { %6786 = vmatprep.mubr.bf16.mxu0 %v7351_v44  ;;  %7046 = vmatprep.mubr.bf16.mxu1 %v7385_v45  ;;  %v16_v44 = vld [vmem:[%s10345_s2] sm:$0xff]  ;;  %v17_v45 = vld [vmem:[%s10345_s2 + $0x8] sm:$0xff] }
  0x6a   :  { %6787 = vmatmul.mubr.bf16.gmra.mrb[36].mxu0 %v7352_v46  ;;  %7047 = vmatmul.mubr.bf16.gmra.mrb[36].mxu1 %v7386_v47  ;;  %v7415_v46 = vld [vmem:[%s10343_s0 + $0x190] sm:$0xff]   ;;  %v7284_v47 = vpack.c.bf16 %v17_v45, %v16_v44 }
  0x6b   :  { %6790 = vmatprep.mubr.bf16.mxu0 %v7355_v48  ;;  %7050 = vmatprep.mubr.bf16.mxu1 %v7389_v49  ;;  %v7449_v48 = vld [vmem:[%s10343_s0 + $0x5a0] sm:$0xff]  }
  0x6c   :  { %7285 = vmatprep.subr.bf16.mxu1 %v7284_v47 }
  0x6d   :  { %7287 = vmatpush3.bf16.msra.mxu1 %v7284_v47 }
  0x72   :  { %6791 = vmatmul.mubr.bf16.gmra.mrb[40].mxu0 %v7356_v50  ;;  %7051 = vmatmul.mubr.bf16.gmra.mrb[40].mxu1 %v7390_v51 }
  0x73   :  { %6794 = vmatprep.mubr.bf16.mxu0 %v7359_v52  ;;  %7054 = vmatprep.mubr.bf16.mxu1 %v7393_v53 }
  0x7a   :  { %6795 = vmatmul.mubr.bf16.gmra.mrb[44].mxu0 %v7360_v54  ;;  %7055 = vmatmul.mubr.bf16.gmra.mrb[44].mxu1 %v7394_v55 }
  0x7b   :  { %6798 = vmatprep.mubr.bf16.mxu0 %v7363_v56  ;;  %7058 = vmatprep.mubr.bf16.mxu1 %v7397_v57 }
  0x82   :  { %6799 = vmatmul.mubr.bf16.gmra.mrb[48].mxu0 %v7364_v58  ;;  %7059 = vmatmul.mubr.bf16.gmra.mrb[48].mxu1 %v7398_v59 }
  0x83   :  { %6802 = vmatprep.mubr.bf16.mxu0 %v7367_v60  ;;  %7062 = vmatprep.mubr.bf16.mxu1 %v7401_v61 }
  0x8a   :  { %6803 = vmatmul.mubr.bf16.gmra.mrb[52].mxu0 %v7368_v62  ;;  %7063 = vmatmul.mubr.bf16.gmra.mrb[52].mxu1 %v7402_v63 }
  0x8b   :  { %6806 = vmatprep.mubr.bf16.mxu0 %v7371_v0  ;;  %7066 = vmatprep.mubr.bf16.mxu1 %v7405_v1 }
  0x92   :  { %6807 = vmatmul.mubr.bf16.gmra.mrb[56].mxu0 %v7372_v2  ;;  %7067 = vmatmul.mubr.bf16.gmra.mrb[56].mxu1 %v7406_v3 }
  0x93   :  { %6810 = vmatprep.mubr.bf16.mxu0 %v7375_v4  ;;  %7070 = vmatprep.mubr.bf16.mxu1 %v7409_v5 }
  0x9a   :  { %6811 = vmatmul.mubr.bf16.gmra.mrb[60].mxu0 %v7376_v6  ;;  %7071 = vmatmul.mubr.bf16.gmra.mrb[60].mxu1 %v7410_v7 }
  0x9b   :  { %6814 = vmatprep.mubr.bf16.mxu0 %v7379_v8  ;;  %7074 = vmatprep.mubr.bf16.mxu1 %v7413_v9 }
  0xa2   :  { %6815 = vmatmul.mubr.bf16.gmra.mrb[64].mxu0 %v7380_v10  ;;  %7075 = vmatmul.mubr.bf16.gmra.mrb[64].mxu1 %v7414_v11 }
  0xa3   :  { %6818 = vmatprep.mubr.bf16.mxu0 %v7383_v12  ;;  %7078 = vmatprep.mubr.bf16.mxu1 %v7417_v13 }
  0xaa   :  { %6819 = vmatmul.mubr.bf16.gmra.mrb[68].mxu0 %v7384_v14  ;;  %7079 = vmatmul.mubr.bf16.gmra.mrb[68].mxu1 %v7418_v15 }
  0xab   :  { %6822 = vmatprep.mubr.bf16.mxu0 %v7387_v16  ;;  %7082 = vmatprep.mubr.bf16.mxu1 %v7421_v17 }
  0xb2   :  { %6823 = vmatmul.mubr.bf16.gmra.mrb[72].mxu0 %v7388_v18  ;;  %7083 = vmatmul.mubr.bf16.gmra.mrb[72].mxu1 %v7422_v19 }
  0xb3   :  { %6826 = vmatprep.mubr.bf16.mxu0 %v7391_v20  ;;  %7086 = vmatprep.mubr.bf16.mxu1 %v7425_v21 }
  0xba   :  { %6827 = vmatmul.mubr.bf16.gmra.mrb[76].mxu0 %v7392_v22  ;;  %7087 = vmatmul.mubr.bf16.gmra.mrb[76].mxu1 %v7426_v23 }
  0xbb   :  { %6830 = vmatprep.mubr.bf16.mxu0 %v7395_v24  ;;  %7090 = vmatprep.mubr.bf16.mxu1 %v7429_v25 }
  0xc2   :  { %6831 = vmatmul.mubr.bf16.gmra.mrb[80].mxu0 %v7396_v26  ;;  %7091 = vmatmul.mubr.bf16.gmra.mrb[80].mxu1 %v7430_v27 }
  0xc3   :  { %6834 = vmatprep.mubr.bf16.mxu0 %v7399_v28  ;;  %7094 = vmatprep.mubr.bf16.mxu1 %v7433_v29 }
  0xca   :  { %6835 = vmatmul.mubr.bf16.gmra.mrb[84].mxu0 %v7400_v30  ;;  %7095 = vmatmul.mubr.bf16.gmra.mrb[84].mxu1 %v7434_v31 }
  0xcb   :  { %6838 = vmatprep.mubr.bf16.mxu0 %v7403_v32  ;;  %7098 = vmatprep.mubr.bf16.mxu1 %v7437_v33 }
  0xd2   :  { %6839 = vmatmul.mubr.bf16.gmra.mrb[88].mxu0 %v7404_v34  ;;  %7099 = vmatmul.mubr.bf16.gmra.mrb[88].mxu1 %v7438_v35 }
  0xd3   :  { %6842 = vmatprep.mubr.bf16.mxu0 %v7407_v36  ;;  %7102 = vmatprep.mubr.bf16.mxu1 %v7441_v37 }
  0xda   :  { %6843 = vmatmul.mubr.bf16.gmra.mrb[92].mxu0 %v7408_v38  ;;  %7103 = vmatmul.mubr.bf16.gmra.mrb[92].mxu1 %v7442_v39 }
  0xdb   :  { %6846 = vmatprep.mubr.bf16.mxu0 %v7411_v40  ;;  %7106 = vmatprep.mubr.bf16.mxu1 %v7445_v41 }
  0xe2   :  { %6847 = vmatmul.mubr.bf16.gmra.mrb[96].mxu0 %v7412_v42  ;;  %7107 = vmatmul.mubr.bf16.gmra.mrb[96].mxu1 %v7446_v43 }
  0xe3   :  { %6850 = vmatprep.mubr.bf16.mxu0 %v7415_v46  ;;  %7110 = vmatprep.mubr.bf16.mxu1 %v7449_v48 }
  0xe4   :  { %8 = vsyncpa [#allocation3], 0  ;;  %v7416_v49 = vld [vmem:[%s10343_s0 + $0x198] sm:$0xff]   ;;  %v7450_v50 = vld [vmem:[%s10343_s0 + $0x5a8] sm:$0xff]   ;;  %v553_v52 = vlaneseq  ;;  %vm4734_vm0 = vcmask 261120   ;;  %vm5859_vm1 = vcmask 1041409  }
  0xe5   :  { %v7419_v51 = vld [vmem:[%s10343_s0 + $0x1a0] sm:$0xff]   ;;  %v7453_v53 = vld [vmem:[%s10343_s0 + $0x5b0] sm:$0xff]   ;;  %v7420_v55 = vld [vmem:[%s10343_s0 + $0x1a8] sm:$0xff]   ;;  %vm5861_vm2 = vcmask 1042434   ;;  %vm5863_vm3 = vcmask 1043459   ;;  %vm5865_vm4 = vcmask 1044484  }
  0xe6   :  { %v8015_v54 = vshrl.u32 %v553_v52, 7  ;;  %v7454_v56 = vld [vmem:[%s10343_s0 + $0x5b8] sm:$0xff]   ;;  %v7423_v58 = vld [vmem:[%s10343_s0 + $0x1b0] sm:$0xff]   ;;  %v7457_v59 = vld [vmem:[%s10343_s0 + $0x5c0] sm:$0xff]   ;;  %vm5867_vm5 = vcmask 1045509   ;;  %vm5869_vm6 = vcmask 1046534  }
  0xe7   :  { %v24_v60 = vld [vmem:[%s10345_s2 + $0x40] sm:$0x1f]  ;;  %v7424_v1 = vld [vmem:[%s10343_s0 + $0x1b8] sm:$0xff]   ;;  %v7458_v2 = vld [vmem:[%s10343_s0 + $0x5c8] sm:$0xff]   ;;  %vm5871_vm7 = vcmask 1047559   ;;  %s7640_s19 = smov 96  }
  0xe8   :  { %10354 = vst [vmem:[#allocation5_spill] sm:$0xff] %v8015_v54  ;;  %v555_v57 = vsub.s32 0, %v8015_v54  ;;  %v7427_v7 = vld [vmem:[%s10343_s0 + $0x1c0] sm:$0xff]   ;;  %v7461_v9 = vld [vmem:[%s10343_s0 + $0x5d0] sm:$0xff]   ;;  %v7428_v24 = vld [vmem:[%s10343_s0 + $0x1c8] sm:$0xff]   ;;  %s7641_s20 = smov 64  }
  0xe9   :  { %v7462_v25 = vld [vmem:[%s10343_s0 + $0x5d8] sm:$0xff]   ;;  %v7431_v31 = vld [vmem:[%s10343_s0 + $0x1d0] sm:$0xff]   ;;  %v7465_v33 = vld [vmem:[%s10343_s0 + $0x5e0] sm:$0xff]   ;;  %vm6027_vm8 = vcmask 7168   ;;  %vm7644_vm9 = vmmov 0   ;;  %vm6078_vm10 = vcmask 785920  }
  0xea   :  { %6851 = vmatmul.mubr.bf16.gmra.mrb[100].mxu0 %v7416_v49  ;;  %7111 = vmatmul.mubr.bf16.gmra.mrb[100].mxu1 %v7450_v50  ;;  %v8033_v61 = vrot.slane %v24_v60, %v555_v57  ;;  %v7432_v52 = vld [vmem:[%s10343_s0 + $0x1d8] sm:$0xff]   ;;  %v7435_v60 = vld [vmem:[%s10343_s0 + $0x1e0] sm:$0xff]   ;;  %vm6174_vm11 = vcmask 123904  }
  0xeb   :  { %6854 = vmatprep.mubr.bf16.mxu0 %v7419_v51  ;;  %7114 = vmatprep.mubr.bf16.mxu1 %v7453_v53  ;;  %v7466_v53 = vld [vmem:[%s10343_s0 + $0x5e8] sm:$0xff]  }
  0xf2   :  { %6855 = vmatmul.mubr.bf16.gmra.mrb[104].mxu0 %v7420_v55  ;;  %7115 = vmatmul.mubr.bf16.gmra.mrb[104].mxu1 %v7454_v56 }
  0xf3   :  { %6858 = vmatprep.mubr.bf16.mxu0 %v7423_v58  ;;  %7118 = vmatprep.mubr.bf16.mxu1 %v7457_v59 }
  0xf5   :  { %v6752_v62 = vpop.f32.mrb[0].mxu0  ;;  %v8035_v63 = vpop.f32.mrb[0].mxu1 }
  0xf6   :  { %v2175_v0 = vpop.f32.mrb[1].mxu0  ;;  %v8043_v3 = vpop.f32.mrb[1].mxu1  ;;  %v2184_v4 = vadd.f32 %v6752_v62, %v8033_v61 }
  0xf7   :  { %v2176_v5 = vadd.f32 %v2175_v0, %v8033_v61  ;;  %v6753_v6 = vpop.f32.mrb[2].mxu0  ;;  %v8050_v8 = vpop.f32.mrb[2].mxu1  ;;  %v7469_v0 = vld [vmem:[%s10343_s0 + $0x5f0] sm:$0xff]  }
  0xf8   :  { %v2178_v10 = vpop.f32.mrb[3].mxu0  ;;  %v8055_v11 = vpop.f32.mrb[3].mxu1  ;;  %v2187_v13 = vadd.f32 %v6753_v6, %v8033_v61  ;;  %v4224_v15 = vmax.f32 %v2184_v4, 0.0 }
  0xf9   :  { %v4222_v12 = vmax.f32 %v2176_v5, 0.0  ;;  %v2179_v14 = vadd.f32 %v2178_v10, %v8033_v61 }
  0xfa   :  { %6859 = vmatmul.mubr.bf16.gmra.mrb[108].mxu0 %v7424_v1  ;;  %7119 = vmatmul.mubr.bf16.gmra.mrb[108].mxu1 %v7458_v2  ;;  %v4225_v18 = vmax.f32 %v2187_v13, 0.0  ;;  %v4738_v27 = vsel %vm4734_vm0, %v4224_v15, 0.0 }
  0xfb   :  { %v4223_v16 = vmax.f32 %v2179_v14, 0.0  ;;  %6862 = vmatprep.mubr.bf16.mxu0 %v7427_v7  ;;  %7122 = vmatprep.mubr.bf16.mxu1 %v7461_v9  ;;  %v4735_v17 = vsel %vm4734_vm0, %v4222_v12, 0.0 }
  0xfc   :  { %v4740_v37 = vsel %vm4734_vm0, %v4225_v18, 0.0 }
  0xfd   :  { %v4736_v19 = vsel %vm4734_vm0, %v4223_v16, 0.0  ;;  %v6756_v20 = vpop.f32.mrb[4].mxu0  ;;  %v8061_v21 = vpop.f32.mrb[4].mxu1 }
  0xfe   :  { %v4737_v22 = vadd.f32 %v4736_v19, %v4735_v17  ;;  %v2191_v23 = vpop.f32.mrb[5].mxu0  ;;  %v8069_v26 = vpop.f32.mrb[5].mxu1  ;;  %v2200_v28 = vadd.f32 %v6756_v20, %v8033_v61 }
  0xff   :  { %v2192_v29 = vadd.f32 %v2191_v23, %v8033_v61  ;;  %v6757_v30 = vpop.f32.mrb[6].mxu0  ;;  %v8077_v32 = vpop.f32.mrb[6].mxu1  ;;  %v7436_v23 = vld [vmem:[%s10343_s0 + $0x1e8] sm:$0xff]  }
 0x100   :  { %v4739_v34 = vadd.f32 %v4738_v27, %v4737_v22  ;;  %v2194_v35 = vpop.f32.mrb[7].mxu0  ;;  %v8082_v36 = vpop.f32.mrb[7].mxu1  ;;  %v2203_v39 = vadd.f32 %v6757_v30, %v8033_v61  ;;  %v4228_v42 = vmax.f32 %v2200_v28, 0.0 }
 0x101   :  { %v4226_v38 = vmax.f32 %v2192_v29, 0.0  ;;  %v2195_v40 = vadd.f32 %v2194_v35, %v8033_v61 }
 0x102   :  { %v4741_v41 = vadd.f32 %v4740_v37, %v4739_v34  ;;  %6863 = vmatmul.mubr.bf16.gmra.mrb[112].mxu0 %v7428_v24  ;;  %7123 = vmatmul.mubr.bf16.gmra.mrb[112].mxu1 %v7462_v25  ;;  %v4229_v46 = vmax.f32 %v2203_v39, 0.0  ;;  %v4746_v56 = vsel %vm4734_vm0, %v4228_v42, 0.0  ;;  %v7470_v24 = vld [vmem:[%s10343_s0 + $0x5f8] sm:$0xff]   ;;  %v7473_v34 = vld [vmem:[%s10343_s0 + $0x600] sm:$0xff]  }
 0x103   :  { %v4742_v43 = vsel %vm4734_vm0, %v4226_v38, 0.0  ;;  %v4227_v44 = vmax.f32 %v2195_v40, 0.0  ;;  %6866 = vmatprep.mubr.bf16.mxu0 %v7431_v31  ;;  %7126 = vmatprep.mubr.bf16.mxu1 %v7465_v33  ;;  %v7439_v31 = vld [vmem:[%s10343_s0 + $0x1f0] sm:$0xff]  }
 0x104   :  { %v4743_v45 = vadd.f32 %v4742_v43, %v4741_v41  ;;  %v4748_v5 = vsel %vm4734_vm0, %v4229_v46, 0.0 }
 0x105   :  { %v4744_v47 = vsel %vm4734_vm0, %v4227_v44, 0.0  ;;  %v6760_v48 = vpop.f32.mrb[8].mxu0  ;;  %v8089_v49 = vpop.f32.mrb[8].mxu1 }
 0x106   :  { %v4745_v50 = vadd.f32 %v4744_v47, %v4743_v45  ;;  %v2207_v51 = vpop.f32.mrb[9].mxu0  ;;  %v8097_v55 = vpop.f32.mrb[9].mxu1  ;;  %v2216_v57 = vadd.f32 %v6760_v48, %v8033_v61 }
 0x107   :  { %v2208_v58 = vadd.f32 %v2207_v51, %v8033_v61  ;;  %v6761_v59 = vpop.f32.mrb[10].mxu0  ;;  %v8105_v62 = vpop.f32.mrb[10].mxu1 }
 0x108   :  { %10355 = vst [vmem:[#allocation6_spill] sm:$0xff] %v8105_v62  ;;  %v4747_v1 = vadd.f32 %v4746_v56, %v4745_v50  ;;  %v2210_v2 = vpop.f32.mrb[11].mxu0  ;;  %v8110_v4 = vpop.f32.mrb[11].mxu1  ;;  %v2219_v7 = vadd.f32 %v6761_v59, %v8033_v61  ;;  %v4232_v12 = vmax.f32 %v2216_v57, 0.0  ;;  %v7440_v57 = vld [vmem:[%s10343_s0 + $0x1f8] sm:$0xff]  }
 0x109   :  { %v4230_v6 = vmax.f32 %v2208_v58, 0.0  ;;  %v2211_v9 = vadd.f32 %v2210_v2, %v8033_v61  ;;  %v7474_v58 = vld [vmem:[%s10343_s0 + $0x608] sm:$0xff]  }
 0x10a   :  { %v4749_v10 = vadd.f32 %v4748_v5, %v4747_v1  ;;  %6867 = vmatmul.mubr.bf16.gmra.mrb[116].mxu0 %v7432_v52  ;;  %7127 = vmatmul.mubr.bf16.gmra.mrb[116].mxu1 %v7466_v53  ;;  %v4233_v16 = vmax.f32 %v2219_v7, 0.0  ;;  %v4754_v27 = vsel %vm4734_vm0, %v4232_v12, 0.0  ;;  %v7443_v5 = vld [vmem:[%s10343_s0 + $0x200] sm:$0xff]   ;;  %v7477_v7 = vld [vmem:[%s10343_s0 + $0x610] sm:$0xff]  }
 0x10b   :  { %v4750_v13 = vsel %vm4734_vm0, %v4230_v6, 0.0  ;;  %v4231_v14 = vmax.f32 %v2211_v9, 0.0  ;;  %6870 = vmatprep.mubr.bf16.mxu0 %v7435_v60  ;;  %7130 = vmatprep.mubr.bf16.mxu1 %v7469_v0 }
 0x10c   :  { %v4751_v15 = vadd.f32 %v4750_v13, %v4749_v10  ;;  %v4756_v39 = vsel %vm4734_vm0, %v4233_v16, 0.0 }
 0x10d   :  { %v4752_v17 = vsel %vm4734_vm0, %v4231_v14, 0.0  ;;  %v6764_v18 = vpop.f32.mrb[12].mxu0  ;;  %v8117_v19 = vpop.f32.mrb[12].mxu1 }
 0x10e   :  { %10356 = vst [vmem:[#allocation7_spill] sm:$0xff] %v8117_v19  ;;  %v4753_v20 = vadd.f32 %v4752_v17, %v4751_v15  ;;  %v2223_v22 = vpop.f32.mrb[13].mxu0  ;;  %v8125_v25 = vpop.f32.mrb[13].mxu1  ;;  %v2232_v28 = vadd.f32 %v6764_v18, %v8033_v61 }
 0x10f   :  { %10357 = vst [vmem:[#allocation8_spill] sm:$0xff] %v8125_v25  ;;  %v2224_v29 = vadd.f32 %v2223_v22, %v8033_v61  ;;  %v6765_v30 = vpop.f32.mrb[14].mxu0  ;;  %v8133_v33 = vpop.f32.mrb[14].mxu1 }
 0x110   :  { %10358 = vst [vmem:[#allocation9_spill] sm:$0xff] %v8133_v33  ;;  %v4755_v35 = vadd.f32 %v4754_v27, %v4753_v20  ;;  %v2226_v37 = vpop.f32.mrb[15].mxu0  ;;  %v8138_v38 = vpop.f32.mrb[15].mxu1  ;;  %v2235_v41 = vadd.f32 %v6765_v30, %v8033_v61  ;;  %v4236_v44 = vmax.f32 %v2232_v28, 0.0 }
 0x111   :  { %10359 = vst [vmem:[#allocation10_spill] sm:$0xff] %v8138_v38  ;;  %v4234_v40 = vmax.f32 %v2224_v29, 0.0  ;;  %v2227_v42 = vadd.f32 %v2226_v37, %v8033_v61 }
 0x112   :  { %v4757_v43 = vadd.f32 %v4756_v39, %v4755_v35  ;;  %6871 = vmatmul.mubr.bf16.gmra.mrb[120].mxu0 %v7436_v23  ;;  %7131 = vmatmul.mubr.bf16.gmra.mrb[120].mxu1 %v7470_v24  ;;  %v4237_v48 = vmax.f32 %v2235_v41, 0.0  ;;  %v4762_v60 = vsel %vm4734_vm0, %v4236_v44, 0.0  ;;  %v7478_v35 = vld [vmem:[%s10343_s0 + $0x618] sm:$0xff]  }
 0x113   :  { %v4758_v45 = vsel %vm4734_vm0, %v4234_v40, 0.0  ;;  %v4235_v46 = vmax.f32 %v2227_v42, 0.0  ;;  %6874 = vmatprep.mubr.bf16.mxu0 %v7439_v31  ;;  %7134 = vmatprep.mubr.bf16.mxu1 %v7473_v34  ;;  %v7444_v34 = vld [vmem:[%s10343_s0 + $0x208] sm:$0xff]  }
 0x114   :  { %v4759_v47 = vadd.f32 %v4758_v45, %v4757_v43  ;;  %v4764_v13 = vsel %vm4734_vm0, %v4237_v48, 0.0  ;;  %v7447_v43 = vld [vmem:[%s10343_s0 + $0x210] sm:$0xff]   ;;  %v7481_v45 = vld [vmem:[%s10343_s0 + $0x620] sm:$0xff]  }
 0x115   :  { %v4760_v50 = vsel %vm4734_vm0, %v4235_v46, 0.0  ;;  %v6768_v51 = vpop.f32.mrb[16].mxu0  ;;  %v8145_v52 = vpop.f32.mrb[16].mxu1 }
 0x116   :  { %10360 = vst [vmem:[#allocation11_spill] sm:$0xff] %v8145_v52  ;;  %v4761_v53 = vadd.f32 %v4760_v50, %v4759_v47  ;;  %v2239_v56 = vpop.f32.mrb[17].mxu0  ;;  %v8153_v59 = vpop.f32.mrb[17].mxu1  ;;  %v2248_v0 = vadd.f32 %v6768_v51, %v8033_v61 }
 0x117   :  { %10361 = vst [vmem:[#allocation12_spill] sm:$0xff] %v8153_v59  ;;  %v2240_v1 = vadd.f32 %v2239_v56, %v8033_v61  ;;  %v6769_v2 = vpop.f32.mrb[18].mxu0  ;;  %v8161_v6 = vpop.f32.mrb[18].mxu1 }
 0x118   :  { %10362 = vst [vmem:[#allocation13_spill] sm:$0xff] %v8161_v6  ;;  %v4763_v9 = vadd.f32 %v4762_v60, %v4761_v53  ;;  %v2242_v10 = vpop.f32.mrb[19].mxu0  ;;  %v8166_v12 = vpop.f32.mrb[19].mxu1  ;;  %v2251_v15 = vadd.f32 %v6769_v2, %v8033_v61  ;;  %v4240_v18 = vmax.f32 %v2248_v0, 0.0 }
 0x119   :  { %10363 = vst [vmem:[#allocation14_spill] sm:$0xff] %v8166_v12  ;;  %v4238_v14 = vmax.f32 %v2240_v1, 0.0  ;;  %v2243_v16 = vadd.f32 %v2242_v10, %v8033_v61 }
 0x11a   :  { %v4765_v17 = vadd.f32 %v4764_v13, %v4763_v9  ;;  %6875 = vmatmul.mubr.bf16.gmra.mrb[124].mxu0 %v7440_v57  ;;  %7135 = vmatmul.mubr.bf16.gmra.mrb[124].mxu1 %v7474_v58  ;;  %v4241_v24 = vmax.f32 %v2251_v15, 0.0  ;;  %v4770_v39 = vsel %vm4734_vm0, %v4240_v18, 0.0 }
 0x11b   :  { %v4766_v20 = vsel %vm4734_vm0, %v4238_v14, 0.0  ;;  %v4239_v22 = vmax.f32 %v2243_v16, 0.0  ;;  %6878 = vmatprep.mubr.bf16.mxu0 %v7443_v5  ;;  %7138 = vmatprep.mubr.bf16.mxu1 %v7477_v7  ;;  %v7448_v14 = vld [vmem:[%s10343_s0 + $0x218] sm:$0xff]   ;;  %v7482_v16 = vld [vmem:[%s10343_s0 + $0x628] sm:$0xff]  }
 0x11c   :  { %v4767_v23 = vadd.f32 %v4766_v20, %v4765_v17  ;;  %v4772_v50 = vsel %vm4734_vm0, %v4241_v24, 0.0 }
 0x11d   :  { %v4768_v27 = vsel %vm4734_vm0, %v4239_v22, 0.0  ;;  %v6772_v28 = vpop.f32.mrb[20].mxu0  ;;  %v8173_v29 = vpop.f32.mrb[20].mxu1 }
 0x11e   :  { %10364 = vst [vmem:[#allocation15_spill] sm:$0xff] %v8173_v29  ;;  %v4769_v30 = vadd.f32 %v4768_v27, %v4767_v23  ;;  %v2255_v31 = vpop.f32.mrb[21].mxu0  ;;  %v8181_v37 = vpop.f32.mrb[21].mxu1  ;;  %v2264_v40 = vadd.f32 %v6772_v28, %v8033_v61  ;;  %v7451_v23 = vld [vmem:[%s10343_s0 + $0x220] sm:$0xff]   ;;  %v7485_v27 = vld [vmem:[%s10343_s0 + $0x630] sm:$0xff]  }
 0x11f   :  { %10365 = vst [vmem:[#allocation16_spill] sm:$0xff] %v8181_v37  ;;  %v2256_v41 = vadd.f32 %v2255_v31, %v8033_v61  ;;  %v6773_v42 = vpop.f32.mrb[22].mxu0  ;;  %v8189_v44 = vpop.f32.mrb[22].mxu1 }
 0x120   :  { %10366 = vst [vmem:[#allocation17_spill] sm:$0xff] %v8189_v44  ;;  %v4771_v46 = vadd.f32 %v4770_v39, %v4769_v30  ;;  %v2258_v47 = vpop.f32.mrb[23].mxu0  ;;  %v8194_v48 = vpop.f32.mrb[23].mxu1  ;;  %v2267_v53 = vadd.f32 %v6773_v42, %v8033_v61  ;;  %v4244_v58 = vmax.f32 %v2264_v40, 0.0 }
 0x121   :  { %10367 = vst [vmem:[#allocation18_spill] sm:$0xff] %v8194_v48  ;;  %v4242_v51 = vmax.f32 %v2256_v41, 0.0  ;;  %v2259_v56 = vadd.f32 %v2258_v47, %v8033_v61 }
 0x122   :  { %v4773_v57 = vadd.f32 %v4772_v50, %v4771_v46  ;;  %6879 = vmatmul.mubr.bf16.gmra.mrb[128].mxu0 %v7444_v34  ;;  %7139 = vmatmul.mubr.bf16.gmra.mrb[128].mxu1 %v7478_v35  ;;  %v4245_v2 = vmax.f32 %v2267_v53, 0.0  ;;  %v4778_v17 = vsel %vm4734_vm0, %v4244_v58, 0.0  ;;  %v7452_v58 = vld [vmem:[%s10343_s0 + $0x228] sm:$0xff]  }
 0x123   :  { %v4774_v60 = vsel %vm4734_vm0, %v4242_v51, 0.0  ;;  %v4243_v0 = vmax.f32 %v2259_v56, 0.0  ;;  %6882 = vmatprep.mubr.bf16.mxu0 %v7447_v43  ;;  %7142 = vmatprep.mubr.bf16.mxu1 %v7481_v45 }
 0x124   :  { %v4775_v1 = vadd.f32 %v4774_v60, %v4773_v57  ;;  %v4780_v34 = vsel %vm4734_vm0, %v4245_v2, 0.0 }
 0x125   :  { %v4776_v5 = vsel %vm4734_vm0, %v4243_v0, 0.0  ;;  %v6776_v7 = vpop.f32.mrb[24].mxu0  ;;  %v8201_v9 = vpop.f32.mrb[24].mxu1  ;;  %v7486_v0 = vld [vmem:[%s10343_s0 + $0x638] sm:$0xff]  }
 0x126   :  { %10368 = vst [vmem:[#allocation19_spill] sm:$0xff] %v8201_v9  ;;  %v4777_v10 = vadd.f32 %v4776_v5, %v4775_v1  ;;  %v2271_v13 = vpop.f32.mrb[25].mxu0  ;;  %v8206_v15 = vpop.f32.mrb[25].mxu1  ;;  %v2280_v18 = vadd.f32 %v6776_v7, %v8033_v61 }
 0x127   :  { %10369 = vst [vmem:[#allocation20_spill] sm:$0xff] %v8206_v15  ;;  %v2272_v20 = vadd.f32 %v2271_v13, %v8033_v61  ;;  %v6777_v22 = vpop.f32.mrb[26].mxu0  ;;  %v8217_v24 = vpop.f32.mrb[26].mxu1 }
 0x128   :  { %10370 = vst [vmem:[#allocation21_spill] sm:$0xff] %v8217_v24  ;;  %v4779_v28 = vadd.f32 %v4778_v17, %v4777_v10  ;;  %v2274_v30 = vpop.f32.mrb[27].mxu0  ;;  %v8222_v31 = vpop.f32.mrb[27].mxu1  ;;  %v2283_v39 = vadd.f32 %v6777_v22, %v8033_v61  ;;  %v4248_v42 = vmax.f32 %v2280_v18, 0.0  ;;  %v7455_v10 = vld [vmem:[%s10343_s0 + $0x230] sm:$0xff]  }
 0x129   :  { %10371 = vst [vmem:[#allocation22_spill] sm:$0xff] %v8222_v31  ;;  %v4246_v35 = vmax.f32 %v2272_v20, 0.0  ;;  %v2275_v40 = vadd.f32 %v2274_v30, %v8033_v61 }
 0x12a   :  { %v4781_v41 = vadd.f32 %v4780_v34, %v4779_v28  ;;  %6883 = vmatmul.mubr.bf16.gmra.mrb[132].mxu0 %v7448_v14  ;;  %7143 = vmatmul.mubr.bf16.gmra.mrb[132].mxu1 %v7482_v16  ;;  %v4249_v47 = vmax.f32 %v2283_v39, 0.0  ;;  %v4786_v1 = vsel %vm4734_vm0, %v4248_v42, 0.0  ;;  %v7489_v16 = vld [vmem:[%s10343_s0 + $0x640] sm:$0xff]  }
 0x12b   :  { %v4782_v43 = vsel %vm4734_vm0, %v4246_v35, 0.0  ;;  %v4247_v45 = vmax.f32 %v2275_v40, 0.0  ;;  %6886 = vmatprep.mubr.bf16.mxu0 %v7451_v23  ;;  %7146 = vmatprep.mubr.bf16.mxu1 %v7485_v27 }
 0x12c   :  { %v4783_v46 = vadd.f32 %v4782_v43, %v4781_v41  ;;  %v4788_v23 = vsel %vm4734_vm0, %v4249_v47, 0.0 }
 0x12d   :  { %v4784_v50 = vsel %vm4734_vm0, %v4247_v45, 0.0  ;;  %v6780_v51 = vpop.f32.mrb[28].mxu0  ;;  %v7040_v53 = vpop.f32.mrb[28].mxu1 }
 0x12e   :  { %v4785_v56 = vadd.f32 %v4784_v50, %v4783_v46  ;;  %v2287_v57 = vpop.f32.mrb[29].mxu0  ;;  %v3327_v60 = vpop.f32.mrb[29].mxu1  ;;  %v2296_v2 = vadd.f32 %v6780_v51, %v8033_v61  ;;  %v3336_v20 = vadd.f32 %v7040_v53, %v8033_v61  ;;  %v7456_v53 = vld [vmem:[%s10343_s0 + $0x238] sm:$0xff]  }
 0x12f   :  { %v2288_v5 = vadd.f32 %v2287_v57, %v8033_v61  ;;  %v6781_v7 = vpop.f32.mrb[30].mxu0  ;;  %v3328_v13 = vadd.f32 %v3327_v60, %v8033_v61  ;;  %v7041_v14 = vpop.f32.mrb[30].mxu1 }
 0x130   :  { %v4787_v17 = vadd.f32 %v4786_v1, %v4785_v56  ;;  %v2290_v18 = vpop.f32.mrb[31].mxu0  ;;  %v3330_v22 = vpop.f32.mrb[31].mxu1  ;;  %v2299_v28 = vadd.f32 %v6781_v7, %v8033_v61  ;;  %v3339_v39 = vadd.f32 %v7041_v14, %v8033_v61  ;;  %v4252_v40 = vmax.f32 %v2296_v2, 0.0 }
 0x131   :  { %v4250_v27 = vmax.f32 %v2288_v5, 0.0  ;;  %v2291_v30 = vadd.f32 %v2290_v18, %v8033_v61  ;;  %v4510_v35 = vmax.f32 %v3328_v13, 0.0  ;;  %v4512_v45 = vmax.f32 %v3336_v20, 0.0  ;;  %v7490_v5 = vld [vmem:[%s10343_s0 + $0x648] sm:$0xff]   ;;  %v7493_v20 = vld [vmem:[%s10343_s0 + $0x650] sm:$0xff]  }
 0x132   :  { %v4789_v34 = vadd.f32 %v4788_v23, %v4787_v17  ;;  %6887 = vmatmul.mubr.bf16.gmra.mrb[136].mxu0 %v7452_v58  ;;  %7147 = vmatmul.mubr.bf16.gmra.mrb[136].mxu1 %v7486_v0  ;;  %v3331_v46 = vadd.f32 %v3330_v22, %v8033_v61  ;;  %v4253_v47 = vmax.f32 %v2299_v28, 0.0  ;;  %v4513_v0 = vmax.f32 %v3339_v39, 0.0 }
 0x133   :  { %v4790_v41 = vsel %vm4734_vm0, %v4250_v27, 0.0  ;;  %v4251_v42 = vmax.f32 %v2291_v30, 0.0  ;;  %6890 = vmatprep.mubr.bf16.mxu0 %v7455_v10  ;;  %7150 = vmatprep.mubr.bf16.mxu1 %v7489_v16  ;;  %v5356_v60 = vsel %vm4734_vm0, %v4510_v35, 0.0  ;;  %v4794_v7 = vsel %vm4734_vm0, %v4252_v40, 0.0  ;;  %v7459_v16 = vld [vmem:[%s10343_s0 + $0x240] sm:$0xff]  }
 0x134   :  { %v4791_v43 = vadd.f32 %v4790_v41, %v4789_v34  ;;  %v4511_v1 = vmax.f32 %v3331_v46, 0.0  ;;  %v5359_v28 = vsel %vm4734_vm0, %v4512_v45, 0.0  ;;  %v4796_v35 = vsel %vm4734_vm0, %v4253_v47, 0.0 }
 0x135   :  { %v4792_v50 = vsel %vm4734_vm0, %v4251_v42, 0.0  ;;  %v6784_v51 = vpop.f32.mrb[32].mxu0  ;;  %v7044_v56 = vpop.f32.mrb[32].mxu1 }
 0x136   :  { %v4793_v57 = vadd.f32 %v4792_v50, %v4791_v43  ;;  %v2303_v58 = vpop.f32.mrb[33].mxu0  ;;  %v3343_v2 = vpop.f32.mrb[33].mxu1  ;;  %v2312_v10 = vadd.f32 %v6784_v51, %v8033_v61  ;;  %v5357_v30 = vsel %vm4734_vm0, %v4511_v1, 0.0  ;;  %v5361_v43 = vsel %vm4734_vm0, %v4513_v0, 0.0 }
 0x137   :  { %v2304_v13 = vadd.f32 %v2303_v58, %v8033_v61  ;;  %v6785_v14 = vpop.f32.mrb[34].mxu0  ;;  %v3344_v17 = vadd.f32 %v3343_v2, %v8033_v61  ;;  %v7045_v18 = vpop.f32.mrb[34].mxu1  ;;  %v5358_v41 = vadd.f32 %v5357_v30, %v5356_v60  ;;  %v3352_v46 = vadd.f32 %v7044_v56, %v8033_v61 }
 0x138   :  { %v4795_v22 = vadd.f32 %v4794_v7, %v4793_v57  ;;  %v2315_v23 = vadd.f32 %v6785_v14, %v8033_v61  ;;  %v2306_v27 = vpop.f32.mrb[35].mxu0  ;;  %v3346_v34 = vpop.f32.mrb[35].mxu1  ;;  %v4256_v51 = vmax.f32 %v2312_v10, 0.0  ;;  %v3355_v1 = vadd.f32 %v7045_v18, %v8033_v61  ;;  %v7460_v14 = vld [vmem:[%s10343_s0 + $0x248] sm:$0xff]   ;;  %v7494_v18 = vld [vmem:[%s10343_s0 + $0x658] sm:$0xff]  }
 0x139   :  { %v4254_v39 = vmax.f32 %v2304_v13, 0.0  ;;  %v2307_v40 = vadd.f32 %v2306_v27, %v8033_v61  ;;  %v4514_v50 = vmax.f32 %v3344_v17, 0.0  ;;  %v5360_v57 = vadd.f32 %v5359_v28, %v5358_v41  ;;  %v7463_v27 = vld [vmem:[%s10343_s0 + $0x250] sm:$0xff]  }
 0x13a   :  { %v8275_v42 = vadd.f32 %v4796_v35, %v4795_v22  ;;  %6891 = vmatmul.mubr.bf16.gmra.mrb[140].mxu0 %v7456_v53  ;;  %7151 = vmatmul.mubr.bf16.gmra.mrb[140].mxu1 %v7490_v5  ;;  %v4257_v58 = vmax.f32 %v2315_v23, 0.0  ;;  %v3347_v56 = vadd.f32 %v3346_v34, %v8033_v61  ;;  %v7497_v35 = vld [vmem:[%s10343_s0 + $0x660] sm:$0xff]  }
 0x13b   :  { %v4255_v45 = vmax.f32 %v2307_v40, 0.0  ;;  %6894 = vmatprep.mubr.bf16.mxu0 %v7459_v16  ;;  %7154 = vmatprep.mubr.bf16.mxu1 %v7493_v20  ;;  %v5363_v47 = vsel %vm4734_vm0, %v4514_v50, 0.0  ;;  %v4804_v60 = vsel %vm4734_vm0, %v4254_v39, 0.0  ;;  %v5362_v0 = vadd.f32 %v5361_v43, %v5360_v57 }
 0x13c   :  { %v4516_v16 = vmax.f32 %v3352_v46, 0.0  ;;  %v4807_v20 = vsel %vm4734_vm0, %v4256_v51, 0.0  ;;  %v4515_v30 = vmax.f32 %v3347_v56, 0.0  ;;  %v4517_v43 = vmax.f32 %v3355_v1, 0.0 }
 0x13d   :  { %v4805_v53 = vsel %vm4734_vm0, %v4255_v45, 0.0  ;;  %v6788_v2 = vpop.f32.mrb[36].mxu0  ;;  %v7048_v7 = vpop.f32.mrb[36].mxu1  ;;  %v5364_v28 = vadd.f32 %v5363_v47, %v5362_v0  ;;  %v4809_v50 = vsel %vm4734_vm0, %v4257_v58, 0.0 }
 0x13e   :  { %v4806_v5 = vadd.f32 %v4805_v53, %v4804_v60  ;;  %v2328_v10 = vadd.f32 %v6788_v2, %v8033_v61  ;;  %v2319_v13 = vpop.f32.mrb[37].mxu0  ;;  %v3359_v17 = vpop.f32.mrb[37].mxu1  ;;  %v5365_v57 = vsel %vm4734_vm0, %v4515_v30, 0.0  ;;  %v5367_v53 = vsel %vm4734_vm0, %v4516_v16, 0.0  ;;  %v7464_v30 = vld [vmem:[%s10343_s0 + $0x258] sm:$0xff]  }
 0x13f   :  { %v2320_v22 = vadd.f32 %v2319_v13, %v8033_v61  ;;  %v6789_v23 = vpop.f32.mrb[38].mxu0  ;;  %v7049_v34 = vpop.f32.mrb[38].mxu1  ;;  %v5366_v56 = vadd.f32 %v5365_v57, %v5364_v28  ;;  %v3368_v1 = vadd.f32 %v7048_v7, %v8033_v61  ;;  %v5369_v13 = vsel %vm4734_vm0, %v4517_v43, 0.0  ;;  %v7501_v57 = vld [vmem:[%s10343_s0 + $0x670] sm:$0xff]  }
 0x140   :  { %v4808_v39 = vadd.f32 %v4807_v20, %v4806_v5  ;;  %v2331_v40 = vadd.f32 %v6789_v23, %v8033_v61  ;;  %v2322_v41 = vpop.f32.mrb[39].mxu0  ;;  %v3362_v46 = vpop.f32.mrb[39].mxu1  ;;  %v4260_v47 = vmax.f32 %v2328_v10, 0.0  ;;  %v3360_v20 = vadd.f32 %v3359_v17, %v8033_v61  ;;  %v7498_v17 = vld [vmem:[%s10343_s0 + $0x668] sm:$0xff]  }
 0x141   :  { %v4258_v51 = vmax.f32 %v2320_v22, 0.0  ;;  %v2323_v45 = vadd.f32 %v2322_v41, %v8033_v61  ;;  %v5368_v22 = vadd.f32 %v5367_v53, %v5366_v56  ;;  %v3371_v16 = vadd.f32 %v7049_v34, %v8033_v61  ;;  %v7467_v41 = vld [vmem:[%s10343_s0 + $0x260] sm:$0xff]  }
 0x142   :  { %v4810_v60 = vadd.f32 %v4809_v50, %v4808_v39  ;;  %6895 = vmatmul.mubr.bf16.gmra.mrb[144].mxu0 %v7460_v14  ;;  %7155 = vmatmul.mubr.bf16.gmra.mrb[144].mxu1 %v7494_v18  ;;  %v4261_v5 = vmax.f32 %v2331_v40, 0.0  ;;  %v4815_v23 = vsel %vm4734_vm0, %v4260_v47, 0.0  ;;  %v4520_v43 = vmax.f32 %v3368_v1, 0.0 }
 0x143   :  { %v4811_v2 = vsel %vm4734_vm0, %v4258_v51, 0.0  ;;  %v4259_v0 = vmax.f32 %v2323_v45, 0.0  ;;  %6898 = vmatprep.mubr.bf16.mxu0 %v7463_v27  ;;  %7158 = vmatprep.mubr.bf16.mxu1 %v7497_v35  ;;  %v4518_v35 = vmax.f32 %v3360_v20, 0.0  ;;  %v5370_v50 = vadd.f32 %v5369_v13, %v5368_v22 }
 0x144   :  { %v4812_v58 = vadd.f32 %v4811_v2, %v4810_v60  ;;  %v3363_v51 = vadd.f32 %v3362_v46, %v8033_v61  ;;  %v4817_v47 = vsel %vm4734_vm0, %v4261_v5, 0.0  ;;  %v4521_v20 = vmax.f32 %v3371_v16, 0.0 }
 0x145   :  { %v4813_v10 = vsel %vm4734_vm0, %v4259_v0, 0.0  ;;  %v6792_v14 = vpop.f32.mrb[40].mxu0  ;;  %v7052_v18 = vpop.f32.mrb[40].mxu1  ;;  %v5371_v0 = vsel %vm4734_vm0, %v4518_v35, 0.0 }
 0x146   :  { %v4814_v27 = vadd.f32 %v4813_v10, %v4812_v58  ;;  %v2344_v28 = vadd.f32 %v6792_v14, %v8033_v61  ;;  %v2335_v7 = vpop.f32.mrb[41].mxu0  ;;  %v3375_v39 = vpop.f32.mrb[41].mxu1  ;;  %v5372_v13 = vadd.f32 %v5371_v0, %v5370_v50  ;;  %v4519_v22 = vmax.f32 %v3363_v51, 0.0 }
 0x147   :  { %v2336_v40 = vadd.f32 %v2335_v7, %v8033_v61  ;;  %v6793_v34 = vpop.f32.mrb[42].mxu0  ;;  %v7053_v45 = vpop.f32.mrb[42].mxu1  ;;  %v3376_v7 = vadd.f32 %v3375_v39, %v8033_v61 }
 0x148   :  { %v4816_v60 = vadd.f32 %v4815_v23, %v4814_v27  ;;  %v2347_v53 = vadd.f32 %v6793_v34, %v8033_v61  ;;  %v2338_v2 = vpop.f32.mrb[43].mxu0  ;;  %v3378_v56 = vpop.f32.mrb[43].mxu1  ;;  %v4264_v46 = vmax.f32 %v2344_v28, 0.0  ;;  %v3384_v27 = vadd.f32 %v7052_v18, %v8033_v61 }
 0x149   :  { %v4262_v58 = vmax.f32 %v2336_v40, 0.0  ;;  %v2339_v1 = vadd.f32 %v2338_v2, %v8033_v61  ;;  %v5375_v40 = vsel %vm4734_vm0, %v4520_v43, 0.0  ;;  %v5373_v16 = vsel %vm4734_vm0, %v4519_v22, 0.0  ;;  %v7468_v43 = vld [vmem:[%s10343_s0 + $0x268] sm:$0xff]  }
 0x14a   :  { %v4818_v10 = vadd.f32 %v4817_v47, %v4816_v60  ;;  %v4265_v14 = vmax.f32 %v2347_v53, 0.0  ;;  %6899 = vmatmul.mubr.bf16.gmra.mrb[148].mxu0 %v7464_v30  ;;  %7159 = vmatmul.mubr.bf16.gmra.mrb[148].mxu1 %v7498_v17  ;;  %v3387_v28 = vadd.f32 %v7053_v45, %v8033_v61  ;;  %v5377_v17 = vsel %vm4734_vm0, %v4521_v20, 0.0  ;;  %v7502_v53 = vld [vmem:[%s10343_s0 + $0x678] sm:$0xff]  }
 0x14b   :  { %v4819_v5 = vsel %vm4734_vm0, %v4262_v58, 0.0  ;;  %v4263_v23 = vmax.f32 %v2339_v1, 0.0  ;;  %6902 = vmatprep.mubr.bf16.mxu0 %v7467_v41  ;;  %7162 = vmatprep.mubr.bf16.mxu1 %v7501_v57  ;;  %v5374_v50 = vadd.f32 %v5373_v16, %v5372_v13  ;;  %v4522_v51 = vmax.f32 %v3376_v7, 0.0  ;;  %v7471_v13 = vld [vmem:[%s10343_s0 + $0x270] sm:$0xff]  }
 0x14c   :  { %v4820_v35 = vadd.f32 %v4819_v5, %v4818_v10  ;;  %v4524_v57 = vmax.f32 %v3384_v27, 0.0  ;;  %v3379_v60 = vadd.f32 %v3378_v56, %v8033_v61  ;;  %v4823_v2 = vsel %vm4734_vm0, %v4264_v46, 0.0  ;;  %v7505_v56 = vld [vmem:[%s10343_s0 + $0x680] sm:$0xff]  }
 0x14d   :  { %v4821_v30 = vsel %vm4734_vm0, %v4263_v23, 0.0  ;;  %v6796_v34 = vpop.f32.mrb[44].mxu0  ;;  %v7056_v41 = vpop.f32.mrb[44].mxu1  ;;  %v4825_v0 = vsel %vm4734_vm0, %v4265_v14, 0.0  ;;  %v5376_v20 = vadd.f32 %v5375_v40, %v5374_v50  ;;  %v5379_v46 = vsel %vm4734_vm0, %v4522_v51, 0.0 }
 0x14e   :  { %v4822_v47 = vadd.f32 %v4821_v30, %v4820_v35  ;;  %v2360_v18 = vadd.f32 %v6796_v34, %v8033_v61  ;;  %v2351_v39 = vpop.f32.mrb[45].mxu0  ;;  %v3391_v45 = vpop.f32.mrb[45].mxu1  ;;  %v4525_v14 = vmax.f32 %v3387_v28, 0.0  ;;  %v4523_v30 = vmax.f32 %v3379_v60, 0.0 }
 0x14f   :  { %v2352_v58 = vadd.f32 %v2351_v39, %v8033_v61  ;;  %v6797_v1 = vpop.f32.mrb[46].mxu0  ;;  %v7057_v10 = vpop.f32.mrb[46].mxu1  ;;  %v5378_v16 = vadd.f32 %v5377_v17, %v5376_v20  ;;  %v5383_v50 = vsel %vm4734_vm0, %v4524_v57, 0.0  ;;  %v3400_v39 = vadd.f32 %v7056_v41, %v8033_v61 }
 0x150   :  { %v4824_v22 = vadd.f32 %v4823_v2, %v4822_v47  ;;  %v2363_v5 = vadd.f32 %v6797_v1, %v8033_v61  ;;  %v2354_v23 = vpop.f32.mrb[47].mxu0  ;;  %v3394_v27 = vpop.f32.mrb[47].mxu1  ;;  %v4268_v34 = vmax.f32 %v2360_v18, 0.0  ;;  %v5381_v28 = vsel %vm4734_vm0, %v4523_v30, 0.0 }
 0x151   :  { %v4266_v7 = vmax.f32 %v2352_v58, 0.0  ;;  %v2355_v35 = vadd.f32 %v2354_v23, %v8033_v61  ;;  %v5380_v51 = vadd.f32 %v5379_v46, %v5378_v16  ;;  %v5385_v17 = vsel %vm4734_vm0, %v4525_v14, 0.0  ;;  %v7506_v46 = vld [vmem:[%s10343_s0 + $0x688] sm:$0xff]  }
 0x152   :  { %v4826_v40 = vadd.f32 %v4825_v0, %v4824_v22  ;;  %6903 = vmatmul.mubr.bf16.gmra.mrb[152].mxu0 %v7468_v43  ;;  %7163 = vmatmul.mubr.bf16.gmra.mrb[152].mxu1 %v7502_v53  ;;  %v4269_v1 = vmax.f32 %v2363_v5, 0.0  ;;  %v3392_v18 = vadd.f32 %v3391_v45, %v8033_v61  ;;  %v3403_v41 = vadd.f32 %v7057_v10, %v8033_v61 }
 0x153   :  { %v4827_v47 = vsel %vm4734_vm0, %v4266_v7, 0.0  ;;  %v4267_v2 = vmax.f32 %v2355_v35, 0.0  ;;  %6906 = vmatprep.mubr.bf16.mxu0 %v7471_v13  ;;  %7166 = vmatprep.mubr.bf16.mxu1 %v7505_v56  ;;  %v5382_v60 = vadd.f32 %v5381_v28, %v5380_v51  ;;  %v3395_v53 = vadd.f32 %v3394_v27, %v8033_v61  ;;  %v7472_v56 = vld [vmem:[%s10343_s0 + $0x278] sm:$0xff]   ;;  %v7475_v7 = vld [vmem:[%s10343_s0 + $0x280] sm:$0xff]  }
 0x154   :  { %v4828_v58 = vadd.f32 %v4827_v47, %v4826_v40  ;;  %v4528_v5 = vmax.f32 %v3400_v39, 0.0  ;;  %v4526_v23 = vmax.f32 %v3392_v18, 0.0  ;;  %v4831_v10 = vsel %vm4734_vm0, %v4268_v34, 0.0  ;;  %v7509_v40 = vld [vmem:[%s10343_s0 + $0x690] sm:$0xff]  }
 0x155   :  { %v4829_v43 = vsel %vm4734_vm0, %v4267_v2, 0.0  ;;  %v6800_v57 = vpop.f32.mrb[48].mxu0  ;;  %v7060_v0 = vpop.f32.mrb[48].mxu1  ;;  %v5384_v35 = vadd.f32 %v5383_v50, %v5382_v60  ;;  %v4527_v16 = vmax.f32 %v3395_v53, 0.0  ;;  %v4833_v39 = vsel %vm4734_vm0, %v4269_v1, 0.0 }
 0x156   :  { %v4830_v13 = vadd.f32 %v4829_v43, %v4828_v58  ;;  %v2376_v20 = vadd.f32 %v6800_v57, %v8033_v61  ;;  %v2367_v22 = vpop.f32.mrb[49].mxu0  ;;  %v3407_v45 = vpop.f32.mrb[49].mxu1  ;;  %v5387_v34 = vsel %vm4734_vm0, %v4526_v23, 0.0  ;;  %v4529_v51 = vmax.f32 %v3403_v41, 0.0 }
 0x157   :  { %v2368_v14 = vadd.f32 %v2367_v22, %v8033_v61  ;;  %v6801_v27 = vpop.f32.mrb[50].mxu0  ;;  %v7061_v30 = vpop.f32.mrb[50].mxu1  ;;  %v5386_v50 = vadd.f32 %v5385_v17, %v5384_v35  ;;  %v5391_v53 = vsel %vm4734_vm0, %v4528_v5, 0.0  ;;  %v5389_v22 = vsel %vm4734_vm0, %v4527_v16, 0.0 }
 0x158   :  { %v4832_v47 = vadd.f32 %v4831_v10, %v4830_v13  ;;  %v2370_v2 = vpop.f32.mrb[51].mxu0  ;;  %v3410_v28 = vpop.f32.mrb[51].mxu1  ;;  %v2379_v18 = vadd.f32 %v6801_v27, %v8033_v61  ;;  %v4272_v57 = vmax.f32 %v2376_v20, 0.0  ;;  %v3416_v23 = vadd.f32 %v7060_v0, %v8033_v61 }
 0x159   :  { %v4270_v58 = vmax.f32 %v2368_v14, 0.0  ;;  %v2371_v43 = vadd.f32 %v2370_v2, %v8033_v61  ;;  %v5388_v41 = vadd.f32 %v5387_v34, %v5386_v50  ;;  %v5393_v14 = vsel %vm4734_vm0, %v4529_v51, 0.0 }
 0x15a   :  { %v4834_v60 = vadd.f32 %v4833_v39, %v4832_v47  ;;  %6907 = vmatmul.mubr.bf16.gmra.mrb[156].mxu0 %v7472_v56  ;;  %7167 = vmatmul.mubr.bf16.gmra.mrb[156].mxu1 %v7506_v46  ;;  %v3408_v17 = vadd.f32 %v3407_v45, %v8033_v61  ;;  %v3419_v20 = vadd.f32 %v7061_v30, %v8033_v61  ;;  %v4273_v56 = vmax.f32 %v2379_v18, 0.0  ;;  %v7510_v30 = vld [vmem:[%s10343_s0 + $0x698] sm:$0xff]  }
 0x15b   :  { %v4835_v1 = vsel %vm4734_vm0, %v4270_v58, 0.0  ;;  %v4271_v13 = vmax.f32 %v2371_v43, 0.0  ;;  %6910 = vmatprep.mubr.bf16.mxu0 %v7475_v7  ;;  %7170 = vmatprep.mubr.bf16.mxu1 %v7509_v40  ;;  %v5390_v46 = vadd.f32 %v5389_v22, %v5388_v41  ;;  %v3411_v35 = vadd.f32 %v3410_v28, %v8033_v61  ;;  %v7476_v40 = vld [vmem:[%s10343_s0 + $0x288] sm:$0xff]   ;;  %v7479_v58 = vld [vmem:[%s10343_s0 + $0x290] sm:$0xff]  }
 0x15c   :  { %v4836_v10 = vadd.f32 %v4835_v1, %v4834_v60  ;;  %v4532_v47 = vmax.f32 %v3416_v23, 0.0  ;;  %v4530_v45 = vmax.f32 %v3408_v17, 0.0  ;;  %v4839_v34 = vsel %vm4734_vm0, %v4272_v57, 0.0  ;;  %v7513_v60 = vld [vmem:[%s10343_s0 + $0x6a0] sm:$0xff]  }
 0x15d   :  { %v4837_v5 = vsel %vm4734_vm0, %v4271_v13, 0.0  ;;  %v6804_v27 = vpop.f32.mrb[52].mxu0  ;;  %v7064_v16 = vpop.f32.mrb[52].mxu1  ;;  %v5392_v18 = vadd.f32 %v5391_v53, %v5390_v46  ;;  %v4531_v43 = vmax.f32 %v3411_v35, 0.0  ;;  %v4533_v41 = vmax.f32 %v3419_v20, 0.0 }
 0x15e   :  { %v4838_v7 = vadd.f32 %v4837_v5, %v4836_v10  ;;  %v2392_v39 = vadd.f32 %v6804_v27, %v8033_v61  ;;  %v2383_v0 = vpop.f32.mrb[53].mxu0  ;;  %v3423_v2 = vpop.f32.mrb[53].mxu1  ;;  %v5395_v57 = vsel %vm4734_vm0, %v4530_v45, 0.0  ;;  %v4841_v10 = vsel %vm4734_vm0, %v4273_v56, 0.0 }
 0x15f   :  { %v2384_v51 = vadd.f32 %v2383_v0, %v8033_v61  ;;  %v6805_v28 = vpop.f32.mrb[54].mxu0  ;;  %v7065_v50 = vpop.f32.mrb[54].mxu1  ;;  %v5394_v53 = vadd.f32 %v5393_v14, %v5392_v18  ;;  %v5399_v35 = vsel %vm4734_vm0, %v4532_v47, 0.0  ;;  %v3432_v45 = vadd.f32 %v7064_v16, %v8033_v61 }
 0x160   :  { %v4840_v22 = vadd.f32 %v4839_v34, %v4838_v7  ;;  %v2395_v1 = vadd.f32 %v6805_v28, %v8033_v61  ;;  %v2386_v13 = vpop.f32.mrb[55].mxu0  ;;  %v3426_v23 = vpop.f32.mrb[55].mxu1  ;;  %v4276_v27 = vmax.f32 %v2392_v39, 0.0  ;;  %v5397_v7 = vsel %vm4734_vm0, %v4531_v43, 0.0 }
 0x161   :  { %v4274_v17 = vmax.f32 %v2384_v51, 0.0  ;;  %v2387_v5 = vadd.f32 %v2386_v13, %v8033_v61  ;;  %v5396_v20 = vadd.f32 %v5395_v57, %v5394_v53  ;;  %v5401_v14 = vsel %vm4734_vm0, %v4533_v41, 0.0  ;;  %v7514_v57 = vld [vmem:[%s10343_s0 + $0x6a8] sm:$0xff]  }
 0x162   :  { %v4842_v46 = vadd.f32 %v4841_v10, %v4840_v22  ;;  %6911 = vmatmul.mubr.bf16.gmra.mrb[160].mxu0 %v7476_v40  ;;  %7171 = vmatmul.mubr.bf16.gmra.mrb[160].mxu1 %v7510_v30  ;;  %v4277_v51 = vmax.f32 %v2395_v1, 0.0  ;;  %v3424_v39 = vadd.f32 %v3423_v2, %v8033_v61  ;;  %v3435_v30 = vadd.f32 %v7065_v50, %v8033_v61  ;;  %v7483_v10 = vld [vmem:[%s10343_s0 + $0x2a0] sm:$0xff]  }
 0x163   :  { %v4843_v0 = vsel %vm4734_vm0, %v4274_v17, 0.0  ;;  %v4275_v34 = vmax.f32 %v2387_v5, 0.0  ;;  %6914 = vmatprep.mubr.bf16.mxu0 %v7479_v58  ;;  %7174 = vmatprep.mubr.bf16.mxu1 %v7513_v60  ;;  %v5398_v28 = vadd.f32 %v5397_v7, %v5396_v20  ;;  %v3427_v18 = vadd.f32 %v3426_v23, %v8033_v61  ;;  %v7480_v60 = vld [vmem:[%s10343_s0 + $0x298] sm:$0xff]  }
 0x164   :  { %v4844_v56 = vadd.f32 %v4843_v0, %v4842_v46  ;;  %v4536_v1 = vmax.f32 %v3432_v45, 0.0  ;;  %v4534_v13 = vmax.f32 %v3424_v39, 0.0  ;;  %v4847_v50 = vsel %vm4734_vm0, %v4276_v27, 0.0  ;;  %v7517_v46 = vld [vmem:[%s10343_s0 + $0x6b0] sm:$0xff]  }
 0x165   :  { %v4845_v40 = vsel %vm4734_vm0, %v4275_v34, 0.0  ;;  %v6808_v47 = vpop.f32.mrb[56].mxu0  ;;  %v7068_v43 = vpop.f32.mrb[56].mxu1  ;;  %v5400_v17 = vadd.f32 %v5399_v35, %v5398_v28  ;;  %v4535_v5 = vmax.f32 %v3427_v18, 0.0  ;;  %v4849_v7 = vsel %vm4734_vm0, %v4277_v51, 0.0 }
 0x166   :  { %v4846_v58 = vadd.f32 %v4845_v40, %v4844_v56  ;;  %v2408_v22 = vadd.f32 %v6808_v47, %v8033_v61  ;;  %v2399_v16 = vpop.f32.mrb[57].mxu0  ;;  %v3439_v2 = vpop.f32.mrb[57].mxu1  ;;  %v5403_v20 = vsel %vm4734_vm0, %v4534_v13, 0.0  ;;  %v4537_v35 = vmax.f32 %v3435_v30, 0.0 }
 0x167   :  { %v2400_v41 = vadd.f32 %v2399_v16, %v8033_v61  ;;  %v6809_v23 = vpop.f32.mrb[58].mxu0  ;;  %v7069_v53 = vpop.f32.mrb[58].mxu1  ;;  %v5402_v40 = vadd.f32 %v5401_v14, %v5400_v17  ;;  %v5407_v18 = vsel %vm4734_vm0, %v4536_v1, 0.0  ;;  %v5405_v16 = vsel %vm4734_vm0, %v4535_v5, 0.0 }
 0x168   :  { %v4848_v0 = vadd.f32 %v4847_v50, %v4846_v58  ;;  %v2411_v34 = vadd.f32 %v6809_v23, %v8033_v61  ;;  %v2402_v27 = vpop.f32.mrb[59].mxu0  ;;  %v3442_v45 = vpop.f32.mrb[59].mxu1  ;;  %v4280_v47 = vmax.f32 %v2408_v22, 0.0  ;;  %v3448_v13 = vadd.f32 %v7068_v43, %v8033_v61 }
 0x169   :  { %v4278_v56 = vmax.f32 %v2400_v41, 0.0  ;;  %v2403_v39 = vadd.f32 %v2402_v27, %v8033_v61  ;;  %v5404_v50 = vadd.f32 %v5403_v20, %v5402_v40  ;;  %v3440_v14 = vadd.f32 %v3439_v2, %v8033_v61 }
 0x16a   :  { %v4850_v28 = vadd.f32 %v4849_v7, %v4848_v0  ;;  %6915 = vmatmul.mubr.bf16.gmra.mrb[164].mxu0 %v7480_v60  ;;  %7175 = vmatmul.mubr.bf16.gmra.mrb[164].mxu1 %v7514_v57  ;;  %v4281_v23 = vmax.f32 %v2411_v34, 0.0  ;;  %v3451_v30 = vadd.f32 %v7069_v53, %v8033_v61  ;;  %v5409_v1 = vsel %vm4734_vm0, %v4537_v35, 0.0  ;;  %v7518_v34 = vld [vmem:[%s10343_s0 + $0x6b8] sm:$0xff]  }
 0x16b   :  { %v4851_v51 = vsel %vm4734_vm0, %v4278_v56, 0.0  ;;  %v4279_v58 = vmax.f32 %v2403_v39, 0.0  ;;  %6918 = vmatprep.mubr.bf16.mxu0 %v7483_v10  ;;  %7178 = vmatprep.mubr.bf16.mxu1 %v7517_v46  ;;  %v5406_v57 = vadd.f32 %v5405_v16, %v5404_v50  ;;  %v3443_v17 = vadd.f32 %v3442_v45, %v8033_v61  ;;  %v7484_v46 = vld [vmem:[%s10343_s0 + $0x2a8] sm:$0xff]   ;;  %v7487_v56 = vld [vmem:[%s10343_s0 + $0x2b0] sm:$0xff]  }
 0x16c   :  { %v4852_v41 = vadd.f32 %v4851_v51, %v4850_v28  ;;  %v4540_v2 = vmax.f32 %v3448_v13, 0.0  ;;  %v4538_v0 = vmax.f32 %v3440_v14, 0.0  ;;  %v4855_v27 = vsel %vm4734_vm0, %v4280_v47, 0.0  ;;  %v7521_v28 = vld [vmem:[%s10343_s0 + $0x6c0] sm:$0xff]  }
 0x16d   :  { %v4853_v22 = vsel %vm4734_vm0, %v4279_v58, 0.0  ;;  %v6812_v60 = vpop.f32.mrb[60].mxu0  ;;  %v7072_v5 = vpop.f32.mrb[60].mxu1  ;;  %v5408_v39 = vadd.f32 %v5407_v18, %v5406_v57  ;;  %v4539_v40 = vmax.f32 %v3443_v17, 0.0  ;;  %v4857_v16 = vsel %vm4734_vm0, %v4281_v23, 0.0 }
 0x16e   :  { %v4854_v10 = vadd.f32 %v4853_v22, %v4852_v41  ;;  %v2424_v7 = vadd.f32 %v6812_v60, %v8033_v61  ;;  %v2415_v43 = vpop.f32.mrb[61].mxu0  ;;  %v3455_v53 = vpop.f32.mrb[61].mxu1  ;;  %v5411_v47 = vsel %vm4734_vm0, %v4538_v0, 0.0  ;;  %v4541_v50 = vmax.f32 %v3451_v30, 0.0 }
 0x16f   :  { %v2416_v20 = vadd.f32 %v2415_v43, %v8033_v61  ;;  %v6813_v45 = vpop.f32.mrb[62].mxu0  ;;  %v7073_v35 = vpop.f32.mrb[62].mxu1  ;;  %v5410_v18 = vadd.f32 %v5409_v1, %v5408_v39  ;;  %v5415_v17 = vsel %vm4734_vm0, %v4540_v2, 0.0  ;;  %v5413_v43 = vsel %vm4734_vm0, %v4539_v40, 0.0 }
 0x170   :  { %v4856_v51 = vadd.f32 %v4855_v27, %v4854_v10  ;;  %v2418_v58 = vpop.f32.mrb[63].mxu0  ;;  %v3458_v13 = vpop.f32.mrb[63].mxu1  ;;  %v2427_v14 = vadd.f32 %v6813_v45, %v8033_v61  ;;  %v4284_v60 = vmax.f32 %v2424_v7, 0.0  ;;  %v3464_v0 = vadd.f32 %v7072_v5, %v8033_v61 }
 0x171   :  { %v4282_v41 = vmax.f32 %v2416_v20, 0.0  ;;  %v2419_v22 = vadd.f32 %v2418_v58, %v8033_v61  ;;  %v5412_v30 = vadd.f32 %v5411_v47, %v5410_v18  ;;  %v5417_v20 = vsel %vm4734_vm0, %v4541_v50, 0.0 }
 0x172   :  { %v4858_v57 = vadd.f32 %v4857_v16, %v4856_v51  ;;  %6919 = vmatmul.mubr.bf16.gmra.mrb[168].mxu0 %v7484_v46  ;;  %7179 = vmatmul.mubr.bf16.gmra.mrb[168].mxu1 %v7518_v34  ;;  %v3456_v1 = vadd.f32 %v3455_v53, %v8033_v61  ;;  %v3467_v7 = vadd.f32 %v7073_v35, %v8033_v61  ;;  %v4285_v46 = vmax.f32 %v2427_v14, 0.0  ;;  %v7488_v34 = vld [vmem:[%s10343_s0 + $0x2b8] sm:$0xff]   ;;  %v7522_v35 = vld [vmem:[%s10343_s0 + $0x6c8] sm:$0xff]  }
 0x173   :  { %v4859_v23 = vsel %vm4734_vm0, %v4282_v41, 0.0  ;;  %v4283_v10 = vmax.f32 %v2419_v22, 0.0  ;;  %6922 = vmatprep.mubr.bf16.mxu0 %v7487_v56  ;;  %7182 = vmatprep.mubr.bf16.mxu1 %v7521_v28  ;;  %v5414_v56 = vadd.f32 %v5413_v43, %v5412_v30  ;;  %v3459_v39 = vadd.f32 %v3458_v13, %v8033_v61  ;;  %v7491_v13 = vld [vmem:[%s10343_s0 + $0x2c0] sm:$0xff]  }
 0x174   :  { %v4860_v27 = vadd.f32 %v4859_v23, %v4858_v57  ;;  %v4863_v40 = vsel %vm4734_vm0, %v4284_v60, 0.0  ;;  %v4544_v51 = vmax.f32 %v3464_v0, 0.0  ;;  %v4542_v53 = vmax.f32 %v3456_v1, 0.0  ;;  %v7525_v60 = vld [vmem:[%s10343_s0 + $0x6d0] sm:$0xff]  }
 0x175   :  { %v4861_v2 = vsel %vm4734_vm0, %v4283_v10, 0.0  ;;  %v6816_v45 = vpop.f32.mrb[64].mxu0  ;;  %v7076_v5 = vpop.f32.mrb[64].mxu1  ;;  %v5416_v14 = vadd.f32 %v5415_v17, %v5414_v56  ;;  %v4543_v22 = vmax.f32 %v3459_v39, 0.0  ;;  %v4545_v30 = vmax.f32 %v3467_v7, 0.0 }
 0x176   :  { %v4862_v28 = vadd.f32 %v4861_v2, %v4860_v27  ;;  %v2431_v16 = vpop.f32.mrb[65].mxu0  ;;  %v3471_v58 = vpop.f32.mrb[65].mxu1  ;;  %v2440_v47 = vadd.f32 %v6816_v45, %v8033_v61  ;;  %v5425_v10 = vsel %vm4734_vm0, %v4542_v53, 0.0  ;;  %v4865_v27 = vsel %vm4734_vm0, %v4285_v46, 0.0 }
 0x177   :  { %v2432_v50 = vadd.f32 %v2431_v16, %v8033_v61  ;;  %v6817_v41 = vpop.f32.mrb[66].mxu0  ;;  %v7077_v18 = vpop.f32.mrb[66].mxu1  ;;  %v8500_v2 = vadd.f32 %v5417_v20, %v5416_v14  ;;  %v5428_v56 = vsel %vm4734_vm0, %v4544_v51, 0.0  ;;  %v5426_v39 = vsel %vm4734_vm0, %v4543_v22, 0.0  ;;  %v7492_v22 = vld [vmem:[%s10343_s0 + $0x2c8] sm:$0xff]  }
 0x178   :  { %v4864_v57 = vadd.f32 %v4863_v40, %v4862_v28  ;;  %v2443_v43 = vadd.f32 %v6817_v41, %v8033_v61  ;;  %v2434_v23 = vpop.f32.mrb[67].mxu0  ;;  %v8496_v0 = vpop.f32.mrb[67].mxu1  ;;  %v4288_v40 = vmax.f32 %v2440_v47, 0.0  ;;  %v5427_v7 = vadd.f32 %v5426_v39, %v5425_v10 }
 0x179   :  { %v4286_v1 = vmax.f32 %v2432_v50, 0.0  ;;  %v2435_v17 = vadd.f32 %v2434_v23, %v8033_v61  ;;  %10372 = vst [vmem:[#allocation23_spill] sm:$0xff] %v8500_v2  ;;  %v5430_v46 = vsel %vm4734_vm0, %v4545_v30, 0.0  ;;  %v3472_v53 = vadd.f32 %v3471_v58, %v8033_v61  ;;  %v7526_v58 = vld [vmem:[%s10343_s0 + $0x6d8] sm:$0xff]  }
 0x17a   :  { %v8502_v45 = vadd.f32 %v4865_v27, %v4864_v57  ;;  %6923 = vmatmul.mubr.bf16.gmra.mrb[172].mxu0 %v7488_v34  ;;  %7183 = vmatmul.mubr.bf16.gmra.mrb[172].mxu1 %v7522_v35  ;;  %v4289_v16 = vmax.f32 %v2443_v43, 0.0  ;;  %v5429_v41 = vadd.f32 %v5428_v56, %v5427_v7  ;;  %v3480_v51 = vadd.f32 %v7076_v5, %v8033_v61  ;;  %v7495_v5 = vld [vmem:[%s10343_s0 + $0x2d0] sm:$0xff]  }
 0x17b   :  { %v4287_v28 = vmax.f32 %v2435_v17, 0.0  ;;  %6926 = vmatprep.mubr.bf16.mxu0 %v7491_v13  ;;  %7186 = vmatprep.mubr.bf16.mxu1 %v7525_v60  ;;  %v4873_v20 = vsel %vm4734_vm0, %v4286_v1, 0.0  ;;  %v4876_v57 = vsel %vm4734_vm0, %v4288_v40, 0.0  ;;  %v4546_v10 = vmax.f32 %v3472_v53, 0.0  ;;  %v7529_v1 = vld [vmem:[%s10343_s0 + $0x6e0] sm:$0xff]  }
 0x17c   :  { %v5431_v30 = vadd.f32 %v5430_v46, %v5429_v41  ;;  %v4878_v17 = vsel %vm4734_vm0, %v4289_v16, 0.0  ;;  %v4548_v53 = vmax.f32 %v3480_v51, 0.0 }
 0x17d   :  { %v4874_v50 = vsel %vm4734_vm0, %v4287_v28, 0.0  ;;  %v6820_v34 = vpop.f32.mrb[68].mxu0  ;;  %v7080_v14 = vpop.f32.mrb[68].mxu1 }
 0x17e   :  { %v4875_v35 = vadd.f32 %v4874_v50, %v4873_v20  ;;  %v2456_v47 = vadd.f32 %v6820_v34, %v8033_v61  ;;  %v2447_v13 = vpop.f32.mrb[69].mxu0  ;;  %v3487_v60 = vpop.f32.mrb[69].mxu1  ;;  %v3483_v34 = vadd.f32 %v7077_v18, %v8033_v61  ;;  %v3475_v18 = vadd.f32 %v8496_v0, %v8033_v61 }
 0x17f   :  { %v2448_v43 = vadd.f32 %v2447_v13, %v8033_v61  ;;  %v6821_v23 = vpop.f32.mrb[70].mxu0  ;;  %v8523_v27 = vpop.f32.mrb[70].mxu1 }
 0x180   :  { %v4877_v56 = vadd.f32 %v4876_v57, %v4875_v35  ;;  %v2459_v39 = vadd.f32 %v6821_v23, %v8033_v61  ;;  %v2450_v40 = vpop.f32.mrb[71].mxu0  ;;  %v8530_v28 = vpop.f32.mrb[71].mxu1  ;;  %v4292_v7 = vmax.f32 %v2456_v47, 0.0  ;;  %v5432_v35 = vsel %vm4734_vm0, %v4546_v10, 0.0  ;;  %v7496_v10 = vld [vmem:[%s10343_s0 + $0x2d8] sm:$0xff]  }
 0x181   :  { %v4290_v20 = vmax.f32 %v2448_v43, 0.0  ;;  %v2451_v50 = vadd.f32 %v2450_v40, %v8033_v61  ;;  %v5433_v23 = vadd.f32 %v5432_v35, %v5431_v30  ;;  %v4549_v30 = vmax.f32 %v3483_v34, 0.0  ;;  %v7530_v40 = vld [vmem:[%s10343_s0 + $0x6e8] sm:$0xff]  }
 0x182   :  { %v4879_v46 = vadd.f32 %v4878_v17, %v4877_v56  ;;  %6927 = vmatmul.mubr.bf16.gmra.mrb[176].mxu0 %v7492_v22  ;;  %7187 = vmatmul.mubr.bf16.gmra.mrb[176].mxu1 %v7526_v58  ;;  %v4293_v13 = vmax.f32 %v2459_v39, 0.0  ;;  %v4884_v47 = vsel %vm4734_vm0, %v4292_v7, 0.0  ;;  %v5436_v22 = vsel %vm4734_vm0, %v4548_v53, 0.0 }
 0x183   :  { %v4880_v41 = vsel %vm4734_vm0, %v4290_v20, 0.0  ;;  %v4291_v16 = vmax.f32 %v2451_v50, 0.0  ;;  %6930 = vmatprep.mubr.bf16.mxu0 %v7495_v5  ;;  %7190 = vmatprep.mubr.bf16.mxu1 %v7529_v1  ;;  %v3496_v1 = vadd.f32 %v7080_v14, %v8033_v61  ;;  %v7499_v50 = vld [vmem:[%s10343_s0 + $0x2e0] sm:$0xff]   ;;  %v4547_v53 = vmax.f32 %v3475_v18, 0.0  ;;  %v7533_v14 = vld [vmem:[%s10343_s0 + $0x6f0] sm:$0xff]  }
 0x184   :  { %v4881_v57 = vadd.f32 %v4880_v41, %v4879_v46  ;;  %v4886_v7 = vsel %vm4734_vm0, %v4293_v13, 0.0  ;;  %v3488_v46 = vadd.f32 %v3487_v60, %v8033_v61  ;;  %v5438_v24 = vsel %vm4734_vm0, %v4549_v30, 0.0 }
 0x185   :  { %v4882_v43 = vsel %vm4734_vm0, %v4291_v16, 0.0  ;;  %v6824_v51 = vpop.f32.mrb[72].mxu0  ;;  %v7084_v58 = vpop.f32.mrb[72].mxu1  ;;  %v5434_v18 = vsel %vm4734_vm0, %v4547_v53, 0.0 }
 0x186   :  { %v4883_v17 = vadd.f32 %v4882_v43, %v4881_v57  ;;  %v2472_v56 = vadd.f32 %v6824_v51, %v8033_v61  ;;  %v2463_v5 = vpop.f32.mrb[73].mxu0  ;;  %v3503_v39 = vpop.f32.mrb[73].mxu1  ;;  %v4552_v57 = vmax.f32 %v3496_v1, 0.0  ;;  %v4550_v60 = vmax.f32 %v3488_v46, 0.0 }
 0x187   :  { %v2464_v0 = vadd.f32 %v2463_v5, %v8033_v61  ;;  %v6825_v20 = vpop.f32.mrb[74].mxu0  ;;  %v8555_v34 = vpop.f32.mrb[74].mxu1 }
 0x188   :  { %v4885_v41 = vadd.f32 %v4884_v47, %v4883_v17  ;;  %v4296_v16 = vmax.f32 %v2472_v56, 0.0  ;;  %v2475_v13 = vadd.f32 %v6825_v20, %v8033_v61  ;;  %v2466_v35 = vpop.f32.mrb[75].mxu0  ;;  %v8561_v43 = vpop.f32.mrb[75].mxu1  ;;  %v5435_v47 = vadd.f32 %v5434_v18, %v5433_v23 }
 0x189   :  { %v4294_v51 = vmax.f32 %v2464_v0, 0.0  ;;  %v2467_v5 = vadd.f32 %v2466_v35, %v8033_v61  ;;  %v5444_v0 = vsel %vm4734_vm0, %v4552_v57, 0.0  ;;  %v5440_v53 = vsel %vm4734_vm0, %v4550_v60, 0.0 }
 0x18a   :  { %v4892_v54 = vsel %vm4734_vm0, %v4296_v16, 0.0  ;;  %v4887_v2 = vadd.f32 %v4886_v7, %v4885_v41  ;;  %6931 = vmatmul.mubr.bf16.gmra.mrb[180].mxu0 %v7496_v10  ;;  %7191 = vmatmul.mubr.bf16.gmra.mrb[180].mxu1 %v7530_v40  ;;  %v4297_v56 = vmax.f32 %v2475_v13, 0.0  ;;  %v5437_v35 = vadd.f32 %v5436_v22, %v5435_v47  ;;  %v7537_v47 = vld [vmem:[%s10343_s0 + $0x700] sm:$0xff]  }
 0x18b   :  { %v4888_v17 = vsel %vm4734_vm0, %v4294_v51, 0.0  ;;  %v4295_v1 = vmax.f32 %v2467_v5, 0.0  ;;  %6934 = vmatprep.mubr.bf16.mxu0 %v7499_v50  ;;  %7194 = vmatprep.mubr.bf16.mxu1 %v7533_v14  ;;  %v3499_v7 = vadd.f32 %v8523_v27, %v8033_v61  ;;  %v3491_v23 = vadd.f32 %v8530_v28, %v8033_v61  ;;  %v7500_v14 = vld [vmem:[%s10343_s0 + $0x2e8] sm:$0xff]   ;;  %v7503_v27 = vld [vmem:[%s10343_s0 + $0x2f0] sm:$0xff]  }
 0x18c   :  { %v4889_v20 = vadd.f32 %v4888_v17, %v4887_v2  ;;  %v3512_v40 = vadd.f32 %v7084_v58, %v8033_v61  ;;  %v3504_v50 = vadd.f32 %v3503_v39, %v8033_v61  ;;  %v5439_v16 = vadd.f32 %v5438_v24, %v5437_v35  ;;  %v7534_v58 = vld [vmem:[%s10343_s0 + $0x6f8] sm:$0xff]  }
 0x18d   :  { %v4890_v10 = vsel %vm4734_vm0, %v4295_v1, 0.0  ;;  %v6828_v30 = vpop.f32.mrb[76].mxu0  ;;  %v7088_v46 = vpop.f32.mrb[76].mxu1  ;;  %v4553_v13 = vmax.f32 %v3499_v7, 0.0  ;;  %v4551_v51 = vmax.f32 %v3491_v23, 0.0 }
 0x18e   :  { %v4891_v41 = vadd.f32 %v4890_v10, %v4889_v20  ;;  %v2488_v2 = vadd.f32 %v6828_v30, %v8033_v61  ;;  %v2479_v22 = vpop.f32.mrb[77].mxu0  ;;  %v3519_v28 = vpop.f32.mrb[77].mxu1  ;;  %v4556_v5 = vmax.f32 %v3512_v40, 0.0  ;;  %v4554_v18 = vmax.f32 %v3504_v50, 0.0 }
 0x18f   :  { %v2480_v39 = vadd.f32 %v2479_v22, %v8033_v61  ;;  %v6829_v57 = vpop.f32.mrb[78].mxu0  ;;  %v8588_v60 = vpop.f32.mrb[78].mxu1  ;;  %v5441_v35 = vadd.f32 %v5440_v53, %v5439_v16  ;;  %v4894_v10 = vsel %vm4734_vm0, %v4297_v56, 0.0  ;;  %v5442_v40 = vsel %vm4734_vm0, %v4551_v51, 0.0 }
 0x190   :  { %v4893_v17 = vadd.f32 %v4892_v54, %v4891_v41  ;;  %v4300_v24 = vmax.f32 %v2488_v2, 0.0  ;;  %v2491_v1 = vadd.f32 %v6829_v57, %v8033_v61  ;;  %v2482_v20 = vpop.f32.mrb[79].mxu0  ;;  %v8594_v7 = vpop.f32.mrb[79].mxu1  ;;  %v5446_v54 = vsel %vm4734_vm0, %v4553_v13, 0.0 }
 0x191   :  { %v4298_v30 = vmax.f32 %v2480_v39, 0.0  ;;  %v2483_v23 = vadd.f32 %v2482_v20, %v8033_v61  ;;  %v5443_v41 = vadd.f32 %v5442_v40, %v5441_v35  ;;  %v5452_v56 = vsel %vm4734_vm0, %v4556_v5, 0.0 }
 0x192   :  { %v4900_v50 = vsel %vm4734_vm0, %v4300_v24, 0.0  ;;  %v4895_v22 = vadd.f32 %v4894_v10, %v4893_v17  ;;  %6935 = vmatmul.mubr.bf16.gmra.mrb[184].mxu0 %v7500_v14  ;;  %7195 = vmatmul.mubr.bf16.gmra.mrb[184].mxu1 %v7534_v58  ;;  %v4301_v53 = vmax.f32 %v2491_v1, 0.0  ;;  %v5448_v51 = vsel %vm4734_vm0, %v4554_v18, 0.0  ;;  %v7504_v18 = vld [vmem:[%s10343_s0 + $0x2f8] sm:$0xff]  }
 0x193   :  { %v4896_v2 = vsel %vm4734_vm0, %v4298_v30, 0.0  ;;  %v4299_v16 = vmax.f32 %v2483_v23, 0.0  ;;  %6938 = vmatprep.mubr.bf16.mxu0 %v7503_v27  ;;  %7198 = vmatprep.mubr.bf16.mxu1 %v7537_v47  ;;  %v5445_v57 = vadd.f32 %v5444_v0, %v5443_v41  ;;  %v3515_v17 = vadd.f32 %v8555_v34, %v8033_v61  ;;  %v7507_v34 = vld [vmem:[%s10343_s0 + $0x300] sm:$0xff]   ;;  %v7541_v41 = vld [vmem:[%s10343_s0 + $0x710] sm:$0xff]  }
 0x194   :  { %v4897_v39 = vadd.f32 %v4896_v2, %v4895_v22  ;;  %v3507_v58 = vadd.f32 %v8561_v43, %v8033_v61  ;;  %v3528_v24 = vadd.f32 %v7088_v46, %v8033_v61  ;;  %v3520_v27 = vadd.f32 %v3519_v28, %v8033_v61  ;;  %v7538_v46 = vld [vmem:[%s10343_s0 + $0x708] sm:$0xff]  }
 0x195   :  { %v4898_v14 = vsel %vm4734_vm0, %v4299_v16, 0.0  ;;  %v6832_v13 = vpop.f32.mrb[80].mxu0  ;;  %v7092_v1 = vpop.f32.mrb[80].mxu1  ;;  %v5447_v20 = vadd.f32 %v5446_v54, %v5445_v57  ;;  %v4557_v35 = vmax.f32 %v3515_v17, 0.0 }
 0x196   :  { %v4899_v5 = vadd.f32 %v4898_v14, %v4897_v39  ;;  %v2504_v47 = vadd.f32 %v6832_v13, %v8033_v61  ;;  %v2495_v0 = vpop.f32.mrb[81].mxu0  ;;  %v3535_v43 = vpop.f32.mrb[81].mxu1  ;;  %v4555_v30 = vmax.f32 %v3507_v58, 0.0  ;;  %v4560_v23 = vmax.f32 %v3528_v24, 0.0 }
 0x197   :  { %v2496_v28 = vadd.f32 %v2495_v0, %v8033_v61  ;;  %v6833_v10 = vpop.f32.mrb[82].mxu0  ;;  %v4558_v40 = vmax.f32 %v3520_v27, 0.0  ;;  %v8622_v22 = vpop.f32.mrb[82].mxu1  ;;  %v5449_v57 = vadd.f32 %v5448_v51, %v5447_v20  ;;  %v4902_v14 = vsel %vm4734_vm0, %v4301_v53, 0.0 }
 0x198   :  { %v4901_v2 = vadd.f32 %v4900_v50, %v4899_v5  ;;  %v4304_v54 = vmax.f32 %v2504_v47, 0.0  ;;  %v2507_v16 = vadd.f32 %v6833_v10, %v8033_v61  ;;  %v2498_v39 = vpop.f32.mrb[83].mxu0  ;;  %v8628_v17 = vpop.f32.mrb[83].mxu1  ;;  %v5450_v24 = vsel %vm4734_vm0, %v4555_v30, 0.0 }
 0x199   :  { %v4302_v13 = vmax.f32 %v2496_v28, 0.0  ;;  %v2499_v58 = vadd.f32 %v2498_v39, %v8033_v61  ;;  %v5454_v50 = vsel %vm4734_vm0, %v4557_v35, 0.0  ;;  %v5451_v5 = vadd.f32 %v5450_v24, %v5449_v57 }
 0x19a   :  { %v4908_v27 = vsel %vm4734_vm0, %v4304_v54, 0.0  ;;  %v4903_v0 = vadd.f32 %v4902_v14, %v4901_v2  ;;  %6939 = vmatmul.mubr.bf16.gmra.mrb[188].mxu0 %v7504_v18  ;;  %7199 = vmatmul.mubr.bf16.gmra.mrb[188].mxu1 %v7538_v46  ;;  %v4305_v51 = vmax.f32 %v2507_v16, 0.0  ;;  %v5460_v53 = vsel %vm4734_vm0, %v4560_v23, 0.0 }
 0x19b   :  { %v4904_v47 = vsel %vm4734_vm0, %v4302_v13, 0.0  ;;  %v4303_v20 = vmax.f32 %v2499_v58, 0.0  ;;  %6942 = vmatprep.mubr.bf16.mxu0 %v7507_v34  ;;  %7202 = vmatprep.mubr.bf16.mxu1 %v7541_v41  ;;  %v5453_v10 = vadd.f32 %v5452_v56, %v5451_v5  ;;  %v5456_v30 = vsel %vm4734_vm0, %v4558_v40, 0.0  ;;  %v7508_v40 = vld [vmem:[%s10343_s0 + $0x308] sm:$0xff]   ;;  %v7545_v5 = vld [vmem:[%s10343_s0 + $0x720] sm:$0xff]  }
 0x19c   :  { %v4905_v28 = vadd.f32 %v4904_v47, %v4903_v0  ;;  %v3531_v2 = vadd.f32 %v8588_v60, %v8033_v61  ;;  %v3523_v46 = vadd.f32 %v8594_v7, %v8033_v61  ;;  %v3544_v54 = vadd.f32 %v7092_v1, %v8033_v61  ;;  %v7511_v60 = vld [vmem:[%s10343_s0 + $0x310] sm:$0xff]   ;;  %v7542_v1 = vld [vmem:[%s10343_s0 + $0x718] sm:$0xff]  }
 0x19d   :  { %v4906_v18 = vsel %vm4734_vm0, %v4303_v20, 0.0  ;;  %v6836_v35 = vpop.f32.mrb[84].mxu0  ;;  %v3536_v34 = vadd.f32 %v3535_v43, %v8033_v61  ;;  %v7096_v16 = vpop.f32.mrb[84].mxu1  ;;  %v5455_v39 = vadd.f32 %v5454_v50, %v5453_v10  ;;  %v4910_v43 = vsel %vm4734_vm0, %v4305_v51, 0.0 }
 0x19e   :  { %v4907_v23 = vadd.f32 %v4906_v18, %v4905_v28  ;;  %v2520_v41 = vadd.f32 %v6836_v35, %v8033_v61  ;;  %v2511_v56 = vpop.f32.mrb[85].mxu0  ;;  %v4561_v57 = vmax.f32 %v3531_v2, 0.0  ;;  %v3551_v7 = vpop.f32.mrb[85].mxu1  ;;  %v4559_v58 = vmax.f32 %v3523_v46, 0.0 }
 0x19f   :  { %v2512_v14 = vadd.f32 %v2511_v56, %v8033_v61  ;;  %v6837_v13 = vpop.f32.mrb[86].mxu0  ;;  %v4564_v24 = vmax.f32 %v3544_v54, 0.0  ;;  %v8657_v0 = vpop.f32.mrb[86].mxu1  ;;  %v5457_v10 = vadd.f32 %v5456_v30, %v5455_v39  ;;  %v4562_v46 = vmax.f32 %v3536_v34, 0.0 }
 0x1a0   :  { %v4909_v50 = vadd.f32 %v4908_v27, %v4907_v23  ;;  %v4308_v47 = vmax.f32 %v2520_v41, 0.0  ;;  %v2523_v20 = vadd.f32 %v6837_v13, %v8033_v61  ;;  %v2514_v28 = vpop.f32.mrb[87].mxu0  ;;  %v8663_v2 = vpop.f32.mrb[87].mxu1  ;;  %v5458_v35 = vsel %vm4734_vm0, %v4559_v58, 0.0 }
 0x1a1   :  { %v4306_v51 = vmax.f32 %v2512_v14, 0.0  ;;  %v2515_v18 = vadd.f32 %v2514_v28, %v8033_v61  ;;  %v5462_v56 = vsel %vm4734_vm0, %v4561_v57, 0.0  ;;  %v5459_v9 = vadd.f32 %v5458_v35, %v5457_v10 }
 0x1a2   :  { %v4911_v54 = vadd.f32 %v4910_v43, %v4909_v50  ;;  %6943 = vmatmul.mubr.bf16.gmra.mrb[192].mxu0 %v7508_v40  ;;  %7203 = vmatmul.mubr.bf16.gmra.mrb[192].mxu1 %v7542_v1  ;;  %v4916_v27 = vsel %vm4734_vm0, %v4308_v47, 0.0  ;;  %v4309_v41 = vmax.f32 %v2523_v20, 0.0  ;;  %v5468_v13 = vsel %vm4734_vm0, %v4564_v24, 0.0 }
 0x1a3   :  { %v4912_v23 = vsel %vm4734_vm0, %v4306_v51, 0.0  ;;  %v4307_v30 = vmax.f32 %v2515_v18, 0.0  ;;  %6946 = vmatprep.mubr.bf16.mxu0 %v7511_v60  ;;  %7206 = vmatprep.mubr.bf16.mxu1 %v7545_v5  ;;  %v5461_v14 = vadd.f32 %v5460_v53, %v5459_v9  ;;  %v3547_v34 = vadd.f32 %v8622_v22, %v8033_v61  ;;  %v7512_v53 = vld [vmem:[%s10343_s0 + $0x318] sm:$0xff]   ;;  %v7515_v22 = vld [vmem:[%s10343_s0 + $0x320] sm:$0xff]  }
 0x1a4   :  { %v4913_v39 = vadd.f32 %v4912_v23, %v4911_v54  ;;  %v5464_v1 = vsel %vm4734_vm0, %v4562_v46, 0.0  ;;  %v3539_v43 = vadd.f32 %v8628_v17, %v8033_v61  ;;  %v3552_v58 = vadd.f32 %v3551_v7, %v8033_v61  ;;  %v7546_v17 = vld [vmem:[%s10343_s0 + $0x728] sm:$0xff]   ;;  %v7549_v46 = vld [vmem:[%s10343_s0 + $0x730] sm:$0xff]  }
 0x1a5   :  { %v4914_v40 = vsel %vm4734_vm0, %v4307_v30, 0.0  ;;  %v6840_v57 = vpop.f32.mrb[88].mxu0  ;;  %v7100_v50 = vpop.f32.mrb[88].mxu1  ;;  %v5463_v24 = vadd.f32 %v5462_v56, %v5461_v14  ;;  %v3560_v47 = vadd.f32 %v7096_v16, %v8033_v61  ;;  %v4918_v7 = vsel %vm4734_vm0, %v4309_v41, 0.0 }
 0x1a6   :  { %v4915_v60 = vadd.f32 %v4914_v40, %v4913_v39  ;;  %v2536_v5 = vadd.f32 %v6840_v57, %v8033_v61  ;;  %v2527_v9 = vpop.f32.mrb[89].mxu0  ;;  %v3567_v20 = vpop.f32.mrb[89].mxu1  ;;  %v4565_v51 = vmax.f32 %v3547_v34, 0.0  ;;  %v4563_v18 = vmax.f32 %v3539_v43, 0.0 }
 0x1a7   :  { %v2528_v28 = vadd.f32 %v2527_v9, %v8033_v61  ;;  %v6841_v10 = vpop.f32.mrb[90].mxu0  ;;  %v8691_v35 = vpop.f32.mrb[90].mxu1  ;;  %v5465_v30 = vadd.f32 %v5464_v1, %v5463_v24  ;;  %v4566_v40 = vmax.f32 %v3552_v58, 0.0  ;;  %v4568_v9 = vmax.f32 %v3560_v47, 0.0 }
 0x1a8   :  { %v4917_v54 = vadd.f32 %v4916_v27, %v4915_v60  ;;  %v4312_v16 = vmax.f32 %v2536_v5, 0.0  ;;  %v2539_v56 = vadd.f32 %v6841_v10, %v8033_v61  ;;  %v2530_v23 = vpop.f32.mrb[91].mxu0  ;;  %v8697_v39 = vpop.f32.mrb[91].mxu1  ;;  %v5466_v34 = vsel %vm4734_vm0, %v4563_v18, 0.0 }
 0x1a9   :  { %v4310_v41 = vmax.f32 %v2528_v28, 0.0  ;;  %v2531_v14 = vadd.f32 %v2530_v23, %v8033_v61  ;;  %v5467_v43 = vadd.f32 %v5466_v34, %v5465_v30  ;;  %v5470_v1 = vsel %vm4734_vm0, %v4565_v51, 0.0 }
 0x1aa   :  { %v4919_v57 = vadd.f32 %v4918_v7, %v4917_v54  ;;  %6947 = vmatmul.mubr.bf16.gmra.mrb[196].mxu0 %v7512_v53  ;;  %7207 = vmatmul.mubr.bf16.gmra.mrb[196].mxu1 %v7546_v17  ;;  %v4924_v27 = vsel %vm4734_vm0, %v4312_v16, 0.0  ;;  %v4313_v28 = vmax.f32 %v2539_v56, 0.0  ;;  %v3563_v58 = vadd.f32 %v8657_v0, %v8033_v61  ;;  %v7516_v0 = vld [vmem:[%s10343_s0 + $0x328] sm:$0xff]  }
 0x1ab   :  { %v4920_v60 = vsel %vm4734_vm0, %v4310_v41, 0.0  ;;  %v4311_v5 = vmax.f32 %v2531_v14, 0.0  ;;  %6950 = vmatprep.mubr.bf16.mxu0 %v7515_v22  ;;  %7210 = vmatprep.mubr.bf16.mxu1 %v7549_v46  ;;  %v5469_v10 = vadd.f32 %v5468_v13, %v5467_v43  ;;  %v5472_v47 = vsel %vm4734_vm0, %v4566_v40, 0.0  ;;  %v7519_v13 = vld [vmem:[%s10343_s0 + $0x330] sm:$0xff]  }
 0x1ac   :  { %v4921_v24 = vadd.f32 %v4920_v60, %v4919_v57  ;;  %v3555_v17 = vadd.f32 %v8663_v2, %v8033_v61  ;;  %v3568_v18 = vadd.f32 %v3567_v20, %v8033_v61  ;;  %v3576_v56 = vadd.f32 %v7100_v50, %v8033_v61  ;;  %v7550_v20 = vld [vmem:[%s10343_s0 + $0x738] sm:$0xff]   ;;  %v7553_v57 = vld [vmem:[%s10343_s0 + $0x740] sm:$0xff]  }
 0x1ad   :  { %v4922_v53 = vsel %vm4734_vm0, %v4311_v5, 0.0  ;;  %v6844_v7 = vpop.f32.mrb[92].mxu0  ;;  %v8711_v22 = vpop.f32.mrb[92].mxu1  ;;  %v5471_v16 = vadd.f32 %v5470_v1, %v5469_v10  ;;  %v5476_v41 = vsel %vm4734_vm0, %v4568_v9, 0.0  ;;  %v4569_v14 = vmax.f32 %v3563_v58, 0.0 }
 0x1ae   :  { %v4923_v51 = vadd.f32 %v4922_v53, %v4921_v24  ;;  %v2552_v46 = vadd.f32 %v6844_v7, %v8033_v61  ;;  %v2543_v54 = vpop.f32.mrb[93].mxu0  ;;  %v3583_v2 = vpop.f32.mrb[93].mxu1  ;;  %v4567_v34 = vmax.f32 %v3555_v17, 0.0  ;;  %v4926_v50 = vsel %vm4734_vm0, %v4313_v28, 0.0 }
 0x1af   :  { %v2544_v23 = vadd.f32 %v2543_v54, %v8033_v61  ;;  %v6845_v30 = vpop.f32.mrb[94].mxu0  ;;  %v8726_v40 = vpop.f32.mrb[94].mxu1  ;;  %v5473_v5 = vadd.f32 %v5472_v47, %v5471_v16  ;;  %v4570_v1 = vmax.f32 %v3568_v18, 0.0  ;;  %v4572_v31 = vmax.f32 %v3576_v56, 0.0 }
 0x1b0   :  { %v4925_v43 = vadd.f32 %v4924_v27, %v4923_v51  ;;  %v2546_v60 = vpop.f32.mrb[95].mxu0  ;;  %v8732_v24 = vpop.f32.mrb[95].mxu1  ;;  %v2555_v53 = vadd.f32 %v6845_v30, %v8033_v61  ;;  %v5474_v58 = vsel %vm4734_vm0, %v4567_v34, 0.0  ;;  %v4316_v7 = vmax.f32 %v2552_v46, 0.0 }
 0x1b1   :  { %v4314_v10 = vmax.f32 %v2544_v23, 0.0  ;;  %v2547_v9 = vadd.f32 %v2546_v60, %v8033_v61  ;;  %v5475_v54 = vadd.f32 %v5474_v58, %v5473_v5  ;;  %v5478_v47 = vsel %vm4734_vm0, %v4569_v14, 0.0 }
 0x1b2   :  { %v4927_v17 = vadd.f32 %v4926_v50, %v4925_v43  ;;  %6951 = vmatmul.mubr.bf16.gmra.mrb[200].mxu0 %v7516_v0  ;;  %7211 = vmatmul.mubr.bf16.gmra.mrb[200].mxu1 %v7550_v20  ;;  %v3579_v16 = vadd.f32 %v8691_v35, %v8033_v61  ;;  %v4317_v23 = vmax.f32 %v2555_v53, 0.0  ;;  %v5480_v0 = vsel %vm4734_vm0, %v4570_v1, 0.0  ;;  %v7554_v43 = vld [vmem:[%s10343_s0 + $0x748] sm:$0xff]   ;;  %v7523_v1 = vld [vmem:[%s10343_s0 + $0x340] sm:$0xff]  }
 0x1b3   :  { %v4928_v27 = vsel %vm4734_vm0, %v4314_v10, 0.0  ;;  %v4315_v28 = vmax.f32 %v2547_v9, 0.0  ;;  %6954 = vmatprep.mubr.bf16.mxu0 %v7519_v13  ;;  %7214 = vmatprep.mubr.bf16.mxu1 %v7553_v57  ;;  %v5477_v51 = vadd.f32 %v5476_v41, %v5475_v54  ;;  %v3571_v56 = vadd.f32 %v8697_v39, %v8033_v61  ;;  %v7520_v41 = vld [vmem:[%s10343_s0 + $0x338] sm:$0xff]  }
 0x1b4   :  { %v4929_v18 = vadd.f32 %v4928_v27, %v4927_v17  ;;  %v4932_v13 = vsel %vm4734_vm0, %v4316_v7, 0.0  ;;  %v5484_v35 = vsel %vm4734_vm0, %v4572_v31, 0.0  ;;  %v4573_v10 = vmax.f32 %v3579_v16, 0.0  ;;  %v7557_v31 = vld [vmem:[%s10343_s0 + $0x750] sm:$0xff]  }
 0x1b5   :  { %v4930_v46 = vsel %vm4734_vm0, %v4315_v28, 0.0  ;;  %v6848_v30 = vpop.f32.mrb[96].mxu0  ;;  %v8745_v20 = vpop.f32.mrb[96].mxu1  ;;  %v5479_v57 = vadd.f32 %v5478_v47, %v5477_v51  ;;  %v4571_v53 = vmax.f32 %v3571_v56, 0.0  ;;  %v3584_v27 = vadd.f32 %v3583_v2, %v8033_v61 }
 0x1b6   :  { %v4931_v14 = vadd.f32 %v4930_v46, %v4929_v18  ;;  %v2559_v34 = vpop.f32.mrb[97].mxu0  ;;  %v8752_v50 = vpop.f32.mrb[97].mxu1  ;;  %v2568_v39 = vadd.f32 %v6848_v30, %v8033_v61  ;;  %v4934_v47 = vsel %vm4734_vm0, %v4317_v23, 0.0  ;;  %v3592_v56 = vadd.f32 %v8711_v22, %v8033_v61 }
 0x1b7   :  { %v2560_v60 = vadd.f32 %v2559_v34, %v8033_v61  ;;  %v6849_v5 = vpop.f32.mrb[98].mxu0  ;;  %v8762_v9 = vpop.f32.mrb[98].mxu1  ;;  %v5481_v54 = vadd.f32 %v5480_v0, %v5479_v57  ;;  %v5482_v16 = vsel %vm4734_vm0, %v4571_v53, 0.0  ;;  %v5486_v2 = vsel %vm4734_vm0, %v4573_v10, 0.0 }
 0x1b8   :  { %v4933_v58 = vadd.f32 %v4932_v13, %v4931_v14  ;;  %v2571_v7 = vadd.f32 %v6849_v5, %v8033_v61  ;;  %v2562_v17 = vpop.f32.mrb[99].mxu0  ;;  %v8769_v28 = vpop.f32.mrb[99].mxu1  ;;  %v4320_v0 = vmax.f32 %v2568_v39, 0.0  ;;  %v4574_v34 = vmax.f32 %v3584_v27, 0.0 }
 0x1b9   :  { %v4318_v18 = vmax.f32 %v2560_v60, 0.0  ;;  %v2563_v51 = vadd.f32 %v2562_v17, %v8033_v61  ;;  %v5483_v30 = vadd.f32 %v5482_v16, %v5481_v54  ;;  %v3587_v22 = vadd.f32 %v8732_v24, %v8033_v61  ;;  %v7527_v54 = vld [vmem:[%s10343_s0 + $0x350] sm:$0xff]  }
 0x1ba   :  { %v8774_v46 = vadd.f32 %v4934_v47, %v4933_v58  ;;  %6955 = vmatmul.mubr.bf16.gmra.mrb[204].mxu0 %v7520_v41  ;;  %7215 = vmatmul.mubr.bf16.gmra.mrb[204].mxu1 %v7554_v43  ;;  %v4321_v23 = vmax.f32 %v2571_v7, 0.0  ;;  %v3595_v41 = vadd.f32 %v8726_v40, %v8033_v61  ;;  %v4576_v53 = vmax.f32 %v3592_v56, 0.0  ;;  %v7558_v40 = vld [vmem:[%s10343_s0 + $0x758] sm:$0xff]  }
 0x1bb   :  { %v4319_v13 = vmax.f32 %v2563_v51, 0.0  ;;  %6958 = vmatprep.mubr.bf16.mxu0 %v7523_v1  ;;  %7218 = vmatprep.mubr.bf16.mxu1 %v7557_v31  ;;  %v5485_v14 = vadd.f32 %v5484_v35, %v5483_v30  ;;  %v4942_v57 = vsel %vm4734_vm0, %v4318_v18, 0.0  ;;  %v7524_v35 = vld [vmem:[%s10343_s0 + $0x348] sm:$0xff]   ;;  %v4945_v58 = vsel %vm4734_vm0, %v4320_v0, 0.0  ;;  %v7561_v18 = vld [vmem:[%s10343_s0 + $0x760] sm:$0xff]  }
 0x1bc   :  { %v4575_v27 = vmax.f32 %v3587_v22, 0.0  ;;  %v4947_v51 = vsel %vm4734_vm0, %v4321_v23, 0.0  ;;  %v5494_v0 = vsel %vm4734_vm0, %v4574_v34, 0.0  ;;  %v5497_v22 = vsel %vm4734_vm0, %v4576_v53, 0.0 }
 0x1bd   :  { %v4943_v60 = vsel %vm4734_vm0, %v4319_v13, 0.0  ;;  %v6852_v5 = vpop.f32.mrb[100].mxu0  ;;  %v8785_v43 = vpop.f32.mrb[100].mxu1  ;;  %v8790_v10 = vadd.f32 %v5486_v2, %v5485_v14 }
 0x1be   :  { %v4944_v39 = vadd.f32 %v4943_v60, %v4942_v57  ;;  %v2575_v1 = vpop.f32.mrb[101].mxu0  ;;  %v8792_v31 = vpop.f32.mrb[101].mxu1  ;;  %v2584_v24 = vadd.f32 %v6852_v5, %v8033_v61  ;;  %v4577_v57 = vmax.f32 %v3595_v41, 0.0  ;;  %v3600_v60 = vadd.f32 %v8752_v50, %v8033_v61 }
 0x1bf   :  { %10373 = vst [vmem:[#allocation24_spill] sm:$0xff] %v8790_v10  ;;  %v2576_v7 = vadd.f32 %v2575_v1, %v8033_v61  ;;  %v6853_v17 = vpop.f32.mrb[102].mxu0  ;;  %v8803_v47 = vpop.f32.mrb[102].mxu1  ;;  %v5495_v34 = vsel %vm4734_vm0, %v4575_v27, 0.0  ;;  %v3608_v41 = vadd.f32 %v8745_v20, %v8033_v61  ;;  %v8859_v10 = vadd.f32 %v8043_v3, %v8033_v61 }
 0x1c0   :  { %v4946_v16 = vadd.f32 %v4945_v58, %v4944_v39  ;;  %v2587_v30 = vadd.f32 %v6853_v17, %v8033_v61  ;;  %v2578_v56 = vpop.f32.mrb[103].mxu0  ;;  %v8811_v13 = vpop.f32.mrb[103].mxu1  ;;  %v4324_v23 = vmax.f32 %v2584_v24, 0.0  ;;  %v5496_v17 = vadd.f32 %v5495_v34, %v5494_v0 }
 0x1c1   :  { %v4322_v2 = vmax.f32 %v2576_v7, 0.0  ;;  %v2579_v14 = vadd.f32 %v2578_v56, %v8033_v61  ;;  %v5499_v53 = vsel %vm4734_vm0, %v4577_v57, 0.0  ;;  %v3603_v3 = vadd.f32 %v8769_v28, %v8033_v61  ;;  %v7532_v28 = vld [vmem:[%s10343_s0 + $0x368] sm:$0xff]  }
 0x1c2   :  { %v4948_v5 = vadd.f32 %v4947_v51, %v4946_v16  ;;  %6959 = vmatmul.mubr.bf16.gmra.mrb[208].mxu0 %v7524_v35  ;;  %7219 = vmatmul.mubr.bf16.gmra.mrb[208].mxu1 %v7558_v40  ;;  %v4325_v7 = vmax.f32 %v2587_v30, 0.0  ;;  %v4578_v40 = vmax.f32 %v3600_v60, 0.0  ;;  %v7528_v51 = vld [vmem:[%s10343_s0 + $0x358] sm:$0xff]   ;;  %v5498_v16 = vadd.f32 %v5497_v22, %v5496_v17  ;;  %v7562_v30 = vld [vmem:[%s10343_s0 + $0x768] sm:$0xff]  }
 0x1c3   :  { %v4949_v39 = vsel %vm4734_vm0, %v4322_v2, 0.0  ;;  %v4323_v1 = vmax.f32 %v2579_v14, 0.0  ;;  %6962 = vmatprep.mubr.bf16.mxu0 %v7527_v54  ;;  %7222 = vmatprep.mubr.bf16.mxu1 %v7561_v18  ;;  %v8827_v54 = vadd.f32 %v8035_v63, %v8033_v61  ;;  %v4953_v56 = vsel %vm4734_vm0, %v4324_v23, 0.0  ;;  %v7531_v14 = vld [vmem:[%s10343_s0 + $0x360] sm:$0xff]  }
 0x1c4   :  { %v4950_v58 = vadd.f32 %v4949_v39, %v4948_v5  ;;  %v5501_v57 = vsel %vm4734_vm0, %v4578_v40, 0.0  ;;  %v7565_v5 = vld [vmem:[%s10343_s0 + $0x770] sm:$0xff]   ;;  %v4955_v22 = vsel %vm4734_vm0, %v4325_v7, 0.0  ;;  %v5500_v34 = vadd.f32 %v5499_v53, %v5498_v16 }
 0x1c5   :  { %v4951_v50 = vsel %vm4734_vm0, %v4323_v1, 0.0  ;;  %v6856_v35 = vpop.f32.mrb[104].mxu0  ;;  %v8823_v24 = vpop.f32.mrb[104].mxu1  ;;  %v4580_v1 = vmax.f32 %v3608_v41, 0.0  ;;  %v3611_v40 = vadd.f32 %v8762_v9, %v8033_v61  ;;  %v8863_v53 = vadd.f32 %v8050_v8, %v8033_v61 }
 0x1c6   :  { %v4952_v27 = vadd.f32 %v4951_v50, %v4950_v58  ;;  %v2591_v18 = vpop.f32.mrb[105].mxu0  ;;  %v8832_v20 = vpop.f32.mrb[105].mxu1  ;;  %v2600_v0 = vadd.f32 %v6856_v35, %v8033_v61  ;;  %v5502_v41 = vadd.f32 %v5501_v57, %v5500_v34 }
 0x1c7   :  { %v2592_v63 = vadd.f32 %v2591_v18, %v8033_v61  ;;  %v6857_v2 = vpop.f32.mrb[106].mxu0  ;;  %v8844_v60 = vpop.f32.mrb[106].mxu1  ;;  %v4581_v57 = vmax.f32 %v3611_v40, 0.0 }
 0x1c8   :  { %v4954_v23 = vadd.f32 %v4953_v56, %v4952_v27  ;;  %v2594_v39 = vpop.f32.mrb[107].mxu0  ;;  %v8850_v58 = vpop.f32.mrb[107].mxu1  ;;  %v2603_v50 = vadd.f32 %v6857_v2, %v8033_v61  ;;  %v4328_v27 = vmax.f32 %v2600_v0, 0.0  ;;  %v3616_v0 = vadd.f32 %v8792_v31, %v8033_v61  ;;  %v7566_v31 = vld [vmem:[%s10343_s0 + $0x778] sm:$0xff]  }
 0x1c9   :  { %v4326_v17 = vmax.f32 %v2592_v63, 0.0  ;;  %v2595_v35 = vadd.f32 %v2594_v39, %v8033_v61  ;;  %v5505_v63 = vsel %vm4734_vm0, %v4580_v1, 0.0  ;;  %v4579_v39 = vmax.f32 %v3603_v3, 0.0 }
 0x1ca   :  { %v4956_v7 = vadd.f32 %v4955_v22, %v4954_v23  ;;  %6963 = vmatmul.mubr.bf16.gmra.mrb[212].mxu0 %v7528_v51  ;;  %7223 = vmatmul.mubr.bf16.gmra.mrb[212].mxu1 %v7562_v30  ;;  %v3624_v51 = vadd.f32 %v8785_v43, %v8033_v61  ;;  %v4329_v30 = vmax.f32 %v2603_v50, 0.0  ;;  %v3619_v43 = vadd.f32 %v8811_v13, %v8033_v61 }
 0x1cb   :  { %v4957_v16 = vsel %vm4734_vm0, %v4326_v17, 0.0  ;;  %v4327_v56 = vmax.f32 %v2595_v35, 0.0  ;;  %6966 = vmatprep.mubr.bf16.mxu0 %v7531_v14  ;;  %7226 = vmatprep.mubr.bf16.mxu1 %v7565_v5  ;;  %v4961_v34 = vsel %vm4734_vm0, %v4328_v27, 0.0  ;;  %v7535_v35 = vld [vmem:[%s10343_s0 + $0x370] sm:$0xff]   ;;  %v5503_v3 = vsel %vm4734_vm0, %v4579_v39, 0.0 }
 0x1cc   :  { %v4958_v9 = vadd.f32 %v4957_v16, %v4956_v7  ;;  %v4584_v40 = vmax.f32 %v3624_v51, 0.0  ;;  %v8894_v7 = vadd.f32 %v8803_v47, %v8033_v61  ;;  %v7569_v16 = vld [vmem:[%s10343_s0 + $0x780] sm:$0xff]   ;;  %v4963_v51 = vsel %vm4734_vm0, %v4329_v30, 0.0 }
 0x1cd   :  { %v4959_v2 = vsel %vm4734_vm0, %v4327_v56, 0.0  ;;  %v6860_v8 = vpop.f32.mrb[108].mxu0  ;;  %v8874_v22 = vpop.f32.mrb[108].mxu1  ;;  %v5504_v18 = vadd.f32 %v5503_v3, %v5502_v41  ;;  %v5507_v29 = vsel %vm4734_vm0, %v4581_v57, 0.0 }
 0x1ce   :  { %v4960_v14 = vadd.f32 %v4959_v2, %v4958_v9  ;;  %v2616_v5 = vadd.f32 %v6860_v8, %v8033_v61  ;;  %v2607_v23 = vpop.f32.mrb[109].mxu0  ;;  %v8882_v1 = vpop.f32.mrb[109].mxu1  ;;  %v4582_v2 = vmax.f32 %v3616_v0, 0.0  ;;  %v5513_v30 = vsel %vm4734_vm0, %v4584_v40, 0.0 }
 0x1cf   :  { %v2608_v17 = vadd.f32 %v2607_v23, %v8033_v61  ;;  %v6861_v50 = vpop.f32.mrb[110].mxu0  ;;  %v8896_v13 = vpop.f32.mrb[110].mxu1  ;;  %v5506_v0 = vadd.f32 %v5505_v63, %v5504_v18  ;;  %v4585_v41 = vmax.f32 %v8894_v7, 0.0  ;;  %v7536_v7 = vld [vmem:[%s10343_s0 + $0x378] sm:$0xff]  }
 0x1d0   :  { %v4962_v56 = vadd.f32 %v4961_v34, %v4960_v14  ;;  %v2619_v27 = vadd.f32 %v6861_v50, %v8033_v61  ;;  %v2610_v9 = vpop.f32.mrb[111].mxu0  ;;  %v8903_v8 = vpop.f32.mrb[111].mxu1  ;;  %v4332_v15 = vmax.f32 %v2616_v5, 0.0  ;;  %v4583_v14 = vmax.f32 %v3619_v43, 0.0 }
 0x1d1   :  { %v4330_v23 = vmax.f32 %v2608_v17, 0.0  ;;  %v2611_v47 = vadd.f32 %v2610_v9, %v8033_v61  ;;  %v5509_v17 = vsel %vm4734_vm0, %v4582_v2, 0.0  ;;  %v5508_v57 = vadd.f32 %v5507_v29, %v5506_v0  ;;  %v7573_v2 = vld [vmem:[%s10343_s0 + $0x790] sm:$0xff]  }
 0x1d2   :  { %v4964_v44 = vadd.f32 %v4963_v51, %v4962_v56  ;;  %6967 = vmatmul.mubr.bf16.gmra.mrb[216].mxu0 %v7532_v28  ;;  %7227 = vmatmul.mubr.bf16.gmra.mrb[216].mxu1 %v7566_v31  ;;  %v4333_v50 = vmax.f32 %v2619_v27, 0.0  ;;  %v3640_v43 = vadd.f32 %v8823_v24, %v8033_v61  ;;  %v3632_v31 = vadd.f32 %v8832_v20, %v8033_v61  ;;  %v7570_v24 = vld [vmem:[%s10343_s0 + $0x788] sm:$0xff]   ;;  %v7539_v56 = vld [vmem:[%s10343_s0 + $0x380] sm:$0xff]  }
 0x1d3   :  { %v4965_v34 = vsel %vm4734_vm0, %v4330_v23, 0.0  ;;  %v4331_v39 = vmax.f32 %v2611_v47, 0.0  ;;  %6970 = vmatprep.mubr.bf16.mxu0 %v7535_v35  ;;  %7230 = vmatprep.mubr.bf16.mxu1 %v7569_v16  ;;  %v5511_v29 = vsel %vm4734_vm0, %v4583_v14, 0.0  ;;  %v5510_v27 = vadd.f32 %v5509_v17, %v5508_v57 }
 0x1d4   :  { %v4966_v48 = vadd.f32 %v4965_v34, %v4964_v44  ;;  %v4969_v44 = vsel %vm4734_vm0, %v4332_v15, 0.0  ;;  %v4971_v20 = vsel %vm4734_vm0, %v4333_v50, 0.0  ;;  %v3635_v9 = vadd.f32 %v8850_v58, %v8033_v61 }
 0x1d5   :  { %v4967_v5 = vsel %vm4734_vm0, %v4331_v39, 0.0  ;;  %v6864_v28 = vpop.f32.mrb[112].mxu0  ;;  %v8917_v35 = vpop.f32.mrb[112].mxu1  ;;  %v4586_v14 = vmax.f32 %v3632_v31, 0.0  ;;  %v3643_v34 = vadd.f32 %v8844_v60, %v8033_v61  ;;  %v5512_v58 = vadd.f32 %v5511_v29, %v5510_v27 }
 0x1d6   :  { %v4968_v18 = vadd.f32 %v4967_v5, %v4966_v48  ;;  %v2632_v63 = vadd.f32 %v6864_v28, %v8033_v61  ;;  %v2623_v40 = vpop.f32.mrb[113].mxu0  ;;  %v8925_v16 = vpop.f32.mrb[113].mxu1  ;;  %v4588_v17 = vmax.f32 %v3640_v43, 0.0  ;;  %v4587_v60 = vmax.f32 %v3635_v9, 0.0 }
 0x1d7   :  { %v2624_v15 = vadd.f32 %v2623_v40, %v8033_v61  ;;  %v6865_v48 = vpop.f32.mrb[114].mxu0  ;;  %v8937_v3 = vpop.f32.mrb[114].mxu1  ;;  %v5514_v40 = vadd.f32 %v5513_v30, %v5512_v58  ;;  %v3648_v43 = vadd.f32 %v8882_v1, %v8033_v61  ;;  %v7540_v1 = vld [vmem:[%s10343_s0 + $0x388] sm:$0xff]   ;;  %v3651_v58 = vadd.f32 %v8903_v8, %v8033_v61 }
 0x1d8   :  { %v4970_v51 = vadd.f32 %v4969_v44, %v4968_v18  ;;  %v2635_v23 = vadd.f32 %v6865_v48, %v8033_v61  ;;  %v2626_v47 = vpop.f32.mrb[115].mxu0  ;;  %v8945_v50 = vpop.f32.mrb[115].mxu1  ;;  %v4336_v5 = vmax.f32 %v2632_v63, 0.0  ;;  %v5515_v44 = vsel %vm4734_vm0, %v4585_v41, 0.0 }
 0x1d9   :  { %v4334_v39 = vmax.f32 %v2624_v15, 0.0  ;;  %v2627_v0 = vadd.f32 %v2626_v47, %v8033_v61  ;;  %v5517_v15 = vsel %vm4734_vm0, %v4586_v14, 0.0  ;;  %v4589_v47 = vmax.f32 %v3643_v34, 0.0 }
 0x1da   :  { %v4972_v28 = vadd.f32 %v4971_v20, %v4970_v51  ;;  %v4337_v57 = vmax.f32 %v2635_v23, 0.0  ;;  %6971 = vmatmul.mubr.bf16.gmra.mrb[220].mxu0 %v7536_v7  ;;  %7231 = vmatmul.mubr.bf16.gmra.mrb[220].mxu1 %v7570_v24  ;;  %v5521_v41 = vsel %vm4734_vm0, %v4588_v17, 0.0  ;;  %v5516_v29 = vadd.f32 %v5515_v44, %v5514_v40 }
 0x1db   :  { %v4973_v18 = vsel %vm4734_vm0, %v4334_v39, 0.0  ;;  %v4335_v31 = vmax.f32 %v2627_v0, 0.0  ;;  %6974 = vmatprep.mubr.bf16.mxu0 %v7539_v56  ;;  %7234 = vmatprep.mubr.bf16.mxu1 %v7573_v2  ;;  %v3656_v24 = vadd.f32 %v8874_v22, %v8033_v61  ;;  %v4977_v30 = vsel %vm4734_vm0, %v4336_v5, 0.0  ;;  %v7574_v22 = vld [vmem:[%s10343_s0 + $0x798] sm:$0xff]   ;;  %v7543_v39 = vld [vmem:[%s10343_s0 + $0x390] sm:$0xff]   ;;  %v7575_v5 = vld [vmem:[%s10343_s0 + $0x7a0] sm:$0xff]  }
 0x1dc   :  { %v4974_v48 = vadd.f32 %v4973_v18, %v4972_v28  ;;  %v5519_v2 = vsel %vm4734_vm0, %v4587_v60, 0.0  ;;  %v4979_v23 = vsel %vm4734_vm0, %v4337_v57, 0.0  ;;  %v5518_v0 = vadd.f32 %v5517_v15, %v5516_v29 }
 0x1dd   :  { %v4975_v63 = vsel %vm4734_vm0, %v4335_v31, 0.0  ;;  %v6868_v7 = vpop.f32.mrb[116].mxu0  ;;  %v8957_v20 = vpop.f32.mrb[116].mxu1  ;;  %v4590_v18 = vmax.f32 %v3648_v43, 0.0  ;;  %v3659_v31 = vadd.f32 %v8896_v13, %v8033_v61  ;;  %v4592_v15 = vmax.f32 %v3656_v24, 0.0 }
 0x1de   :  { %v4976_v56 = vadd.f32 %v4975_v63, %v4974_v48  ;;  %v2648_v27 = vadd.f32 %v6868_v7, %v8033_v61  ;;  %v2639_v9 = vpop.f32.mrb[117].mxu0  ;;  %v8965_v51 = vpop.f32.mrb[117].mxu1  ;;  %v5520_v8 = vadd.f32 %v5519_v2, %v5518_v0  ;;  %v4591_v13 = vmax.f32 %v3651_v58, 0.0 }
 0x1df   :  { %v2640_v14 = vadd.f32 %v2639_v9, %v8033_v61  ;;  %v6869_v34 = vpop.f32.mrb[118].mxu0  ;;  %v8977_v17 = vpop.f32.mrb[118].mxu1  ;;  %v3664_v24 = vadd.f32 %v8925_v16, %v8033_v61  ;;  %v7544_v16 = vld [vmem:[%s10343_s0 + $0x398] sm:$0xff]  }
 0x1e0   :  { %v4978_v28 = vadd.f32 %v4977_v30, %v4976_v56  ;;  %v2651_v57 = vadd.f32 %v6869_v34, %v8033_v61  ;;  %v2642_v44 = vpop.f32.mrb[119].mxu0  ;;  %v8985_v40 = vpop.f32.mrb[119].mxu1  ;;  %v4340_v63 = vmax.f32 %v2648_v27, 0.0  ;;  %v5523_v30 = vsel %vm4734_vm0, %v4589_v47, 0.0 }
 0x1e1   :  { %v4338_v60 = vmax.f32 %v2640_v14, 0.0  ;;  %v2643_v48 = vadd.f32 %v2642_v44, %v8033_v61  ;;  %v5522_v9 = vadd.f32 %v5521_v41, %v5520_v8  ;;  %v5525_v14 = vsel %vm4734_vm0, %v4590_v18, 0.0 }
 0x1e2   :  { %v4980_v7 = vadd.f32 %v4979_v23, %v4978_v28  ;;  %v4341_v29 = vmax.f32 %v2651_v57, 0.0  ;;  %6975 = vmatmul.mubr.bf16.gmra.mrb[224].mxu0 %v7540_v1  ;;  %7235 = vmatmul.mubr.bf16.gmra.mrb[224].mxu1 %v7574_v22  ;;  %v4593_v44 = vmax.f32 %v3659_v31, 0.0  ;;  %v5529_v47 = vsel %vm4734_vm0, %v4592_v15, 0.0 }
 0x1e3   :  { %v4981_v56 = vsel %vm4734_vm0, %v4338_v60, 0.0  ;;  %v4339_v43 = vmax.f32 %v2643_v48, 0.0  ;;  %6978 = vmatprep.mubr.bf16.mxu0 %v7543_v39  ;;  %7238 = vmatprep.mubr.bf16.mxu1 %v7575_v5  ;;  %v5524_v2 = vadd.f32 %v5523_v30, %v5522_v9  ;;  %v3672_v22 = vadd.f32 %v8917_v35, %v8033_v61  ;;  %v7576_v35 = vld [vmem:[%s10343_s0 + $0x7a8] sm:$0xff]   ;;  %v7547_v60 = vld [vmem:[%s10343_s0 + $0x3a0] sm:$0xff]  }
 0x1e4   :  { %v4982_v34 = vadd.f32 %v4981_v56, %v4980_v7  ;;  %v4985_v41 = vsel %vm4734_vm0, %v4340_v63, 0.0  ;;  %v5527_v5 = vsel %vm4734_vm0, %v4591_v13, 0.0  ;;  %v4987_v57 = vsel %vm4734_vm0, %v4341_v29, 0.0  ;;  %v7577_v63 = vld [vmem:[%s10343_s0 + $0x7b0] sm:$0xff]  }
 0x1e5   :  { %v4983_v27 = vsel %vm4734_vm0, %v4339_v43, 0.0  ;;  %v6872_v1 = vpop.f32.mrb[120].mxu0  ;;  %v8997_v23 = vpop.f32.mrb[120].mxu1  ;;  %v5526_v48 = vadd.f32 %v5525_v14, %v5524_v2  ;;  %v3667_v8 = vadd.f32 %v8945_v50, %v8033_v61  ;;  %v4594_v56 = vmax.f32 %v3664_v24, 0.0 }
 0x1e6   :  { %v4984_v39 = vadd.f32 %v4983_v27, %v4982_v34  ;;  %v2664_v0 = vadd.f32 %v6872_v1, %v8033_v61  ;;  %v2655_v58 = vpop.f32.mrb[121].mxu0  ;;  %v9005_v28 = vpop.f32.mrb[121].mxu1  ;;  %v3675_v43 = vadd.f32 %v8937_v3, %v8033_v61  ;;  %v4596_v14 = vmax.f32 %v3672_v22, 0.0 }
 0x1e7   :  { %v2656_v18 = vadd.f32 %v2655_v58, %v8033_v61  ;;  %v6873_v31 = vpop.f32.mrb[122].mxu0  ;;  %v9017_v15 = vpop.f32.mrb[122].mxu1  ;;  %v5528_v50 = vadd.f32 %v5527_v5, %v5526_v48  ;;  %v4798_v27 = vrot.slane %v8275_v42, 4  ;;  %v4595_v58 = vmax.f32 %v3667_v8, 0.0 }
 0x1e8   :  { %v4986_v7 = vadd.f32 %v4985_v41, %v4984_v39  ;;  %v2667_v29 = vadd.f32 %v6873_v31, %v8033_v61  ;;  %v2658_v30 = vpop.f32.mrb[123].mxu0  ;;  %v9025_v9 = vpop.f32.mrb[123].mxu1  ;;  %v4344_v1 = vmax.f32 %v2664_v0, 0.0  ;;  %v5531_v41 = vsel %vm4734_vm0, %v4593_v44, 0.0 }
 0x1e9   :  { %v4342_v13 = vmax.f32 %v2656_v18, 0.0  ;;  %v2659_v34 = vadd.f32 %v2658_v30, %v8033_v61  ;;  %v5530_v3 = vadd.f32 %v5529_v47, %v5528_v50  ;;  %v5533_v5 = vsel %vm4734_vm0, %v4594_v56, 0.0  ;;  %v7578_v30 = vld [vmem:[%s10343_s0 + $0x7b8] sm:$0xff]  }
 0x1ea   :  { %v4988_v2 = vadd.f32 %v4987_v57, %v4986_v7  ;;  %6979 = vmatmul.mubr.bf16.gmra.mrb[228].mxu0 %v7544_v16  ;;  %7239 = vmatmul.mubr.bf16.gmra.mrb[228].mxu1 %v7576_v35  ;;  %v4345_v31 = vmax.f32 %v2667_v29, 0.0  ;;  %v3680_v22 = vadd.f32 %v8965_v51, %v8033_v61  ;;  %v5537_v44 = vsel %vm4734_vm0, %v4596_v14, 0.0 }
 0x1eb   :  { %v4989_v24 = vsel %vm4734_vm0, %v4342_v13, 0.0  ;;  %v4343_v39 = vmax.f32 %v2659_v34, 0.0  ;;  %6982 = vmatprep.mubr.bf16.mxu0 %v7547_v60  ;;  %7242 = vmatprep.mubr.bf16.mxu1 %v7577_v63  ;;  %v5532_v35 = vadd.f32 %v5531_v41, %v5530_v3  ;;  %v4597_v57 = vmax.f32 %v3675_v43, 0.0  ;;  %v7548_v63 = vld [vmem:[%s10343_s0 + $0x3a8] sm:$0xff]   ;;  %v7551_v34 = vld [vmem:[%s10343_s0 + $0x3b0] sm:$0xff]  }
 0x1ec   :  { %v4990_v18 = vadd.f32 %v4989_v24, %v4988_v2  ;;  %v5535_v7 = vsel %vm4734_vm0, %v4595_v58, 0.0  ;;  %v3688_v51 = vadd.f32 %v8957_v20, %v8033_v61  ;;  %v4993_v56 = vsel %vm4734_vm0, %v4344_v1, 0.0  ;;  %v7579_v2 = vld [vmem:[%s10343_s0 + $0x7c0] sm:$0xff]  }
 0x1ed   :  { %v4991_v0 = vsel %vm4734_vm0, %v4343_v39, 0.0  ;;  %v6876_v16 = vpop.f32.mrb[124].mxu0  ;;  %v9036_v48 = vpop.f32.mrb[124].mxu1  ;;  %v5534_v50 = vadd.f32 %v5533_v5, %v5532_v35  ;;  %v3683_v14 = vadd.f32 %v8985_v40, %v8033_v61  ;;  %v4995_v41 = vsel %vm4734_vm0, %v4345_v31, 0.0 }
 0x1ee   :  { %v4992_v60 = vadd.f32 %v4991_v0, %v4990_v18  ;;  %v2680_v47 = vadd.f32 %v6876_v16, %v8033_v61  ;;  %v2671_v8 = vpop.f32.mrb[125].mxu0  ;;  %v9045_v29 = vpop.f32.mrb[125].mxu1  ;;  %v4598_v3 = vmax.f32 %v3680_v22, 0.0  ;;  %v3691_v40 = vadd.f32 %v8977_v17, %v8033_v61 }
 0x1ef   :  { %v2672_v43 = vadd.f32 %v2671_v8, %v8033_v61  ;;  %v6877_v13 = vpop.f32.mrb[126].mxu0  ;;  %v9057_v20 = vpop.f32.mrb[126].mxu1  ;;  %v5536_v0 = vadd.f32 %v5535_v7, %v5534_v50  ;;  %v5539_v8 = vsel %vm4734_vm0, %v4597_v57, 0.0  ;;  %v4600_v31 = vmax.f32 %v3688_v51, 0.0 }
 0x1f0   :  { %v4994_v1 = vadd.f32 %v4993_v56, %v4992_v60  ;;  %v2683_v24 = vadd.f32 %v6877_v13, %v8033_v61  ;;  %v2674_v39 = vpop.f32.mrb[127].mxu0  ;;  %v9064_v58 = vpop.f32.mrb[127].mxu1  ;;  %v4348_v16 = vmax.f32 %v2680_v47, 0.0  ;;  %v4599_v13 = vmax.f32 %v3683_v14, 0.0 }
 0x1f1   :  { %v4346_v18 = vmax.f32 %v2672_v43, 0.0  ;;  %v2675_v5 = vadd.f32 %v2674_v39, %v8033_v61  ;;  %v5538_v22 = vadd.f32 %v5537_v44, %v5536_v0  ;;  %v5541_v7 = vsel %vm4734_vm0, %v4598_v3, 0.0  ;;  %v7552_v44 = vld [vmem:[%s10343_s0 + $0x3b8] sm:$0xff]  }
 0x1f2   :  { %v4996_v35 = vadd.f32 %v4995_v41, %v4994_v1  ;;  %6983 = vmatmul.mubr.bf16.gmra.mrb[232].mxu0 %v7548_v63  ;;  %7243 = vmatmul.mubr.bf16.gmra.mrb[232].mxu1 %v7578_v30  ;;  %v4349_v39 = vmax.f32 %v2683_v24, 0.0  ;;  %v3696_v17 = vadd.f32 %v9005_v28, %v8033_v61  ;;  %v9077_v57 = vadd.f32 %v4798_v27, %v8275_v42  ;;  %v7580_v41 = vld [vmem:[%s10343_s0 + $0x7c8] sm:$0xff]  }
 0x1f3   :  { %v4997_v60 = vsel %vm4734_vm0, %v4346_v18, 0.0  ;;  %v4347_v56 = vmax.f32 %v2675_v5, 0.0  ;;  %6986 = vmatprep.mubr.bf16.mxu0 %v7551_v34  ;;  %7246 = vmatprep.mubr.bf16.mxu1 %v7579_v2  ;;  %v5540_v51 = vadd.f32 %v5539_v8, %v5538_v22  ;;  %v4601_v30 = vmax.f32 %v3691_v40, 0.0  ;;  %v7555_v18 = vld [vmem:[%s10343_s0 + $0x3c0] sm:$0xff]  }
 0x1f4   :  { %v4998_v43 = vadd.f32 %v4997_v60, %v4996_v35  ;;  %v5001_v50 = vsel %vm4734_vm0, %v4348_v16, 0.0  ;;  %v5545_v2 = vsel %vm4734_vm0, %v4600_v31, 0.0  ;;  %v5543_v42 = vsel %vm4734_vm0, %v4599_v13, 0.0  ;;  %v7581_v16 = vld [vmem:[%s10343_s0 + $0x7d0] sm:$0xff]  }
 0x1f5   :  { %v4999_v47 = vsel %vm4734_vm0, %v4347_v56, 0.0  ;;  %v6880_v63 = vpop.f32.mrb[128].mxu0  ;;  %v9083_v34 = vpop.f32.mrb[128].mxu1  ;;  %v5542_v5 = vadd.f32 %v5541_v7, %v5540_v51  ;;  %v3699_v0 = vadd.f32 %v9025_v9, %v8033_v61  ;;  %v5003_v35 = vsel %vm4734_vm0, %v4349_v39, 0.0 }
 0x1f6   :  { %v5000_v14 = vadd.f32 %v4999_v47, %v4998_v43  ;;  %v2687_v28 = vpop.f32.mrb[129].mxu0  ;;  %v9088_v27 = vpop.f32.mrb[129].mxu1  ;;  %v2696_v1 = vadd.f32 %v6880_v63, %v8033_v61  ;;  %v3704_v60 = vadd.f32 %v8997_v23, %v8033_v61  ;;  %v4602_v56 = vmax.f32 %v3696_v17, 0.0 }
 0x1f7   :  { %v2688_v24 = vadd.f32 %v2687_v28, %v8033_v61  ;;  %v6881_v3 = vpop.f32.mrb[130].mxu0  ;;  %v9100_v40 = vpop.f32.mrb[130].mxu1  ;;  %v5544_v7 = vadd.f32 %v5543_v42, %v5542_v5  ;;  %v5547_v39 = vsel %vm4734_vm0, %v4601_v30, 0.0  ;;  %v3707_v51 = vadd.f32 %v9017_v15, %v8033_v61 }
 0x1f8   :  { %v5002_v8 = vadd.f32 %v5001_v50, %v5000_v14  ;;  %v2690_v31 = vpop.f32.mrb[131].mxu0  ;;  %v9108_v22 = vpop.f32.mrb[131].mxu1  ;;  %v2699_v43 = vadd.f32 %v6881_v3, %v8033_v61  ;;  %v4352_v23 = vmax.f32 %v2696_v1, 0.0  ;;  %v4603_v14 = vmax.f32 %v3699_v0, 0.0 }
 0x1f9   :  { %v4350_v13 = vmax.f32 %v2688_v24, 0.0  ;;  %v2691_v9 = vadd.f32 %v2690_v31, %v8033_v61  ;;  %v5546_v50 = vadd.f32 %v5545_v2, %v5544_v7  ;;  %v4800_v28 = vrot.slane %v9077_v57, 2  ;;  %v7582_v31 = vld [vmem:[%s10343_s0 + $0x7d8] sm:$0xff]  }
 0x1fa   :  { %v9113_v63 = vadd.f32 %v5003_v35, %v5002_v8  ;;  %6987 = vmatmul.mubr.bf16.gmra.mrb[236].mxu0 %v7552_v44  ;;  %7247 = vmatmul.mubr.bf16.gmra.mrb[236].mxu1 %v7580_v41  ;;  %v9121_v42 = vadd.f32 %v8055_v11, %v8033_v61  ;;  %v4604_v24 = vmax.f32 %v3704_v60, 0.0  ;;  %v5549_v44 = vsel %vm4734_vm0, %v4602_v56, 0.0  ;;  %v7556_v11 = vld [vmem:[%s10343_s0 + $0x3c8] sm:$0xff]  }
 0x1fb   :  { %v4351_v17 = vmax.f32 %v2691_v9, 0.0  ;;  %6990 = vmatprep.mubr.bf16.mxu0 %v7555_v18  ;;  %7250 = vmatprep.mubr.bf16.mxu1 %v7581_v16  ;;  %v5011_v30 = vsel %vm4734_vm0, %v4350_v13, 0.0  ;;  %v4353_v3 = vmax.f32 %v2699_v43, 0.0  ;;  %v5548_v1 = vadd.f32 %v5547_v39, %v5546_v50  ;;  %v7559_v43 = vld [vmem:[%s10343_s0 + $0x3d0] sm:$0xff]  }
 0x1fc   :  { %v4605_v16 = vmax.f32 %v3707_v51, 0.0  ;;  %v5551_v35 = vsel %vm4734_vm0, %v4603_v14, 0.0  ;;  %v5014_v60 = vsel %vm4734_vm0, %v4352_v23, 0.0  ;;  %v3712_v7 = vadd.f32 %v9045_v29, %v8033_v61  ;;  %v7583_v51 = vld [vmem:[%s10343_s0 + $0x7e0] sm:$0xff]  }
 0x1fd   :  { %v5012_v15 = vsel %vm4734_vm0, %v4351_v17, 0.0  ;;  %v6884_v41 = vpop.f32.mrb[132].mxu0  ;;  %v9126_v18 = vpop.f32.mrb[132].mxu1  ;;  %v5550_v9 = vadd.f32 %v5549_v44, %v5548_v1  ;;  %v5553_v14 = vsel %vm4734_vm0, %v4604_v24, 0.0  ;;  %v5016_v44 = vsel %vm4734_vm0, %v4353_v3, 0.0 }
 0x1fe   :  { %v5013_v2 = vadd.f32 %v5012_v15, %v5011_v30  ;;  %v2712_v5 = vadd.f32 %v6884_v41, %v8033_v61  ;;  %v2703_v0 = vpop.f32.mrb[133].mxu0  ;;  %v9133_v8 = vpop.f32.mrb[133].mxu1  ;;  %v3720_v30 = vadd.f32 %v9036_v48, %v8033_v61  ;;  %v4606_v37 = vmax.f32 %v3712_v7, 0.0 }
 0x1ff   :  { %v2704_v56 = vadd.f32 %v2703_v0, %v8033_v61  ;;  %v6885_v13 = vpop.f32.mrb[134].mxu0  ;;  %v9145_v39 = vpop.f32.mrb[134].mxu1  ;;  %v5552_v1 = vadd.f32 %v5551_v35, %v5550_v9  ;;  %v9163_v3 = vadd.f32 %v4800_v28, %v9077_v57 }
 0x200   :  { %v5015_v17 = vadd.f32 %v5014_v60, %v5013_v2  ;;  %v2715_v23 = vadd.f32 %v6885_v13, %v8033_v61  ;;  %v2706_v50 = vpop.f32.mrb[135].mxu0  ;;  %v9154_v15 = vpop.f32.mrb[135].mxu1  ;;  %v4356_v0 = vmax.f32 %v2712_v5, 0.0  ;;  %v5555_v2 = vsel %vm4734_vm0, %v4605_v16, 0.0 }
 0x201   :  { %v4354_v29 = vmax.f32 %v2704_v56, 0.0  ;;  %v2707_v41 = vadd.f32 %v2706_v50, %v8033_v61  ;;  %v3723_v60 = vadd.f32 %v9057_v20, %v8033_v61  ;;  %v5554_v13 = vadd.f32 %v5553_v14, %v5552_v1 }
 0x202   :  { %v5017_v47 = vadd.f32 %v5016_v44, %v5015_v17  ;;  %6991 = vmatmul.mubr.bf16.gmra.mrb[240].mxu0 %v7556_v11  ;;  %7251 = vmatmul.mubr.bf16.gmra.mrb[240].mxu1 %v7582_v31  ;;  %v4357_v5 = vmax.f32 %v2715_v23, 0.0  ;;  %v4608_v56 = vmax.f32 %v3720_v30, 0.0  ;;  %v4867_v11 = vrot.slane %v8502_v45, 4  ;;  %v7563_v44 = vld [vmem:[%s10343_s0 + $0x3e0] sm:$0xff]  }
 0x203   :  { %v5018_v24 = vsel %vm4734_vm0, %v4354_v29, 0.0  ;;  %v4355_v48 = vmax.f32 %v2707_v41, 0.0  ;;  %6994 = vmatprep.mubr.bf16.mxu0 %v7559_v43  ;;  %7254 = vmatprep.mubr.bf16.mxu1 %v7583_v51  ;;  %v9167_v20 = vadd.f32 %v5555_v2, %v5554_v13  ;;  %v3715_v31 = vadd.f32 %v9064_v58, %v8033_v61  ;;  %v7584_v58 = vld [vmem:[%s10343_s0 + $0x7e8] sm:$0xff]  }
 0x204   :  { %v5019_v35 = vadd.f32 %v5018_v24, %v5017_v47  ;;  %v5022_v7 = vsel %vm4734_vm0, %v4356_v0, 0.0  ;;  %v7560_v47 = vld [vmem:[%s10343_s0 + $0x3d8] sm:$0xff]   ;;  %v4609_v28 = vmax.f32 %v3723_v60, 0.0  ;;  %v3728_v17 = vadd.f32 %v9088_v27, %v8033_v61  ;;  %v7585_v27 = vld [vmem:[%s10343_s0 + $0x7f0] sm:$0xff]  }
 0x205   :  { %v5020_v16 = vsel %vm4734_vm0, %v4355_v48, 0.0  ;;  %v6888_v9 = vpop.f32.mrb[136].mxu0  ;;  %10374 = vst [vmem:[#allocation25_spill] sm:$0xff] %v9167_v20  ;;  %v9171_v43 = vpop.f32.mrb[136].mxu1  ;;  %v5563_v29 = vsel %vm4734_vm0, %v4606_v37, 0.0  ;;  %v4607_v41 = vmax.f32 %v3715_v31, 0.0 }
 0x206   :  { %v5021_v51 = vadd.f32 %v5020_v16, %v5019_v35  ;;  %v2719_v57 = vpop.f32.mrb[137].mxu0  ;;  %v9179_v23 = vpop.f32.mrb[137].mxu1  ;;  %v2728_v50 = vadd.f32 %v6888_v9, %v8033_v61  ;;  %v5024_v0 = vsel %vm4734_vm0, %v4357_v5, 0.0  ;;  %v5566_v48 = vsel %vm4734_vm0, %v4608_v56, 0.0 }
 0x207   :  { %v2720_v14 = vadd.f32 %v2719_v57, %v8033_v61  ;;  %v6889_v30 = vpop.f32.mrb[138].mxu0  ;;  %v9190_v1 = vpop.f32.mrb[138].mxu1  ;;  %v5564_v16 = vsel %vm4734_vm0, %v4607_v41, 0.0  ;;  %v4610_v9 = vmax.f32 %v3728_v17, 0.0  ;;  %v10375_v31 = vmax.f32 %v8827_v54, 0.0 }
 0x208   :  { %v5023_v2 = vadd.f32 %v5022_v7, %v5021_v51  ;;  %v2731_v60 = vadd.f32 %v6889_v30, %v8033_v61  ;;  %v2722_v24 = vpop.f32.mrb[139].mxu0  ;;  %v9198_v13 = vpop.f32.mrb[139].mxu1  ;;  %v5565_v7 = vadd.f32 %v5564_v16, %v5563_v29  ;;  %v3736_v51 = vadd.f32 %v9083_v34, %v8033_v61  ;;  %v7567_v16 = vld [vmem:[%s10343_s0 + $0x3f0] sm:$0xff]  }
 0x209   :  { %v4358_v35 = vmax.f32 %v2720_v14, 0.0  ;;  %v2723_v37 = vadd.f32 %v2722_v24, %v8033_v61  ;;  %v9205_v57 = vsel %vm4734_vm0, %v10375_v31, 0.0  ;;  %v4360_v56 = vmax.f32 %v2728_v50, 0.0 }
 0x20a   :  { %v5025_v5 = vadd.f32 %v5024_v0, %v5023_v2  ;;  %6995 = vmatmul.mubr.bf16.gmra.mrb[244].mxu0 %v7560_v47  ;;  %7255 = vmatmul.mubr.bf16.gmra.mrb[244].mxu1 %v7584_v58  ;;  %v5568_v41 = vsel %vm4734_vm0, %v4609_v28, 0.0  ;;  %v9212_v54 = vadd.f32 %v4867_v11, %v8502_v45  ;;  %v4361_v24 = vmax.f32 %v2731_v60, 0.0 }
 0x20b   :  { %v5026_v14 = vsel %vm4734_vm0, %v4358_v35, 0.0  ;;  %v4359_v30 = vmax.f32 %v2723_v37, 0.0  ;;  %6998 = vmatprep.mubr.bf16.mxu0 %v7563_v44  ;;  %7258 = vmatprep.mubr.bf16.mxu1 %v7585_v27  ;;  %v5567_v0 = vadd.f32 %v5566_v48, %v5565_v7  ;;  %v5570_v34 = vsel %vm4734_vm0, %v4610_v9, 0.0  ;;  %v7564_v27 = vld [vmem:[%s10343_s0 + $0x3e8] sm:$0xff]  }
 0x20c   :  { %v5027_v17 = vadd.f32 %v5026_v14, %v5025_v5  ;;  %v3739_v58 = vadd.f32 %v9100_v40, %v8033_v61  ;;  %v3731_v50 = vadd.f32 %v9108_v22, %v8033_v61  ;;  %v4612_v2 = vmax.f32 %v3736_v51, 0.0  ;;  %v7586_v40 = vld [vmem:[%s10343_s0 + $0x7f8] sm:$0xff]  }
 0x20d   :  { %v5028_v47 = vsel %vm4734_vm0, %v4359_v30, 0.0  ;;  %v6892_v29 = vpop.f32.mrb[140].mxu0  ;;  %v9220_v44 = vpop.f32.mrb[140].mxu1  ;;  %v5569_v60 = vadd.f32 %v5568_v41, %v5567_v0  ;;  %v5030_v22 = vsel %vm4734_vm0, %v4360_v56, 0.0  ;;  %v5032_v56 = vsel %vm4734_vm0, %v4361_v24, 0.0 }
 0x20e   :  { %v5029_v28 = vadd.f32 %v5028_v47, %v5027_v17  ;;  %v2744_v45 = vadd.f32 %v6892_v29, %v8033_v61  ;;  %v2735_v11 = vpop.f32.mrb[141].mxu0  ;;  %v9226_v48 = vpop.f32.mrb[141].mxu1  ;;  %v4613_v9 = vmax.f32 %v3739_v58, 0.0  ;;  %v4611_v31 = vmax.f32 %v3731_v50, 0.0 }
 0x20f   :  { %v2736_v35 = vadd.f32 %v2735_v11, %v8033_v61  ;;  %v6893_v37 = vpop.f32.mrb[142].mxu0  ;;  %v9236_v5 = vpop.f32.mrb[142].mxu1  ;;  %v5571_v41 = vadd.f32 %v5570_v34, %v5569_v60  ;;  %v3752_v29 = vadd.f32 %v9126_v18, %v8033_v61  ;;  %v5574_v50 = vsel %vm4734_vm0, %v4612_v2, 0.0 }
 0x210   :  { %v5031_v7 = vadd.f32 %v5030_v22, %v5029_v28  ;;  %v4364_v51 = vmax.f32 %v2744_v45, 0.0  ;;  %v2747_v14 = vadd.f32 %v6893_v37, %v8033_v61  ;;  %v2738_v30 = vpop.f32.mrb[143].mxu0  ;;  %v9239_v17 = vpop.f32.mrb[143].mxu1  ;;  %v5576_v28 = vsel %vm4734_vm0, %v4613_v9, 0.0 }
 0x211   :  { %v4362_v0 = vmax.f32 %v2736_v35, 0.0  ;;  %v2739_v47 = vadd.f32 %v2738_v30, %v8033_v61  ;;  %v5572_v45 = vsel %vm4734_vm0, %v4611_v31, 0.0  ;;  %v3744_v18 = vadd.f32 %v9133_v8, %v8033_v61  ;;  %v7568_v8 = vld [vmem:[%s10343_s0 + $0x3f8] sm:$0xff]  }
 0x212   :  { %v5033_v58 = vadd.f32 %v5032_v56, %v5031_v7  ;;  %6999 = vmatmul.mubr.bf16.gmra.mrb[248].mxu0 %v7564_v27  ;;  %7259 = vmatmul.mubr.bf16.gmra.mrb[248].mxu1 %v7586_v40  ;;  %v4365_v11 = vmax.f32 %v2747_v14, 0.0  ;;  %v5573_v24 = vadd.f32 %v5572_v45, %v5571_v41  ;;  %v5038_v22 = vsel %vm4734_vm0, %v4364_v51, 0.0 }
 0x213   :  { %v5034_v34 = vsel %vm4734_vm0, %v4362_v0, 0.0  ;;  %v4363_v60 = vmax.f32 %v2739_v47, 0.0  ;;  %7002 = vmatprep.mubr.bf16.mxu0 %v7567_v16  ;;  %v3755_v27 = vadd.f32 %v9145_v39, %v8033_v61  ;;  %v4616_v40 = vmax.f32 %v3752_v29, 0.0 }
 0x214   :  { %v5035_v35 = vadd.f32 %v5034_v34, %v5033_v58  ;;  %v5575_v9 = vadd.f32 %v5574_v50, %v5573_v24  ;;  %v3747_v31 = vadd.f32 %v9154_v15, %v8033_v61  ;;  %v4614_v30 = vmax.f32 %v3744_v18, 0.0  ;;  %v7571_v15 = vld [vmem:[%s10343_s0 + $0x400] sm:$0xff]  }
 0x215   :  { %v5036_v2 = vsel %vm4734_vm0, %v4363_v60, 0.0  ;;  %v6896_v37 = vpop.f32.mrb[144].mxu0  ;;  %v9257_v7 = vpop.f32.mrb[144].mxu1  ;;  %v4617_v39 = vmax.f32 %v3755_v27, 0.0  ;;  %v5040_v56 = vsel %vm4734_vm0, %v4365_v11, 0.0 }
 0x216   :  { %v5037_v16 = vadd.f32 %v5036_v2, %v5035_v35  ;;  %v2760_v51 = vadd.f32 %v6896_v37, %v8033_v61  ;;  %v2751_v14 = vpop.f32.mrb[145].mxu0  ;;  %v9263_v41 = vpop.f32.mrb[145].mxu1  ;;  %v5577_v29 = vadd.f32 %v5576_v28, %v5575_v9  ;;  %v4615_v58 = vmax.f32 %v3747_v31, 0.0 }
 0x217   :  { %v2752_v0 = vadd.f32 %v2751_v14, %v8033_v61  ;;  %v6897_v47 = vpop.f32.mrb[146].mxu0  ;;  %v9270_v50 = vpop.f32.mrb[146].mxu1  ;;  %v5578_v35 = vsel %vm4734_vm0, %v4614_v30, 0.0  ;;  %v3768_v37 = vadd.f32 %v9171_v43, %v8033_v61  ;;  %v5582_v9 = vsel %vm4734_vm0, %v4616_v40, 0.0 }
 0x218   :  { %v5039_v45 = vadd.f32 %v5038_v22, %v5037_v16  ;;  %v4368_v34 = vmax.f32 %v2760_v51, 0.0  ;;  %v2763_v60 = vadd.f32 %v6897_v47, %v8033_v61  ;;  %v2754_v24 = vpop.f32.mrb[147].mxu0  ;;  %v9274_v18 = vpop.f32.mrb[147].mxu1  ;;  %v5579_v2 = vadd.f32 %v5578_v35, %v5577_v29 }
 0x219   :  { %v4366_v11 = vmax.f32 %v2752_v0, 0.0  ;;  %v2755_v27 = vadd.f32 %v2754_v24, %v8033_v61  ;;  %v5584_v22 = vsel %vm4734_vm0, %v4617_v39, 0.0  ;;  %v5580_v31 = vsel %vm4734_vm0, %v4615_v58, 0.0 }
 0x21a   :  { %v5041_v28 = vadd.f32 %v5040_v56, %v5039_v45  ;;  %7003 = vmatmul.mubr.bf16.gmra.mrb[252].mxu0 %v7568_v8  ;;  %v4369_v51 = vmax.f32 %v2763_v60, 0.0  ;;  %v5581_v30 = vadd.f32 %v5580_v31, %v5579_v2  ;;  %v5046_v0 = vsel %vm4734_vm0, %v4368_v34, 0.0 }
 0x21b   :  { %v5042_v16 = vsel %vm4734_vm0, %v4366_v11, 0.0  ;;  %v4367_v14 = vmax.f32 %v2755_v27, 0.0  ;;  %7006 = vmatprep.mubr.bf16.mxu0 %v7571_v15  ;;  %v3760_v43 = vadd.f32 %v9179_v23, %v8033_v61  ;;  %v3771_v8 = vadd.f32 %v9190_v1, %v8033_v61  ;;  %v7572_v23 = vld [vmem:[%s10343_s0 + $0x408] sm:$0xff]  }
 0x21c   :  { %v5043_v47 = vadd.f32 %v5042_v16, %v5041_v28  ;;  %v5583_v56 = vadd.f32 %v5582_v9, %v5581_v30  ;;  %v4620_v29 = vmax.f32 %v3768_v37, 0.0  ;;  %v3763_v58 = vadd.f32 %v9198_v13, %v8033_v61 }
 0x21d   :  { %v5044_v40 = vsel %vm4734_vm0, %v4367_v14, 0.0  ;;  %v6900_v39 = vpop.f32.mrb[148].mxu0  ;;  %v9291_v45 = vpop.f32.mrb[148].mxu1  ;;  %v4618_v24 = vmax.f32 %v3760_v43, 0.0  ;;  %v4621_v1 = vmax.f32 %v3771_v8, 0.0  ;;  %v5048_v11 = vsel %vm4734_vm0, %v4369_v51, 0.0 }
 0x21e   :  { %v5045_v15 = vadd.f32 %v5044_v40, %v5043_v47  ;;  %v2776_v34 = vadd.f32 %v6900_v39, %v8033_v61  ;;  %v2767_v60 = vpop.f32.mrb[149].mxu0  ;;  %v9297_v35 = vpop.f32.mrb[149].mxu1  ;;  %v5585_v13 = vadd.f32 %v5584_v22, %v5583_v56  ;;  %v4619_v37 = vmax.f32 %v3763_v58, 0.0 }
 0x21f   :  { %v2768_v27 = vadd.f32 %v2767_v60, %v8033_v61  ;;  %v6901_v2 = vpop.f32.mrb[150].mxu0  ;;  %v9301_v28 = vpop.f32.mrb[150].mxu1  ;;  %v5586_v30 = vsel %vm4734_vm0, %v4618_v24, 0.0  ;;  %v3784_v40 = vadd.f32 %v9220_v44, %v8033_v61  ;;  %v5590_v39 = vsel %vm4734_vm0, %v4620_v29, 0.0  ;;  %v18_v29 = vld [vmem:[%s10345_s2 + $0x10] sm:$0xff] }
 0x220   :  { %v5047_v9 = vadd.f32 %v5046_v0, %v5045_v15  ;;  %v4372_v31 = vmax.f32 %v2776_v34, 0.0  ;;  %v2779_v16 = vadd.f32 %v6901_v2, %v8033_v61  ;;  %v2770_v14 = vpop.f32.mrb[151].mxu0  ;;  %v9305_v47 = vpop.f32.mrb[151].mxu1  ;;  %v5587_v51 = vadd.f32 %v5586_v30, %v5585_v13 }
 0x221   :  { %v4370_v43 = vmax.f32 %v2768_v27, 0.0  ;;  %v2771_v8 = vadd.f32 %v2770_v14, %v8033_v61  ;;  %v5592_v0 = vsel %vm4734_vm0, %v4621_v1, 0.0  ;;  %v5588_v56 = vsel %vm4734_vm0, %v4619_v37, 0.0 }
 0x222   :  { %v5049_v22 = vadd.f32 %v5048_v11, %v5047_v9  ;;  %7007 = vmatmul.mubr.bf16.gmra.mrb[0].mxu0 %v7572_v23  ;;  %v5054_v58 = vsel %vm4734_vm0, %v4372_v31, 0.0  ;;  %v5589_v60 = vadd.f32 %v5588_v56, %v5587_v51  ;;  %v4373_v27 = vmax.f32 %v2779_v16, 0.0  ;;  %v19_v23 = vld [vmem:[%s10345_s2 + $0x18] sm:$0xff] }
 0x223   :  { %v5050_v15 = vsel %vm4734_vm0, %v4370_v43, 0.0  ;;  %v4371_v34 = vmax.f32 %v2771_v8, 0.0  ;;  %v3776_v2 = vadd.f32 %v9226_v48, %v8033_v61  ;;  %v3787_v44 = vadd.f32 %v9236_v5, %v8033_v61 }
 0x224   :  { %v5051_v24 = vadd.f32 %v5050_v15, %v5049_v22  ;;  %v5591_v13 = vadd.f32 %v5590_v39, %v5589_v60  ;;  %v4624_v37 = vmax.f32 %v3784_v40, 0.0  ;;  %v3779_v9 = vadd.f32 %v9239_v17, %v8033_v61 }
 0x225   :  { %v5052_v1 = vsel %vm4734_vm0, %v4371_v34, 0.0  ;;  %v6904_v11 = vpop.f32.mrb[152].mxu0  ;;  %v9328_v48 = vpop.f32.mrb[152].mxu1  ;;  %v4622_v14 = vmax.f32 %v3776_v2, 0.0  ;;  %v4625_v30 = vmax.f32 %v3787_v44, 0.0  ;;  %v7288_v39 = vpack.c.bf16 %v19_v23, %v18_v29 }
 0x226   :  { %v5053_v31 = vadd.f32 %v5052_v1, %v5051_v24  ;;  %v2792_v5 = vadd.f32 %v6904_v11, %v8033_v61  ;;  %v2783_v16 = vpop.f32.mrb[153].mxu0  ;;  %v9331_v43 = vpop.f32.mrb[153].mxu1  ;;  %v5593_v22 = vadd.f32 %v5592_v0, %v5591_v13  ;;  %v4623_v56 = vmax.f32 %v3779_v9, 0.0 }
 0x227   :  { %v2784_v8 = vadd.f32 %v2783_v16, %v8033_v61  ;;  %v6905_v51 = vpop.f32.mrb[154].mxu0  ;;  %v9334_v40 = vpop.f32.mrb[154].mxu1  ;;  %v5056_v17 = vsel %vm4734_vm0, %v4373_v27, 0.0  ;;  %v5594_v24 = vsel %vm4734_vm0, %v4622_v14, 0.0  ;;  %v5598_v11 = vsel %vm4734_vm0, %v4624_v37, 0.0  ;;  %7289 = vmatprep.subr.bf16.mxu1 %v7288_v39 }
 0x228   :  { %v5055_v15 = vadd.f32 %v5054_v58, %v5053_v31  ;;  %v2795_v34 = vadd.f32 %v6905_v51, %v8033_v61  ;;  %v2786_v60 = vpop.f32.mrb[155].mxu0  ;;  %v9339_v2 = vpop.f32.mrb[155].mxu1  ;;  %v5595_v0 = vadd.f32 %v5594_v24, %v5593_v22  ;;  %v4376_v29 = vmax.f32 %v2792_v5, 0.0  ;;  %7291 = vmatpush3.bf16.msra.mxu1 %v7288_v39 }
 0x229   :  { %v4374_v44 = vmax.f32 %v2784_v8, 0.0  ;;  %v2787_v1 = vadd.f32 %v2786_v60, %v8033_v61  ;;  %v5600_v13 = vsel %vm4734_vm0, %v4625_v30, 0.0  ;;  %v5596_v58 = vsel %vm4734_vm0, %v4623_v56, 0.0 }
 0x22a   :  { %v5057_v23 = vadd.f32 %v5056_v17, %v5055_v15  ;;  %v5597_v31 = vadd.f32 %v5596_v58, %v5595_v0  ;;  %v3800_v16 = vadd.f32 %v9257_v7, %v8033_v61  ;;  %v4377_v8 = vmax.f32 %v2795_v34, 0.0 }
 0x22b   :  { %v5058_v27 = vsel %vm4734_vm0, %v4374_v44, 0.0  ;;  %v4375_v9 = vmax.f32 %v2787_v1, 0.0  ;;  %v3792_v37 = vadd.f32 %v9263_v41, %v8033_v61  ;;  %v3803_v5 = vadd.f32 %v9270_v50, %v8033_v61 }
 0x22c   :  { %v5059_v14 = vadd.f32 %v5058_v27, %v5057_v23  ;;  %v4869_v30 = vrot.slane %v9212_v54, 2  ;;  %v5599_v56 = vadd.f32 %v5598_v11, %v5597_v31  ;;  %v3795_v39 = vadd.f32 %v9274_v18, %v8033_v61 }
 0x22d   :  { %v5060_v51 = vsel %vm4734_vm0, %v4375_v9, 0.0  ;;  %v6908_v22 = vpop.f32.mrb[156].mxu0  ;;  %v9356_v17 = vpop.f32.mrb[156].mxu1  ;;  %v4628_v60 = vmax.f32 %v3800_v16, 0.0  ;;  %v4626_v41 = vmax.f32 %v3792_v37, 0.0  ;;  %v5062_v50 = vsel %vm4734_vm0, %v4376_v29, 0.0 }
 0x22e   :  { %v5061_v7 = vadd.f32 %v5060_v51, %v5059_v14  ;;  %v2808_v15 = vadd.f32 %v6908_v22, %v8033_v61  ;;  %v2799_v34 = vpop.f32.mrb[157].mxu0  ;;  %v9359_v24 = vpop.f32.mrb[157].mxu1  ;;  %v5601_v0 = vadd.f32 %v5600_v13, %v5599_v56  ;;  %v4627_v11 = vmax.f32 %v3795_v39, 0.0 }
 0x22f   :  { %v2800_v44 = vadd.f32 %v2799_v34, %v8033_v61  ;;  %v6909_v1 = vpop.f32.mrb[158].mxu0  ;;  %v9363_v23 = vpop.f32.mrb[158].mxu1  ;;  %v5064_v18 = vsel %vm4734_vm0, %v4377_v8, 0.0  ;;  %v5602_v9 = vsel %vm4734_vm0, %v4626_v41, 0.0  ;;  %v4629_v31 = vmax.f32 %v3803_v5, 0.0 }
 0x230   :  { %v5063_v58 = vadd.f32 %v5062_v50, %v5061_v7  ;;  %v2802_v27 = vpop.f32.mrb[159].mxu0  ;;  %v9367_v16 = vpop.f32.mrb[159].mxu1  ;;  %v2811_v37 = vadd.f32 %v6909_v1, %v8033_v61  ;;  %v5603_v51 = vadd.f32 %v5602_v9, %v5601_v0  ;;  %v4380_v22 = vmax.f32 %v2808_v15, 0.0 }
 0x231   :  { %v4378_v14 = vmax.f32 %v2800_v44, 0.0  ;;  %v2803_v29 = vadd.f32 %v2802_v27, %v8033_v61  ;;  %v5606_v56 = vsel %vm4734_vm0, %v4628_v60, 0.0  ;;  %v5604_v39 = vsel %vm4734_vm0, %v4627_v11, 0.0 }
 0x232   :  { %v5065_v13 = vadd.f32 %v5064_v18, %v5063_v58  ;;  %v5605_v34 = vadd.f32 %v5604_v39, %v5603_v51  ;;  %v3816_v5 = vadd.f32 %v9291_v45, %v8033_v61  ;;  %v5608_v50 = vsel %vm4734_vm0, %v4629_v31, 0.0 }
 0x233   :  { %v5066_v8 = vsel %vm4734_vm0, %v4378_v14, 0.0  ;;  %v4379_v7 = vmax.f32 %v2803_v29, 0.0  ;;  %v3808_v44 = vadd.f32 %v9297_v35, %v8033_v61  ;;  %v3819_v15 = vadd.f32 %v9301_v28, %v8033_v61 }
 0x234   :  { %v5067_v41 = vadd.f32 %v5066_v8, %v5065_v13  ;;  %v4381_v1 = vmax.f32 %v2811_v37, 0.0  ;;  %v5607_v11 = vadd.f32 %v5606_v56, %v5605_v34  ;;  %v3811_v18 = vadd.f32 %v9305_v47, %v8033_v61 }
 0x235   :  { %v5068_v60 = vsel %vm4734_vm0, %v4379_v7, 0.0  ;;  %v6912_v0 = vpop.f32.mrb[160].mxu0  ;;  %v9384_v58 = vpop.f32.mrb[160].mxu1  ;;  %v5070_v45 = vsel %vm4734_vm0, %v4380_v22, 0.0  ;;  %v4632_v31 = vmax.f32 %v3816_v5, 0.0  ;;  %v4630_v14 = vmax.f32 %v3808_v44, 0.0 }
 0x236   :  { %v5069_v27 = vadd.f32 %v5068_v60, %v5067_v41  ;;  %v2815_v9 = vpop.f32.mrb[161].mxu0  ;;  %v9387_v35 = vpop.f32.mrb[161].mxu1  ;;  %v2824_v28 = vadd.f32 %v6912_v0, %v8033_v61  ;;  %v5609_v51 = vadd.f32 %v5608_v50, %v5607_v11  ;;  %v4631_v13 = vmax.f32 %v3811_v18, 0.0 }
 0x237   :  { %v2816_v37 = vadd.f32 %v2815_v9, %v8033_v61  ;;  %v6913_v29 = vpop.f32.mrb[162].mxu0  ;;  %v9391_v56 = vpop.f32.mrb[162].mxu1  ;;  %v5610_v22 = vsel %vm4734_vm0, %v4630_v14, 0.0  ;;  %v4633_v7 = vmax.f32 %v3819_v15, 0.0  ;;  %v5072_v5 = vsel %vm4734_vm0, %v4381_v1, 0.0 }
 0x238   :  { %v5071_v47 = vadd.f32 %v5070_v45, %v5069_v27  ;;  %v2827_v39 = vadd.f32 %v6913_v29, %v8033_v61  ;;  %v2818_v8 = vpop.f32.mrb[163].mxu0  ;;  %v9395_v34 = vpop.f32.mrb[163].mxu1  ;;  %v5611_v60 = vadd.f32 %v5610_v22, %v5609_v51  ;;  %v5614_v11 = vsel %vm4734_vm0, %v4632_v31, 0.0 }
 0x239   :  { %v4382_v41 = vmax.f32 %v2816_v37, 0.0  ;;  %v2819_v44 = vadd.f32 %v2818_v8, %v8033_v61  ;;  %v5612_v18 = vsel %vm4734_vm0, %v4631_v13, 0.0  ;;  %v4802_v45 = vrot.slane %v9163_v3, 1 }
 0x23a   :  { %v9400_v0 = vadd.f32 %v5072_v5, %v5071_v47  ;;  %v4384_v27 = vmax.f32 %v2824_v28, 0.0  ;;  %v5613_v9 = vadd.f32 %v5612_v18, %v5611_v60  ;;  %v4385_v14 = vmax.f32 %v2827_v39, 0.0 }
 0x23b   :  { %v4383_v15 = vmax.f32 %v2819_v44, 0.0  ;;  %v5616_v1 = vsel %vm4734_vm0, %v4633_v7, 0.0  ;;  %v3832_v37 = vadd.f32 %v9328_v48, %v8033_v61  ;;  %v3824_v29 = vadd.f32 %v9331_v43, %v8033_v61 }
 0x23c   :  { %v9413_v31 = vadd.f32 %v4869_v30, %v9212_v54  ;;  %v5080_v51 = vsel %vm4734_vm0, %v4382_v41, 0.0  ;;  %v5615_v47 = vadd.f32 %v5614_v11, %v5613_v9  ;;  %v3835_v43 = vadd.f32 %v9334_v40, %v8033_v61 }
 0x23d   :  { %v5081_v28 = vsel %vm4734_vm0, %v4383_v15, 0.0  ;;  %v6916_v13 = vpop.f32.mrb[164].mxu0  ;;  %v9417_v39 = vpop.f32.mrb[164].mxu1  ;;  %v4634_v7 = vmax.f32 %v3824_v29, 0.0  ;;  %v5083_v54 = vsel %vm4734_vm0, %v4384_v27, 0.0  ;;  %v3827_v60 = vadd.f32 %v9339_v2, %v8033_v61 }
 0x23e   :  { %v5082_v8 = vadd.f32 %v5081_v28, %v5080_v51  ;;  %v2840_v22 = vadd.f32 %v6916_v13, %v8033_v61  ;;  %v2831_v48 = vpop.f32.mrb[165].mxu0  ;;  %v9422_v5 = vpop.f32.mrb[165].mxu1  ;;  %v5617_v44 = vadd.f32 %v5616_v1, %v5615_v47  ;;  %v4936_v18 = vrot.slane %v8774_v46, 4 }
 0x23f   :  { %v2832_v30 = vadd.f32 %v2831_v48, %v8033_v61  ;;  %v6917_v41 = vpop.f32.mrb[166].mxu0  ;;  %v9428_v11 = vpop.f32.mrb[166].mxu1  ;;  %v5085_v15 = vsel %vm4734_vm0, %v4385_v14, 0.0  ;;  %v4636_v40 = vmax.f32 %v3832_v37, 0.0  ;;  %v5618_v1 = vsel %vm4734_vm0, %v4634_v7, 0.0 }
 0x240   :  { %v5084_v9 = vadd.f32 %v5083_v54, %v5082_v8  ;;  %v2834_v29 = vpop.f32.mrb[167].mxu0  ;;  %v9432_v51 = vpop.f32.mrb[167].mxu1  ;;  %v2843_v27 = vadd.f32 %v6917_v41, %v8033_v61  ;;  %v9438_v2 = vadd.f32 %v4802_v45, %v9163_v3  ;;  %v4388_v47 = vmax.f32 %v2840_v22, 0.0 }
 0x241   :  { %v4386_v28 = vmax.f32 %v2832_v30, 0.0  ;;  %v2835_v13 = vadd.f32 %v2834_v29, %v8033_v61  ;;  %v4637_v50 = vmax.f32 %v3835_v43, 0.0  ;;  %v5619_v54 = vadd.f32 %v5618_v1, %v5617_v44 }
 0x242   :  { %v5086_v48 = vadd.f32 %v5085_v15, %v5084_v9  ;;  %v4635_v37 = vmax.f32 %v3827_v60, 0.0  ;;  %v9443_v30 = vadd.f32 %v4936_v18, %v8774_v46  ;;  %v5622_v29 = vsel %vm4734_vm0, %v4636_v40, 0.0 }
 0x243   :  { %v5087_v14 = vsel %vm4734_vm0, %v4386_v28, 0.0  ;;  %v4387_v8 = vmax.f32 %v2835_v13, 0.0  ;;  %v4389_v7 = vmax.f32 %v2843_v27, 0.0  ;;  %v3848_v43 = vadd.f32 %v9356_v17, %v8033_v61 }
 0x244   :  { %v5088_v41 = vadd.f32 %v5087_v14, %v5086_v48  ;;  %v5620_v22 = vsel %vm4734_vm0, %v4635_v37, 0.0  ;;  %v3840_v18 = vadd.f32 %v9359_v24, %v8033_v61  ;;  %v5005_v28 = vrot.slane %v9113_v63, 4 }
 0x245   :  { %v5089_v3 = vsel %vm4734_vm0, %v4387_v8, 0.0  ;;  %v6920_v45 = vpop.f32.mrb[168].mxu0  ;;  %v9450_v15 = vpop.f32.mrb[168].mxu1  ;;  %v5621_v46 = vadd.f32 %v5620_v22, %v5619_v54  ;;  %v5091_v27 = vsel %vm4734_vm0, %v4388_v47, 0.0  ;;  %v5624_v17 = vsel %vm4734_vm0, %v4637_v50, 0.0 }
 0x246   :  { %v5090_v44 = vadd.f32 %v5089_v3, %v5088_v41  ;;  %v2856_v60 = vadd.f32 %v6920_v45, %v8033_v61  ;;  %v2847_v9 = vpop.f32.mrb[169].mxu0  ;;  %v9455_v40 = vpop.f32.mrb[169].mxu1  ;;  %v3851_v24 = vadd.f32 %v9363_v23, %v8033_v61  ;;  %v5093_v3 = vsel %vm4734_vm0, %v4389_v7, 0.0 }
 0x247   :  { %v2848_v13 = vadd.f32 %v2847_v9, %v8033_v61  ;;  %v6921_v1 = vpop.f32.mrb[170].mxu0  ;;  %v9461_v48 = vpop.f32.mrb[170].mxu1  ;;  %v5623_v37 = vadd.f32 %v5622_v29, %v5621_v46  ;;  %v4640_v22 = vmax.f32 %v3848_v43, 0.0  ;;  %v3843_v23 = vadd.f32 %v9367_v16, %v8033_v61 }
 0x248   :  { %v5092_v14 = vadd.f32 %v5091_v27, %v5090_v44  ;;  %v2859_v8 = vadd.f32 %v6921_v1, %v8033_v61  ;;  %v2850_v54 = vpop.f32.mrb[171].mxu0  ;;  %v9466_v41 = vpop.f32.mrb[171].mxu1  ;;  %v4392_v9 = vmax.f32 %v2856_v60, 0.0  ;;  %v4638_v44 = vmax.f32 %v3840_v18, 0.0 }
 0x249   :  { %v4390_v47 = vmax.f32 %v2848_v13, 0.0  ;;  %v2851_v45 = vadd.f32 %v2850_v54, %v8033_v61  ;;  %v9470_v20 = vadd.f32 %v5624_v17, %v5623_v37  ;;  %v4938_v46 = vrot.slane %v9443_v30, 2 }
 0x24a   :  { %v5094_v50 = vadd.f32 %v5093_v3, %v5092_v14  ;;  %v4393_v1 = vmax.f32 %v2859_v8, 0.0  ;;  %v9477_v7 = vadd.f32 %v5005_v28, %v9113_v63  ;;  %v4641_v54 = vmax.f32 %v3851_v24, 0.0 }
 0x24b   :  { %10376 = vst [vmem:[#allocation26_spill] sm:$0xff] %v9470_v20  ;;  %v5095_v27 = vsel %vm4734_vm0, %v4390_v47, 0.0  ;;  %v4391_v29 = vmax.f32 %v2851_v45, 0.0  ;;  %v4639_v17 = vmax.f32 %v3843_v23, 0.0  ;;  %v3864_v18 = vadd.f32 %v9384_v58, %v8033_v61 }
 0x24c   :  { %v5096_v13 = vadd.f32 %v5095_v27, %v5094_v50  ;;  %v3856_v14 = vadd.f32 %v9387_v35, %v8033_v61  ;;  %v5099_v16 = vsel %vm4734_vm0, %v4392_v9, 0.0  ;;  %v5635_v63 = vsel %vm4734_vm0, %v4640_v22, 0.0 }
 0x24d   :  { %v5097_v43 = vsel %vm4734_vm0, %v4391_v29, 0.0  ;;  %v6924_v60 = vpop.f32.mrb[172].mxu0  ;;  %v9484_v8 = vpop.f32.mrb[172].mxu1  ;;  %v5632_v28 = vsel %vm4734_vm0, %v4638_v44, 0.0  ;;  %v5101_v47 = vsel %vm4734_vm0, %v4393_v1, 0.0  ;;  %v5633_v35 = vsel %vm4734_vm0, %v4639_v17, 0.0 }
 0x24e   :  { %v5098_v37 = vadd.f32 %v5097_v43, %v5096_v13  ;;  %v2863_v3 = vpop.f32.mrb[173].mxu0  ;;  %v9489_v24 = vpop.f32.mrb[173].mxu1  ;;  %v2872_v45 = vadd.f32 %v6924_v60, %v8033_v61  ;;  %v4642_v22 = vmax.f32 %v3856_v14, 0.0  ;;  %v3867_v44 = vadd.f32 %v9391_v56, %v8033_v61 }
 0x24f   :  { %v2864_v58 = vadd.f32 %v2863_v3, %v8033_v61  ;;  %v6925_v50 = vpop.f32.mrb[174].mxu0  ;;  %v9495_v27 = vpop.f32.mrb[174].mxu1  ;;  %v5634_v60 = vadd.f32 %v5633_v35, %v5632_v28  ;;  %v4644_v3 = vmax.f32 %v3864_v18, 0.0  ;;  %v9504_v20 = vadd.f32 %v4938_v46, %v9443_v30 }
 0x250   :  { %v5100_v9 = vadd.f32 %v5099_v16, %v5098_v37  ;;  %v2875_v29 = vadd.f32 %v6925_v50, %v8033_v61  ;;  %v2866_v23 = vpop.f32.mrb[175].mxu0  ;;  %v9500_v13 = vpop.f32.mrb[175].mxu1  ;;  %v5007_v17 = vrot.slane %v9477_v7, 2  ;;  %v5637_v37 = vsel %vm4734_vm0, %v4641_v54, 0.0 }
 0x251   :  { %v4394_v1 = vmax.f32 %v2864_v58, 0.0  ;;  %v2867_v43 = vadd.f32 %v2866_v23, %v8033_v61  ;;  %v4396_v50 = vmax.f32 %v2872_v45, 0.0  ;;  %v5636_v56 = vadd.f32 %v5635_v63, %v5634_v60 }
 0x252   :  { %v5102_v16 = vadd.f32 %v5101_v47, %v5100_v9  ;;  %v4397_v12 = vmax.f32 %v2875_v29, 0.0  ;;  %v5639_v58 = vsel %vm4734_vm0, %v4642_v22, 0.0  ;;  %v4645_v23 = vmax.f32 %v3867_v44, 0.0 }
 0x253   :  { %v5103_v14 = vsel %vm4734_vm0, %v4394_v1, 0.0  ;;  %v4395_v6 = vmax.f32 %v2867_v43, 0.0  ;;  %v5643_v30 = vsel %vm4734_vm0, %v4644_v3, 0.0  ;;  %v5638_v46 = vadd.f32 %v5637_v37, %v5636_v56 }
 0x254   :  { %v5104_v52 = vadd.f32 %v5103_v14, %v5102_v16  ;;  %v3859_v47 = vadd.f32 %v9395_v34, %v8033_v61  ;;  %v3880_v9 = vadd.f32 %v9417_v39, %v8033_v61  ;;  %v3872_v29 = vadd.f32 %v9422_v5, %v8033_v61 }
 0x255   :  { %v5105_v18 = vsel %vm4734_vm0, %v4395_v6, 0.0  ;;  %v6928_v28 = vpop.f32.mrb[176].mxu0  ;;  %v9514_v54 = vpop.f32.mrb[176].mxu1  ;;  %v5107_v22 = vsel %vm4734_vm0, %v4396_v50, 0.0  ;;  %v5640_v34 = vadd.f32 %v5639_v58, %v5638_v46  ;;  %v5645_v50 = vsel %vm4734_vm0, %v4645_v23, 0.0 }
 0x256   :  { %v5106_v45 = vadd.f32 %v5105_v18, %v5104_v52  ;;  %v2888_v35 = vadd.f32 %v6928_v28, %v8033_v61  ;;  %v2879_v63 = vpop.f32.mrb[177].mxu0  ;;  %v9521_v6 = vpop.f32.mrb[177].mxu1  ;;  %v4643_v43 = vmax.f32 %v3859_v47, 0.0  ;;  %v5109_v52 = vsel %vm4734_vm0, %v4397_v12, 0.0 }
 0x257   :  { %v2880_v44 = vadd.f32 %v2879_v63, %v8033_v61  ;;  %v6929_v1 = vpop.f32.mrb[178].mxu0  ;;  %v9525_v60 = vpop.f32.mrb[178].mxu1  ;;  %v4646_v37 = vmax.f32 %v3872_v29, 0.0  ;;  %v4648_v47 = vmax.f32 %v3880_v9, 0.0  ;;  %v3883_v29 = vadd.f32 %v9428_v11, %v8033_v61 }
 0x258   :  { %v5108_v3 = vadd.f32 %v5107_v22, %v5106_v45  ;;  %v2891_v16 = vadd.f32 %v6929_v1, %v8033_v61  ;;  %v2882_v39 = vpop.f32.mrb[179].mxu0  ;;  %v9529_v14 = vpop.f32.mrb[179].mxu1  ;;  %v5641_v18 = vsel %vm4734_vm0, %v4643_v43, 0.0  ;;  %v4400_v58 = vmax.f32 %v2888_v35, 0.0 }
 0x259   :  { %v4398_v5 = vmax.f32 %v2880_v44, 0.0  ;;  %v2883_v56 = vadd.f32 %v2882_v39, %v8033_v61  ;;  %v5642_v46 = vadd.f32 %v5641_v18, %v5640_v34  ;;  %v5647_v44 = vsel %vm4734_vm0, %v4646_v37, 0.0 }
 0x25a   :  { %v5110_v28 = vadd.f32 %v5109_v52, %v5108_v3  ;;  %v4401_v45 = vmax.f32 %v2891_v16, 0.0  ;;  %v3875_v23 = vadd.f32 %v9432_v51, %v8033_v61  ;;  %v4649_v52 = vmax.f32 %v3883_v29, 0.0 }
 0x25b   :  { %v5111_v12 = vsel %vm4734_vm0, %v4398_v5, 0.0  ;;  %v4399_v63 = vmax.f32 %v2883_v56, 0.0  ;;  %v5644_v1 = vadd.f32 %v5643_v30, %v5642_v46  ;;  %v3896_v9 = vadd.f32 %v9450_v15, %v8033_v61 }
 0x25c   :  { %v5112_v22 = vadd.f32 %v5111_v12, %v5110_v28  ;;  %v3888_v34 = vadd.f32 %v9455_v40, %v8033_v61  ;;  %v4647_v37 = vmax.f32 %v3875_v23, 0.0  ;;  %v5115_v51 = vsel %vm4734_vm0, %v4400_v58, 0.0 }
 0x25d   :  { %v5113_v43 = vsel %vm4734_vm0, %v4399_v63, 0.0  ;;  %v6932_v35 = vpop.f32.mrb[180].mxu0  ;;  %v9545_v3 = vpop.f32.mrb[180].mxu1  ;;  %v5646_v39 = vadd.f32 %v5645_v50, %v5644_v1  ;;  %v5117_v56 = vsel %vm4734_vm0, %v4401_v45, 0.0  ;;  %v5651_v28 = vsel %vm4734_vm0, %v4648_v47, 0.0 }
 0x25e   :  { %v5114_v11 = vadd.f32 %v5113_v43, %v5112_v22  ;;  %v2904_v30 = vadd.f32 %v6932_v35, %v8033_v61  ;;  %v2895_v16 = vpop.f32.mrb[181].mxu0  ;;  %v9548_v5 = vpop.f32.mrb[181].mxu1  ;;  %v4650_v50 = vmax.f32 %v3888_v34, 0.0  ;;  %v5653_v45 = vsel %vm4734_vm0, %v4649_v52, 0.0 }
 0x25f   :  { %v2896_v18 = vadd.f32 %v2895_v16, %v8033_v61  ;;  %v6933_v15 = vpop.f32.mrb[182].mxu0  ;;  %v9554_v40 = vpop.f32.mrb[182].mxu1  ;;  %v5648_v29 = vadd.f32 %v5647_v44, %v5646_v39  ;;  %v5649_v23 = vsel %vm4734_vm0, %v4647_v37, 0.0  ;;  %v4652_v16 = vmax.f32 %v3896_v9, 0.0 }
 0x260   :  { %v5116_v46 = vadd.f32 %v5115_v51, %v5114_v11  ;;  %v2907_v12 = vadd.f32 %v6933_v15, %v8033_v61  ;;  %v2898_v63 = vpop.f32.mrb[183].mxu0  ;;  %v9557_v22 = vpop.f32.mrb[183].mxu1  ;;  %v4404_v43 = vmax.f32 %v2904_v30, 0.0  ;;  %v3899_v44 = vadd.f32 %v9461_v48, %v8033_v61 }
 0x261   :  { %v4402_v1 = vmax.f32 %v2896_v18, 0.0  ;;  %v2899_v58 = vadd.f32 %v2898_v63, %v8033_v61  ;;  %v5650_v47 = vadd.f32 %v5649_v23, %v5648_v29  ;;  %v5655_v18 = vsel %vm4734_vm0, %v4650_v50, 0.0 }
 0x262   :  { %v5118_v35 = vadd.f32 %v5117_v56, %v5116_v46  ;;  %v4405_v51 = vmax.f32 %v2907_v12, 0.0  ;;  %v3891_v52 = vadd.f32 %v9466_v41, %v8033_v61  ;;  %v4653_v56 = vmax.f32 %v3899_v44, 0.0 }
 0x263   :  { %v5119_v11 = vsel %vm4734_vm0, %v4402_v1, 0.0  ;;  %v4403_v15 = vmax.f32 %v2899_v58, 0.0  ;;  %v5652_v39 = vadd.f32 %v5651_v28, %v5650_v47  ;;  %v3912_v9 = vadd.f32 %v9484_v8, %v8033_v61 }
 0x264   :  { %v5120_v34 = vadd.f32 %v5119_v11, %v5118_v35  ;;  %v3904_v46 = vadd.f32 %v9489_v24, %v8033_v61  ;;  %v4651_v50 = vmax.f32 %v3891_v52, 0.0  ;;  %v5123_v41 = vsel %vm4734_vm0, %v4404_v43, 0.0 }
 0x265   :  { %v5121_v37 = vsel %vm4734_vm0, %v4403_v15, 0.0  ;;  %v6936_v30 = vpop.f32.mrb[184].mxu0  ;;  %v9573_v12 = vpop.f32.mrb[184].mxu1  ;;  %v5654_v29 = vadd.f32 %v5653_v45, %v5652_v39  ;;  %v5125_v58 = vsel %vm4734_vm0, %v4405_v51, 0.0  ;;  %v5659_v35 = vsel %vm4734_vm0, %v4652_v16, 0.0 }
 0x266   :  { %v5122_v48 = vadd.f32 %v5121_v37, %v5120_v34  ;;  %v2920_v28 = vadd.f32 %v6936_v30, %v8033_v61  ;;  %v2911_v63 = vpop.f32.mrb[185].mxu0  ;;  %v9576_v1 = vpop.f32.mrb[185].mxu1  ;;  %v4656_v45 = vmax.f32 %v3912_v9, 0.0  ;;  %v5657_v51 = vsel %vm4734_vm0, %v4651_v50, 0.0 }
 0x267   :  { %v2912_v23 = vadd.f32 %v2911_v63, %v8033_v61  ;;  %v6937_v8 = vpop.f32.mrb[186].mxu0  ;;  %v9582_v24 = vpop.f32.mrb[186].mxu1  ;;  %v5656_v44 = vadd.f32 %v5655_v18, %v5654_v29  ;;  %v4654_v52 = vmax.f32 %v3904_v46, 0.0  ;;  %v5661_v16 = vsel %vm4734_vm0, %v4653_v56, 0.0 }
 0x268   :  { %v5124_v47 = vadd.f32 %v5123_v41, %v5122_v48  ;;  %v2923_v11 = vadd.f32 %v6937_v8, %v8033_v61  ;;  %v2914_v15 = vpop.f32.mrb[187].mxu0  ;;  %v9585_v34 = vpop.f32.mrb[187].mxu1  ;;  %v4408_v37 = vmax.f32 %v2920_v28, 0.0  ;;  %v3915_v18 = vadd.f32 %v9495_v27, %v8033_v61 }
 0x269   :  { %v4406_v39 = vmax.f32 %v2912_v23, 0.0  ;;  %v2915_v43 = vadd.f32 %v2914_v15, %v8033_v61  ;;  %v5658_v63 = vadd.f32 %v5657_v51, %v5656_v44  ;;  %v5667_v23 = vsel %vm4734_vm0, %v4656_v45, 0.0 }
 0x26a   :  { %v5126_v30 = vadd.f32 %v5125_v58, %v5124_v47  ;;  %v4409_v41 = vmax.f32 %v2923_v11, 0.0  ;;  %v3907_v50 = vadd.f32 %v9500_v13, %v8033_v61  ;;  %v5663_v56 = vsel %vm4734_vm0, %v4654_v52, 0.0 }
 0x26b   :  { %v5127_v48 = vsel %vm4734_vm0, %v4406_v39, 0.0  ;;  %v4407_v8 = vmax.f32 %v2915_v43, 0.0  ;;  %v5660_v29 = vadd.f32 %v5659_v35, %v5658_v63  ;;  %v3928_v58 = vadd.f32 %v9514_v54, %v8033_v61 }
 0x26c   :  { %v5128_v9 = vadd.f32 %v5127_v48, %v5126_v30  ;;  %v3920_v47 = vadd.f32 %v9521_v6, %v8033_v61  ;;  %v4657_v44 = vmax.f32 %v3915_v18, 0.0  ;;  %v4655_v45 = vmax.f32 %v3907_v50, 0.0 }
 0x26d   :  { %v5129_v46 = vsel %vm4734_vm0, %v4407_v8, 0.0  ;;  %v6940_v28 = vpop.f32.mrb[188].mxu0  ;;  %v9602_v11 = vpop.f32.mrb[188].mxu1  ;;  %v5662_v15 = vadd.f32 %v5661_v16, %v5660_v29  ;;  %v5131_v13 = vsel %vm4734_vm0, %v4408_v37, 0.0  ;;  %v5133_v43 = vsel %vm4734_vm0, %v4409_v41, 0.0 }
 0x26e   :  { %v5130_v27 = vadd.f32 %v5129_v46, %v5128_v9  ;;  %v2927_v35 = vpop.f32.mrb[189].mxu0  ;;  %v9604_v39 = vpop.f32.mrb[189].mxu1  ;;  %v2936_v51 = vadd.f32 %v6940_v28, %v8033_v61  ;;  %v4660_v8 = vmax.f32 %v3928_v58, 0.0  ;;  %v5665_v41 = vsel %vm4734_vm0, %v4655_v45, 0.0 }
 0x26f   :  { %v2928_v54 = vadd.f32 %v2927_v35, %v8033_v61  ;;  %v6941_v52 = vpop.f32.mrb[190].mxu0  ;;  %v9610_v30 = vpop.f32.mrb[190].mxu1  ;;  %v5664_v16 = vadd.f32 %v5663_v56, %v5662_v15  ;;  %v4658_v29 = vmax.f32 %v3920_v47, 0.0  ;;  %v4940_v50 = vrot.slane %v9504_v20, 1 }
 0x270   :  { %v5132_v6 = vadd.f32 %v5131_v13, %v5130_v27  ;;  %v2939_v63 = vadd.f32 %v6941_v52, %v8033_v61  ;;  %v2930_v48 = vpop.f32.mrb[191].mxu0  ;;  %v9613_v18 = vpop.f32.mrb[191].mxu1  ;;  %v5669_v28 = vsel %vm4734_vm0, %v4657_v44, 0.0  ;;  %v4412_v27 = vmax.f32 %v2936_v51, 0.0 }
 0x271   :  { %v4410_v9 = vmax.f32 %v2928_v54, 0.0  ;;  %v2931_v37 = vadd.f32 %v2930_v48, %v8033_v61  ;;  %v5666_v35 = vadd.f32 %v5665_v41, %v5664_v16  ;;  %v3931_v56 = vadd.f32 %v9525_v60, %v8033_v61 }
 0x272   :  { %v5134_v46 = vadd.f32 %v5133_v43, %v5132_v6  ;;  %v4413_v15 = vmax.f32 %v2939_v63, 0.0  ;;  %v3923_v45 = vadd.f32 %v9529_v14, %v8033_v61  ;;  %v9627_v47 = vadd.f32 %v5007_v17, %v9477_v7 }
 0x273   :  { %v5135_v13 = vsel %vm4734_vm0, %v4410_v9, 0.0  ;;  %v4411_v52 = vmax.f32 %v2931_v37, 0.0  ;;  %v5668_v54 = vadd.f32 %v5667_v23, %v5666_v35  ;;  %v5675_v51 = vsel %vm4734_vm0, %v4660_v8, 0.0 }
 0x274   :  { %v5136_v58 = vadd.f32 %v5135_v13, %v5134_v46  ;;  %v5671_v6 = vsel %vm4734_vm0, %v4658_v29, 0.0  ;;  %v4659_v16 = vmax.f32 %v3923_v45, 0.0  ;;  %v3936_v14 = vadd.f32 %v9548_v5, %v8033_v61 }
 0x275   :  { %v5137_v44 = vsel %vm4734_vm0, %v4411_v52, 0.0  ;;  %v6944_v43 = vpop.f32.mrb[192].mxu0  ;;  %v9632_v48 = vpop.f32.mrb[192].mxu1  ;;  %v5670_v23 = vadd.f32 %v5669_v28, %v5668_v54  ;;  %v5139_v7 = vsel %vm4734_vm0, %v4412_v27, 0.0  ;;  %v4661_v41 = vmax.f32 %v3931_v56, 0.0 }
 0x276   :  { %v5138_v60 = vadd.f32 %v5137_v44, %v5136_v58  ;;  %v2943_v63 = vpop.f32.mrb[193].mxu0  ;;  %v9636_v9 = vpop.f32.mrb[193].mxu1  ;;  %v2952_v17 = vadd.f32 %v6944_v43, %v8033_v61  ;;  %v5141_v46 = vsel %vm4734_vm0, %v4413_v15, 0.0  ;;  %v5673_v54 = vsel %vm4734_vm0, %v4659_v16, 0.0 }
 0x277   :  { %v2944_v37 = vadd.f32 %v2943_v63, %v8033_v61  ;;  %v6945_v8 = vpop.f32.mrb[194].mxu0  ;;  %v9641_v29 = vpop.f32.mrb[194].mxu1  ;;  %v5672_v52 = vadd.f32 %v5671_v6, %v5670_v23  ;;  %v3944_v45 = vadd.f32 %v9545_v3, %v8033_v61  ;;  %v10377_v56 = vrot.slane %v9413_v31, 1 }
 0x278   :  { %v5140_v35 = vadd.f32 %v5139_v7, %v5138_v60  ;;  %v2955_v28 = vadd.f32 %v6945_v8, %v8033_v61  ;;  %v2946_v13 = vpop.f32.mrb[195].mxu0  ;;  %v9645_v5 = vpop.f32.mrb[195].mxu1  ;;  %v4662_v60 = vmax.f32 %v3936_v14, 0.0  ;;  %v4416_v6 = vmax.f32 %v2952_v17, 0.0 }
 0x279   :  { %v4414_v58 = vmax.f32 %v2944_v37, 0.0  ;;  %v2947_v27 = vadd.f32 %v2946_v13, %v8033_v61  ;;  %v9654_v44 = vadd.f32 %v10377_v56, %v9413_v31  ;;  %v5674_v43 = vadd.f32 %v5673_v54, %v5672_v52 }
 0x27a   :  { %v9656_v15 = vadd.f32 %v5141_v46, %v5140_v35  ;;  %v4417_v63 = vmax.f32 %v2955_v28, 0.0  ;;  %v5677_v7 = vsel %vm4734_vm0, %v4661_v41, 0.0  ;;  %v9660_v37 = vadd.f32 %v4940_v50, %v9504_v20 }
 0x27b   :  { %v4415_v23 = vmax.f32 %v2947_v27, 0.0  ;;  %v5676_v16 = vadd.f32 %v5675_v51, %v5674_v43  ;;  %v3947_v3 = vadd.f32 %v9554_v40, %v8033_v61  ;;  %v3939_v31 = vadd.f32 %v9557_v22, %v8033_v61 }
 0x27c   :  { %v5149_v46 = vsel %vm4734_vm0, %v4414_v58, 0.0  ;;  %v4664_v35 = vmax.f32 %v3944_v45, 0.0  ;;  %v5679_v40 = vsel %vm4734_vm0, %v4662_v60, 0.0  ;;  %v5152_v22 = vsel %vm4734_vm0, %v4416_v6, 0.0 }
 0x27d   :  { %v5150_v14 = vsel %vm4734_vm0, %v4415_v23, 0.0  ;;  %v6948_v17 = vpop.f32.mrb[196].mxu0  ;;  %v9669_v28 = vpop.f32.mrb[196].mxu1  ;;  %v5678_v51 = vadd.f32 %v5677_v7, %v5676_v16  ;;  %v5154_v52 = vsel %vm4734_vm0, %v4417_v63, 0.0  ;;  %v4663_v54 = vmax.f32 %v3939_v31, 0.0 }
 0x27e   :  { %v5151_v41 = vadd.f32 %v5150_v14, %v5149_v46  ;;  %v2968_v20 = vadd.f32 %v6948_v17, %v8033_v61  ;;  %v2959_v50 = vpop.f32.mrb[197].mxu0  ;;  %v9673_v13 = vpop.f32.mrb[197].mxu1  ;;  %v4665_v46 = vmax.f32 %v3947_v3, 0.0  ;;  %v3952_v60 = vadd.f32 %v9576_v1, %v8033_v61 }
 0x27f   :  { %v2960_v58 = vadd.f32 %v2959_v50, %v8033_v61  ;;  %v6949_v27 = vpop.f32.mrb[198].mxu0  ;;  %v9678_v45 = vpop.f32.mrb[198].mxu1  ;;  %v5680_v63 = vadd.f32 %v5679_v40, %v5678_v51  ;;  %v5681_v14 = vsel %vm4734_vm0, %v4663_v54, 0.0  ;;  %v5683_v50 = vsel %vm4734_vm0, %v4664_v35, 0.0 }
 0x280   :  { %v5153_v56 = vadd.f32 %v5152_v22, %v5151_v41  ;;  %v2971_v43 = vadd.f32 %v6949_v27, %v8033_v61  ;;  %v2962_v23 = vpop.f32.mrb[199].mxu0  ;;  %v9683_v7 = vpop.f32.mrb[199].mxu1  ;;  %v4420_v17 = vmax.f32 %v2968_v20, 0.0  ;;  %v3960_v41 = vadd.f32 %v9573_v12, %v8033_v61 }
 0x281   :  { %v4418_v16 = vmax.f32 %v2960_v58, 0.0  ;;  %v2963_v6 = vadd.f32 %v2962_v23, %v8033_v61  ;;  %v5074_v3 = vrot.slane %v9400_v0, 4  ;;  %v5682_v27 = vadd.f32 %v5681_v14, %v5680_v63 }
 0x282   :  { %v5155_v31 = vadd.f32 %v5154_v52, %v5153_v56  ;;  %v4421_v58 = vmax.f32 %v2971_v43, 0.0  ;;  %v5685_v23 = vsel %vm4734_vm0, %v4665_v46, 0.0  ;;  %v4666_v51 = vmax.f32 %v3952_v60, 0.0 }
 0x283   :  { %v5156_v22 = vsel %vm4734_vm0, %v4418_v16, 0.0  ;;  %v4419_v1 = vmax.f32 %v2963_v6, 0.0  ;;  %v5684_v52 = vadd.f32 %v5683_v50, %v5682_v27  ;;  %v3963_v35 = vadd.f32 %v9582_v24, %v8033_v61 }
 0x284   :  { %v5157_v8 = vadd.f32 %v5156_v22, %v5155_v31  ;;  %v3955_v12 = vadd.f32 %v9585_v34, %v8033_v61  ;;  %v5160_v56 = vsel %vm4734_vm0, %v4420_v17, 0.0  ;;  %v4668_v43 = vmax.f32 %v3960_v41, 0.0 }
 0x285   :  { %v5158_v40 = vsel %vm4734_vm0, %v4419_v1, 0.0  ;;  %v6952_v20 = vpop.f32.mrb[200].mxu0  ;;  %v9698_v54 = vpop.f32.mrb[200].mxu1  ;;  %v5687_v46 = vsel %vm4734_vm0, %v4666_v51, 0.0  ;;  %v5686_v24 = vadd.f32 %v5685_v23, %v5684_v52  ;;  %v9709_v34 = vadd.f32 %v5074_v3, %v9400_v0 }
 0x286   :  { %v5159_v16 = vadd.f32 %v5158_v40, %v5157_v8  ;;  %v2975_v6 = vpop.f32.mrb[201].mxu0  ;;  %v9702_v60 = vpop.f32.mrb[201].mxu1  ;;  %v2984_v63 = vadd.f32 %v6952_v20, %v8033_v61  ;;  %v4667_v50 = vmax.f32 %v3955_v12, 0.0  ;;  %v5162_v8 = vsel %vm4734_vm0, %v4421_v58, 0.0 }
 0x287   :  { %v2976_v14 = vadd.f32 %v2975_v6, %v8033_v61  ;;  %v6953_v31 = vpop.f32.mrb[202].mxu0  ;;  %v9706_v22 = vpop.f32.mrb[202].mxu1  ;;  %v4669_v1 = vmax.f32 %v3963_v35, 0.0  ;;  %v5688_v6 = vadd.f32 %v5687_v46, %v5686_v24  ;;  %v5691_v52 = vsel %vm4734_vm0, %v4668_v43, 0.0 }
 0x288   :  { %v5161_v17 = vadd.f32 %v5160_v56, %v5159_v16  ;;  %v2978_v41 = vpop.f32.mrb[203].mxu0  ;;  %v9712_v27 = vpop.f32.mrb[203].mxu1  ;;  %v2987_v40 = vadd.f32 %v6953_v31, %v8033_v61  ;;  %v5689_v12 = vsel %vm4734_vm0, %v4667_v50, 0.0  ;;  %v3976_v0 = vadd.f32 %v9602_v11, %v8033_v61 }
 0x289   :  { %v4422_v51 = vmax.f32 %v2976_v14, 0.0  ;;  %v2979_v20 = vadd.f32 %v2978_v41, %v8033_v61  ;;  %v4424_v3 = vmax.f32 %v2984_v63, 0.0  ;;  %v5690_v56 = vadd.f32 %v5689_v12, %v5688_v6 }
 0x28a   :  { %v5163_v23 = vadd.f32 %v5162_v8, %v5161_v17  ;;  %v5693_v14 = vsel %vm4734_vm0, %v4669_v1, 0.0  ;;  %v3968_v31 = vadd.f32 %v9604_v39, %v8033_v61  ;;  %v3979_v46 = vadd.f32 %v9610_v30, %v8033_v61 }
 0x28b   :  { %v5164_v58 = vsel %vm4734_vm0, %v4422_v51, 0.0  ;;  %v4423_v35 = vmax.f32 %v2979_v20, 0.0  ;;  %v4425_v43 = vmax.f32 %v2987_v40, 0.0  ;;  %v5692_v8 = vadd.f32 %v5691_v52, %v5690_v56 }
 0x28c   :  { %v5165_v16 = vadd.f32 %v5164_v58, %v5163_v23  ;;  %v3971_v11 = vadd.f32 %v9613_v18, %v8033_v61  ;;  %v4672_v51 = vmax.f32 %v3976_v0, 0.0  ;;  %v4670_v20 = vmax.f32 %v3968_v31, 0.0 }
 0x28d   :  { %v5166_v24 = vsel %vm4734_vm0, %v4423_v35, 0.0  ;;  %v6956_v50 = vpop.f32.mrb[204].mxu0  ;;  %v9729_v63 = vpop.f32.mrb[204].mxu1  ;;  %v5168_v30 = vsel %vm4734_vm0, %v4424_v3, 0.0  ;;  %v9736_v23 = vadd.f32 %v5693_v14, %v5692_v8  ;;  %v4673_v56 = vmax.f32 %v3979_v46, 0.0 }
 0x28e   :  { %v5167_v17 = vadd.f32 %v5166_v24, %v5165_v16  ;;  %v3000_v41 = vadd.f32 %v6956_v50, %v8033_v61  ;;  %v2991_v1 = vpop.f32.mrb[205].mxu0  ;;  %v9732_v39 = vpop.f32.mrb[205].mxu1  ;;  %v4671_v52 = vmax.f32 %v3971_v11, 0.0  ;;  %v5701_v35 = vsel %vm4734_vm0, %v4670_v20, 0.0 }
 0x28f   :  { %v2992_v40 = vadd.f32 %v2991_v1, %v8033_v61  ;;  %v6957_v6 = vpop.f32.mrb[206].mxu0  ;;  %10378 = vst [vmem:[#allocation27_spill] sm:$0xff] %v9736_v23  ;;  %v9738_v12 = vpop.f32.mrb[206].mxu1  ;;  %v3992_v0 = vadd.f32 %v9632_v48, %v8033_v61  ;;  %v5170_v3 = vsel %vm4734_vm0, %v4425_v43, 0.0  ;;  %v5704_v11 = vsel %vm4734_vm0, %v4672_v51, 0.0 }
 0x290   :  { %v5169_v18 = vadd.f32 %v5168_v30, %v5167_v17  ;;  %v2994_v58 = vpop.f32.mrb[207].mxu0  ;;  %v9743_v16 = vpop.f32.mrb[207].mxu1  ;;  %v3003_v24 = vadd.f32 %v6957_v6, %v8033_v61  ;;  %v4428_v50 = vmax.f32 %v3000_v41, 0.0  ;;  %v5702_v17 = vsel %vm4734_vm0, %v4671_v52, 0.0 }
 0x291   :  { %v4426_v31 = vmax.f32 %v2992_v40, 0.0  ;;  %v2995_v14 = vadd.f32 %v2994_v58, %v8033_v61  ;;  %v5076_v46 = vrot.slane %v9709_v34, 2  ;;  %v5703_v20 = vadd.f32 %v5702_v17, %v5701_v35 }
 0x292   :  { %v5171_v8 = vadd.f32 %v5170_v3, %v5169_v18  ;;  %v5706_v43 = vsel %vm4734_vm0, %v4673_v56, 0.0  ;;  %v4676_v40 = vmax.f32 %v3992_v0, 0.0  ;;  %v3984_v6 = vadd.f32 %v9636_v9, %v8033_v61 }
 0x293   :  { %v5172_v1 = vsel %vm4734_vm0, %v4426_v31, 0.0  ;;  %v4427_v48 = vmax.f32 %v2995_v14, 0.0  ;;  %v4429_v58 = vmax.f32 %v3003_v24, 0.0  ;;  %v5705_v51 = vadd.f32 %v5704_v11, %v5703_v20 }
 0x294   :  { %v5173_v30 = vadd.f32 %v5172_v1, %v5171_v8  ;;  %v3995_v52 = vadd.f32 %v9641_v29, %v8033_v61  ;;  %v5176_v31 = vsel %vm4734_vm0, %v4428_v50, 0.0  ;;  %v4674_v0 = vmax.f32 %v3984_v6, 0.0 }
 0x295   :  { %v5174_v41 = vsel %vm4734_vm0, %v4427_v48, 0.0  ;;  %v6960_v18 = vpop.f32.mrb[208].mxu0  ;;  %v9758_v3 = vpop.f32.mrb[208].mxu1  ;;  %v5707_v17 = vadd.f32 %v5706_v43, %v5705_v51  ;;  %v3987_v11 = vadd.f32 %v9645_v5, %v8033_v61 }
 0x296   :  { %v5175_v35 = vadd.f32 %v5174_v41, %v5173_v30  ;;  %v3016_v14 = vadd.f32 %v6960_v18, %v8033_v61  ;;  %v3007_v56 = vpop.f32.mrb[209].mxu0  ;;  %v9762_v8 = vpop.f32.mrb[209].mxu1  ;;  %v4677_v1 = vmax.f32 %v3995_v52, 0.0  ;;  %v5708_v41 = vsel %vm4734_vm0, %v4674_v0, 0.0 }
 0x297   :  { %v3008_v9 = vadd.f32 %v3007_v56, %v8033_v61  ;;  %v6961_v24 = vpop.f32.mrb[210].mxu0  ;;  %v9767_v29 = vpop.f32.mrb[210].mxu1  ;;  %v5178_v18 = vsel %vm4734_vm0, %v4429_v58, 0.0  ;;  %v5709_v51 = vadd.f32 %v5708_v41, %v5707_v17  ;;  %v9776_v52 = vadd.f32 %v5076_v46, %v9709_v34 }
 0x298   :  { %v5177_v48 = vadd.f32 %v5176_v31, %v5175_v35  ;;  %v4432_v20 = vmax.f32 %v3016_v14, 0.0  ;;  %v3019_v50 = vadd.f32 %v6961_v24, %v8033_v61  ;;  %v3010_v30 = vpop.f32.mrb[211].mxu0  ;;  %v9771_v6 = vpop.f32.mrb[211].mxu1  ;;  %v5712_v35 = vsel %vm4734_vm0, %v4676_v40, 0.0 }
 0x299   :  { %v4430_v56 = vmax.f32 %v3008_v9, 0.0  ;;  %v3011_v43 = vadd.f32 %v3010_v30, %v8033_v61  ;;  %v4675_v23 = vmax.f32 %v3987_v11, 0.0  ;;  %v5714_v58 = vsel %vm4734_vm0, %v4677_v1, 0.0 }
 0x29a   :  { %v5184_v5 = vsel %vm4734_vm0, %v4432_v20, 0.0  ;;  %v5179_v31 = vadd.f32 %v5178_v18, %v5177_v48  ;;  %v4433_v24 = vmax.f32 %v3019_v50, 0.0  ;;  %v4008_v9 = vadd.f32 %v9669_v28, %v8033_v61 }
 0x29b   :  { %v5180_v14 = vsel %vm4734_vm0, %v4430_v56, 0.0  ;;  %v4431_v0 = vmax.f32 %v3011_v43, 0.0  ;;  %v4000_v34 = vadd.f32 %v9673_v13, %v8033_v61  ;;  %v5710_v48 = vsel %vm4734_vm0, %v4675_v23, 0.0 }
 0x29c   :  { %v5181_v59 = vadd.f32 %v5180_v14, %v5179_v31  ;;  %v4011_v40 = vadd.f32 %v9678_v45, %v8033_v61  ;;  %v4003_v11 = vadd.f32 %v9683_v7, %v8033_v61  ;;  %v5711_v30 = vadd.f32 %v5710_v48, %v5709_v51 }
 0x29d   :  { %v5182_v46 = vsel %vm4734_vm0, %v4431_v0, 0.0  ;;  %v6964_v17 = vpop.f32.mrb[212].mxu0  ;;  %v9792_v20 = vpop.f32.mrb[212].mxu1  ;;  %v4680_v41 = vmax.f32 %v4008_v9, 0.0  ;;  %v4678_v23 = vmax.f32 %v4000_v34, 0.0  ;;  %v5186_v51 = vsel %vm4734_vm0, %v4433_v24, 0.0 }
 0x29e   :  { %v5183_v1 = vadd.f32 %v5182_v46, %v5181_v59  ;;  %v3032_v50 = vadd.f32 %v6964_v17, %v8033_v61  ;;  %v3023_v28 = vpop.f32.mrb[213].mxu0  ;;  %v9795_v13 = vpop.f32.mrb[213].mxu1  ;;  %v4681_v43 = vmax.f32 %v4011_v40, 0.0  ;;  %v4679_v31 = vmax.f32 %v4003_v11, 0.0 }
 0x29f   :  { %v3024_v18 = vadd.f32 %v3023_v28, %v8033_v61  ;;  %v6965_v56 = vpop.f32.mrb[214].mxu0  ;;  %v9798_v45 = vpop.f32.mrb[214].mxu1  ;;  %v5713_v46 = vadd.f32 %v5712_v35, %v5711_v30  ;;  %v5716_v28 = vsel %vm4734_vm0, %v4678_v23, 0.0  ;;  %v5720_v11 = vsel %vm4734_vm0, %v4680_v41, 0.0 }
 0x2a0   :  { %v5185_v14 = vadd.f32 %v5184_v5, %v5183_v1  ;;  %v4436_v7 = vmax.f32 %v3032_v50, 0.0  ;;  %v3035_v0 = vadd.f32 %v6965_v56, %v8033_v61  ;;  %v3026_v59 = vpop.f32.mrb[215].mxu0  ;;  %v9801_v17 = vpop.f32.mrb[215].mxu1  ;;  %v5718_v35 = vsel %vm4734_vm0, %v4679_v31, 0.0 }
 0x2a1   :  { %v4434_v9 = vmax.f32 %v3024_v18, 0.0  ;;  %v3027_v48 = vadd.f32 %v3026_v59, %v8033_v61  ;;  %v5715_v5 = vadd.f32 %v5714_v58, %v5713_v46  ;;  %v5722_v24 = vsel %vm4734_vm0, %v4681_v43, 0.0 }
 0x2a2   :  { %v5192_v34 = vsel %vm4734_vm0, %v4436_v7, 0.0  ;;  %v5187_v40 = vadd.f32 %v5186_v51, %v5185_v14  ;;  %v4437_v50 = vmax.f32 %v3035_v0, 0.0  ;;  %v4024_v18 = vadd.f32 %v9698_v54, %v8033_v61 }
 0x2a3   :  { %v5188_v1 = vsel %vm4734_vm0, %v4434_v9, 0.0  ;;  %v4435_v56 = vmax.f32 %v3027_v48, 0.0  ;;  %v5717_v33 = vadd.f32 %v5716_v28, %v5715_v5  ;;  %v4016_v41 = vadd.f32 %v9702_v60, %v8033_v61 }
 0x2a4   :  { %v5189_v30 = vadd.f32 %v5188_v1, %v5187_v40  ;;  %v4027_v58 = vadd.f32 %v9706_v22, %v8033_v61  ;;  %v4019_v14 = vadd.f32 %v9712_v27, %v8033_v61  ;;  %v4684_v54 = vmax.f32 %v4024_v18, 0.0 }
 0x2a5   :  { %v5190_v23 = vsel %vm4734_vm0, %v4435_v56, 0.0  ;;  %v6968_v7 = vpop.f32.mrb[216].mxu0  ;;  %v9820_v31 = vpop.f32.mrb[216].mxu1  ;;  %v5719_v46 = vadd.f32 %v5718_v35, %v5717_v33  ;;  %v5194_v9 = vsel %vm4734_vm0, %v4437_v50, 0.0  ;;  %v4682_v28 = vmax.f32 %v4016_v41, 0.0 }
 0x2a6   :  { %v5191_v0 = vadd.f32 %v5190_v23, %v5189_v30  ;;  %v3048_v43 = vadd.f32 %v6968_v7, %v8033_v61  ;;  %v3039_v59 = vpop.f32.mrb[217].mxu0  ;;  %v9823_v51 = vpop.f32.mrb[217].mxu1  ;;  %v4683_v22 = vmax.f32 %v4019_v14, 0.0  ;;  %v4685_v18 = vmax.f32 %v4027_v58, 0.0 }
 0x2a7   :  { %v3040_v60 = vadd.f32 %v3039_v59, %v8033_v61  ;;  %v6969_v48 = vpop.f32.mrb[218].mxu0  ;;  %v9827_v40 = vpop.f32.mrb[218].mxu1  ;;  %v5721_v30 = vadd.f32 %v5720_v11, %v5719_v46  ;;  %v5724_v50 = vsel %vm4734_vm0, %v4682_v28, 0.0  ;;  %v5143_v7 = vrot.slane %v9656_v15, 4 }
 0x2a8   :  { %v5193_v27 = vadd.f32 %v5192_v34, %v5191_v0  ;;  %v4440_v5 = vmax.f32 %v3048_v43, 0.0  ;;  %v3051_v1 = vadd.f32 %v6969_v48, %v8033_v61  ;;  %v3042_v56 = vpop.f32.mrb[219].mxu0  ;;  %v9830_v23 = vpop.f32.mrb[219].mxu1  ;;  %v5728_v14 = vsel %vm4734_vm0, %v4684_v54, 0.0 }
 0x2a9   :  { %v4438_v33 = vmax.f32 %v3040_v60, 0.0  ;;  %v3043_v35 = vadd.f32 %v3042_v56, %v8033_v61  ;;  %v5723_v59 = vadd.f32 %v5722_v24, %v5721_v30  ;;  %v5726_v11 = vsel %vm4734_vm0, %v4683_v22, 0.0 }
 0x2aa   :  { %v5195_v41 = vadd.f32 %v5194_v9, %v5193_v27  ;;  %v5200_v34 = vsel %vm4734_vm0, %v4440_v5, 0.0  ;;  %v4441_v60 = vmax.f32 %v3051_v1, 0.0  ;;  %v4040_v28 = vadd.f32 %v9729_v63, %v8033_v61 }
 0x2ab   :  { %v5196_v0 = vsel %vm4734_vm0, %v4438_v33, 0.0  ;;  %v4439_v43 = vmax.f32 %v3043_v35, 0.0  ;;  %v5725_v48 = vadd.f32 %v5724_v50, %v5723_v59  ;;  %v5730_v9 = vsel %vm4734_vm0, %v4685_v18, 0.0 }
 0x2ac   :  { %v5197_v46 = vadd.f32 %v5196_v0, %v5195_v41  ;;  %v4032_v24 = vadd.f32 %v9732_v39, %v8033_v61  ;;  %v4035_v54 = vadd.f32 %v9743_v16, %v8033_v61  ;;  %v4043_v63 = vadd.f32 %v9738_v12, %v8033_v61 }
 0x2ad   :  { %v5198_v58 = vsel %vm4734_vm0, %v4439_v43, 0.0  ;;  %v6972_v56 = vpop.f32.mrb[220].mxu0  ;;  %v9847_v27 = vpop.f32.mrb[220].mxu1  ;;  %v5727_v30 = vadd.f32 %v5726_v11, %v5725_v48  ;;  %v4688_v18 = vmax.f32 %v4040_v28, 0.0  ;;  %v5202_v16 = vsel %vm4734_vm0, %v4441_v60, 0.0 }
 0x2ae   :  { %v5199_v22 = vadd.f32 %v5198_v58, %v5197_v46  ;;  %v3064_v5 = vadd.f32 %v6972_v56, %v8033_v61  ;;  %v3055_v1 = vpop.f32.mrb[221].mxu0  ;;  %v9852_v33 = vpop.f32.mrb[221].mxu1  ;;  %v4686_v39 = vmax.f32 %v4032_v24, 0.0  ;;  %v4687_v41 = vmax.f32 %v4035_v54, 0.0 }
 0x2af   :  { %v3056_v35 = vadd.f32 %v3055_v1, %v8033_v61  ;;  %v6973_v50 = vpop.f32.mrb[222].mxu0  ;;  %v9855_v59 = vpop.f32.mrb[222].mxu1  ;;  %v5729_v11 = vadd.f32 %v5728_v14, %v5727_v30  ;;  %v9864_v28 = vadd.f32 %v5143_v7, %v9656_v15  ;;  %v4689_v19 = vmax.f32 %v4043_v63, 0.0 }
 0x2b0   :  { %v5201_v0 = vadd.f32 %v5200_v34, %v5199_v22  ;;  %v3067_v43 = vadd.f32 %v6973_v50, %v8033_v61  ;;  %v3058_v46 = vpop.f32.mrb[223].mxu0  ;;  %v9859_v48 = vpop.f32.mrb[223].mxu1  ;;  %v4444_v12 = vmax.f32 %v3064_v5, 0.0  ;;  %v5732_v1 = vsel %vm4734_vm0, %v4686_v39, 0.0 }
 0x2b1   :  { %v4442_v58 = vmax.f32 %v3056_v35, 0.0  ;;  %v3059_v56 = vadd.f32 %v3058_v46, %v8033_v61  ;;  %v5731_v54 = vadd.f32 %v5730_v9, %v5729_v11  ;;  %v5736_v22 = vsel %vm4734_vm0, %v4688_v18, 0.0 }
 0x2b2   :  { %v5203_v24 = vadd.f32 %v5202_v16, %v5201_v0  ;;  %v5734_v14 = vsel %vm4734_vm0, %v4687_v41, 0.0  ;;  %v4445_v5 = vmax.f32 %v3067_v43, 0.0  ;;  %v4056_v50 = vadd.f32 %v9758_v3, %v8033_v61 }
 0x2b3   :  { %v5204_v34 = vsel %vm4734_vm0, %v4442_v58, 0.0  ;;  %v4443_v60 = vmax.f32 %v3059_v56, 0.0  ;;  %v5733_v35 = vadd.f32 %v5732_v1, %v5731_v54  ;;  %v5208_v39 = vsel %vm4734_vm0, %v4444_v12, 0.0 }
 0x2b4   :  { %v5205_v30 = vadd.f32 %v5204_v34, %v5203_v24  ;;  %v4048_v9 = vadd.f32 %v9762_v8, %v8033_v61  ;;  %v4051_v63 = vadd.f32 %v9771_v6, %v8033_v61  ;;  %v5738_v0 = vsel %vm4734_vm0, %v4689_v19, 0.0 }
 0x2b5   :  { %v5206_v15 = vsel %vm4734_vm0, %v4443_v60, 0.0  ;;  %v6976_v7 = vpop.f32.mrb[224].mxu0  ;;  %v9877_v18 = vpop.f32.mrb[224].mxu1  ;;  %v5735_v43 = vadd.f32 %v5734_v14, %v5733_v35  ;;  %v4059_v3 = vadd.f32 %v9767_v29, %v8033_v61  ;;  %v5210_v1 = vsel %vm4734_vm0, %v4445_v5, 0.0 }
 0x2b6   :  { %v5207_v41 = vadd.f32 %v5206_v15, %v5205_v30  ;;  %v3071_v16 = vpop.f32.mrb[225].mxu0  ;;  %v9882_v46 = vpop.f32.mrb[225].mxu1  ;;  %v3080_v11 = vadd.f32 %v6976_v7, %v8033_v61  ;;  %v4690_v58 = vmax.f32 %v4048_v9, 0.0  ;;  %v4691_v56 = vmax.f32 %v4051_v63, 0.0 }
 0x2b7   :  { %v3072_v12 = vadd.f32 %v3071_v16, %v8033_v61  ;;  %v6977_v8 = vpop.f32.mrb[226].mxu0  ;;  %v9886_v6 = vpop.f32.mrb[226].mxu1  ;;  %v5737_v19 = vadd.f32 %v5736_v22, %v5735_v43  ;;  %v4692_v34 = vmax.f32 %v4056_v50, 0.0  ;;  %v10379_v15 = vrot.slane %v9627_v47, 1 }
 0x2b8   :  { %v5209_v24 = vadd.f32 %v5208_v39, %v5207_v41  ;;  %v3074_v54 = vpop.f32.mrb[227].mxu0  ;;  %v9889_v60 = vpop.f32.mrb[227].mxu1  ;;  %v3083_v14 = vadd.f32 %v6977_v8, %v8033_v61  ;;  %v5740_v35 = vsel %vm4734_vm0, %v4690_v58, 0.0  ;;  %v4448_v50 = vmax.f32 %v3080_v11, 0.0 }
 0x2b9   :  { %v4446_v29 = vmax.f32 %v3072_v12, 0.0  ;;  %v3075_v30 = vadd.f32 %v3074_v54, %v8033_v61  ;;  %v9897_v7 = vadd.f32 %v10379_v15, %v9627_v47  ;;  %v5739_v22 = vadd.f32 %v5738_v0, %v5737_v19 }
 0x2ba   :  { %v9900_v39 = vadd.f32 %v5210_v1, %v5209_v24  ;;  %v4693_v63 = vmax.f32 %v4059_v3, 0.0  ;;  %v5742_v41 = vsel %vm4734_vm0, %v4691_v56, 0.0  ;;  %v5744_v43 = vsel %vm4734_vm0, %v4692_v34, 0.0 }
 0x2bb   :  { %v4447_v9 = vmax.f32 %v3075_v30, 0.0  ;;  %v5741_v12 = vadd.f32 %v5740_v35, %v5739_v22  ;;  %v4072_v8 = vadd.f32 %v9792_v20, %v8033_v61  ;;  %v5218_v47 = vsel %vm4734_vm0, %v4446_v29, 0.0 }
 0x2bc   :  { %v4449_v58 = vmax.f32 %v3083_v14, 0.0  ;;  %v4064_v0 = vadd.f32 %v9795_v13, %v8033_v61  ;;  %v4075_v34 = vadd.f32 %v9798_v45, %v8033_v61  ;;  %v5221_v29 = vsel %vm4734_vm0, %v4448_v50, 0.0 }
 0x2bd   :  { %v5219_v1 = vsel %vm4734_vm0, %v4447_v9, 0.0  ;;  %v6980_v24 = vpop.f32.mrb[228].mxu0  ;;  %v9911_v3 = vpop.f32.mrb[228].mxu1  ;;  %v5743_v19 = vadd.f32 %v5742_v41, %v5741_v12  ;;  %v5746_v35 = vsel %vm4734_vm0, %v4693_v63, 0.0  ;;  %v4696_v41 = vmax.f32 %v4072_v8, 0.0 }
 0x2be   :  { %v5220_v11 = vadd.f32 %v5219_v1, %v5218_v47  ;;  %v3096_v56 = vadd.f32 %v6980_v24, %v8033_v61  ;;  %v3087_v54 = vpop.f32.mrb[229].mxu0  ;;  %v9916_v20 = vpop.f32.mrb[229].mxu1  ;;  %v4694_v13 = vmax.f32 %v4064_v0, 0.0  ;;  %v4067_v45 = vadd.f32 %v9801_v17, %v8033_v61 }
 0x2bf   :  { %v3088_v14 = vadd.f32 %v3087_v54, %v8033_v61  ;;  %v6981_v30 = vpop.f32.mrb[230].mxu0  ;;  %v9921_v15 = vpop.f32.mrb[230].mxu1  ;;  %v5223_v50 = vsel %vm4734_vm0, %v4449_v58, 0.0  ;;  %v5745_v54 = vadd.f32 %v5744_v43, %v5743_v19  ;;  %v5212_v63 = vrot.slane %v9900_v39, 4 }
 0x2c0   :  { %v5222_v22 = vadd.f32 %v5221_v29, %v5220_v11  ;;  %v3099_v9 = vadd.f32 %v6981_v30, %v8033_v61  ;;  %v3090_v47 = vpop.f32.mrb[231].mxu0  ;;  %v9926_v12 = vpop.f32.mrb[231].mxu1  ;;  %v4452_v0 = vmax.f32 %v3096_v56, 0.0  ;;  %v4697_v11 = vmax.f32 %v4075_v34, 0.0 }
 0x2c1   :  { %v4450_v1 = vmax.f32 %v3088_v14, 0.0  ;;  %v3091_v24 = vadd.f32 %v3090_v47, %v8033_v61  ;;  %v5747_v8 = vadd.f32 %v5746_v35, %v5745_v54  ;;  %v5748_v5 = vsel %vm4734_vm0, %v4694_v13, 0.0 }
 0x2c2   :  { %v5224_v16 = vadd.f32 %v5223_v50, %v5222_v22  ;;  %v4453_v38 = vmax.f32 %v3099_v9, 0.0  ;;  %v5752_v25 = vsel %vm4734_vm0, %v4696_v41, 0.0  ;;  %v4695_v58 = vmax.f32 %v4067_v45, 0.0 }
 0x2c3   :  { %v5225_v29 = vsel %vm4734_vm0, %v4450_v1, 0.0  ;;  %v4451_v30 = vmax.f32 %v3091_v24, 0.0  ;;  %v5749_v43 = vadd.f32 %v5748_v5, %v5747_v8  ;;  %v4088_v56 = vadd.f32 %v9820_v31, %v8033_v61 }
 0x2c4   :  { %v5226_v17 = vadd.f32 %v5225_v29, %v5224_v16  ;;  %v4080_v19 = vadd.f32 %v9823_v51, %v8033_v61  ;;  %v5229_v35 = vsel %vm4734_vm0, %v4452_v0, 0.0  ;;  %v5750_v9 = vsel %vm4734_vm0, %v4695_v58, 0.0 }
 0x2c5   :  { %v5227_v14 = vsel %vm4734_vm0, %v4451_v30, 0.0  ;;  %v6984_v47 = vpop.f32.mrb[232].mxu0  ;;  %v9939_v34 = vpop.f32.mrb[232].mxu1  ;;  %v5754_v31 = vsel %vm4734_vm0, %v4697_v11, 0.0  ;;  %v5751_v50 = vadd.f32 %v5750_v9, %v5749_v43  ;;  %v4700_v29 = vmax.f32 %v4088_v56, 0.0 }
 0x2c6   :  { %v5228_v13 = vadd.f32 %v5227_v14, %v5226_v17  ;;  %v3112_v16 = vadd.f32 %v6984_v47, %v8033_v61  ;;  %v3103_v22 = vpop.f32.mrb[233].mxu0  ;;  %v9944_v41 = vpop.f32.mrb[233].mxu1  ;;  %v4698_v1 = vmax.f32 %v4080_v19, 0.0  ;;  %v4091_v30 = vadd.f32 %v9827_v40, %v8033_v61 }
 0x2c7   :  { %v3104_v5 = vadd.f32 %v3103_v22, %v8033_v61  ;;  %v6985_v45 = vpop.f32.mrb[234].mxu0  ;;  %v9948_v51 = vpop.f32.mrb[234].mxu1  ;;  %v5231_v17 = vsel %vm4734_vm0, %v4453_v38, 0.0  ;;  %v5753_v11 = vadd.f32 %v5752_v25, %v5751_v50  ;;  %v9958_v47 = vadd.f32 %v5212_v63, %v9900_v39 }
 0x2c8   :  { %v5230_v24 = vadd.f32 %v5229_v35, %v5228_v13  ;;  %v3115_v54 = vadd.f32 %v6985_v45, %v8033_v61  ;;  %v3106_v0 = vpop.f32.mrb[235].mxu0  ;;  %v9953_v8 = vpop.f32.mrb[235].mxu1  ;;  %v4456_v43 = vmax.f32 %v3112_v16, 0.0  ;;  %v5756_v35 = vsel %vm4734_vm0, %v4698_v1, 0.0 }
 0x2c9   :  { %v4454_v58 = vmax.f32 %v3104_v5, 0.0  ;;  %v3107_v14 = vadd.f32 %v3106_v0, %v8033_v61  ;;  %v5755_v40 = vadd.f32 %v5754_v31, %v5753_v11  ;;  %v5760_v45 = vsel %vm4734_vm0, %v4700_v29, 0.0 }
 0x2ca   :  { %v5232_v19 = vadd.f32 %v5231_v17, %v5230_v24  ;;  %v4457_v13 = vmax.f32 %v3115_v54, 0.0  ;;  %v4701_v38 = vmax.f32 %v4091_v30, 0.0  ;;  %v4083_v5 = vadd.f32 %v9830_v23, %v8033_v61 }
 0x2cb   :  { %v5233_v56 = vsel %vm4734_vm0, %v4454_v58, 0.0  ;;  %v4455_v22 = vmax.f32 %v3107_v14, 0.0  ;;  %v5757_v63 = vadd.f32 %v5756_v35, %v5755_v40  ;;  %v4104_v16 = vadd.f32 %v9847_v27, %v8033_v61 }
 0x2cc   :  { %v5234_v9 = vadd.f32 %v5233_v56, %v5232_v19  ;;  %v4096_v50 = vadd.f32 %v9852_v33, %v8033_v61  ;;  %v5237_v31 = vsel %vm4734_vm0, %v4456_v43, 0.0  ;;  %v4699_v29 = vmax.f32 %v4083_v5, 0.0 }
 0x2cd   :  { %v5235_v25 = vsel %vm4734_vm0, %v4455_v22, 0.0  ;;  %v6988_v39 = vpop.f32.mrb[236].mxu0  ;;  %v9970_v1 = vpop.f32.mrb[236].mxu1  ;;  %v5239_v30 = vsel %vm4734_vm0, %v4457_v13, 0.0  ;;  %v4107_v33 = vadd.f32 %v9855_v59, %v8033_v61  ;;  %v4099_v56 = vadd.f32 %v9859_v48, %v8033_v61 }
 0x2ce   :  { %v5236_v24 = vadd.f32 %v5235_v25, %v5234_v9  ;;  %v3128_v54 = vadd.f32 %v6988_v39, %v8033_v61  ;;  %v3119_v0 = vpop.f32.mrb[237].mxu0  ;;  %v9974_v23 = vpop.f32.mrb[237].mxu1  ;;  %v4702_v27 = vmax.f32 %v4096_v50, 0.0  ;;  %v5758_v35 = vsel %vm4734_vm0, %v4699_v29, 0.0 }
 0x2cf   :  { %v3120_v17 = vadd.f32 %v3119_v0, %v8033_v61  ;;  %v6989_v58 = vpop.f32.mrb[238].mxu0  ;;  %v9980_v14 = vpop.f32.mrb[238].mxu1  ;;  %v5759_v9 = vadd.f32 %v5758_v35, %v5757_v63  ;;  %v4704_v5 = vmax.f32 %v4104_v16, 0.0  ;;  %v5214_v59 = vrot.slane %v9958_v47, 2 }
 0x2d0   :  { %v5238_v11 = vadd.f32 %v5237_v31, %v5236_v24  ;;  %v3131_v43 = vadd.f32 %v6989_v58, %v8033_v61  ;;  %v3122_v19 = vpop.f32.mrb[239].mxu0  ;;  %v9986_v22 = vpop.f32.mrb[239].mxu1  ;;  %v4460_v25 = vmax.f32 %v3128_v54, 0.0  ;;  %v5762_v50 = vsel %vm4734_vm0, %v4701_v38, 0.0 }
 0x2d1   :  { %v4458_v13 = vmax.f32 %v3120_v17, 0.0  ;;  %v3123_v40 = vadd.f32 %v3122_v19, %v8033_v61  ;;  %v5761_v0 = vadd.f32 %v5760_v45, %v5759_v9  ;;  %v4705_v29 = vmax.f32 %v4107_v33, 0.0 }
 0x2d2   :  { %v5240_v39 = vadd.f32 %v5239_v30, %v5238_v11  ;;  %v4461_v48 = vmax.f32 %v3131_v43, 0.0  ;;  %v5770_v62 = vsel %vm4734_vm0, %v4702_v27, 0.0  ;;  %v4703_v17 = vmax.f32 %v4099_v56, 0.0 }
 0x2d3   :  { %v5241_v31 = vsel %vm4734_vm0, %v4458_v13, 0.0  ;;  %v4459_v24 = vmax.f32 %v3123_v40, 0.0  ;;  %v9994_v16 = vadd.f32 %v5762_v50, %v5761_v0  ;;  %v5773_v54 = vsel %vm4734_vm0, %v4704_v5, 0.0 }
 0x2d4   :  { %v5242_v58 = vadd.f32 %v5241_v31, %v5240_v39  ;;  %v4112_v38 = vadd.f32 %v9882_v46, %v8033_v61  ;;  %v5245_v45 = vsel %vm4734_vm0, %v4460_v25, 0.0  ;;  %v5771_v43 = vsel %vm4734_vm0, %v4703_v17, 0.0 }
 0x2d5   :  { %v5243_v19 = vsel %vm4734_vm0, %v4459_v24, 0.0  ;;  %v6992_v63 = vpop.f32.mrb[240].mxu0  ;;  %v9999_v30 = vpop.f32.mrb[240].mxu1  ;;  %v4120_v27 = vadd.f32 %v9877_v18, %v8033_v61  ;;  %v5772_v9 = vadd.f32 %v5771_v43, %v5770_v62  ;;  %v5247_v25 = vsel %vm4734_vm0, %v4461_v48, 0.0 }
 0x2d6   :  { %v5244_v33 = vadd.f32 %v5243_v19, %v5242_v58  ;;  %v3135_v11 = vpop.f32.mrb[241].mxu0  ;;  %v10005_v35 = vpop.f32.mrb[241].mxu1  ;;  %v3144_v56 = vadd.f32 %v6992_v63, %v8033_v61  ;;  %v4706_v46 = vmax.f32 %v4112_v38, 0.0  ;;  %v5775_v31 = vsel %vm4734_vm0, %v4705_v29, 0.0 }
 0x2d7   :  { %v3136_v13 = vadd.f32 %v3135_v11, %v8033_v61  ;;  %v6993_v40 = vpop.f32.mrb[242].mxu0  ;;  %v10009_v5 = vpop.f32.mrb[242].mxu1  ;;  %v4123_v18 = vadd.f32 %v9886_v6, %v8033_v61  ;;  %v5774_v62 = vadd.f32 %v5773_v54, %v5772_v9  ;;  %v10380_v19 = vrot.slane %v9776_v52, 1 }
 0x2d8   :  { %v5246_v39 = vadd.f32 %v5245_v45, %v5244_v33  ;;  %v3138_v50 = vpop.f32.mrb[243].mxu0  ;;  %v10015_v24 = vpop.f32.mrb[243].mxu1  ;;  %v3147_v58 = vadd.f32 %v6993_v40, %v8033_v61  ;;  %v4708_v38 = vmax.f32 %v4120_v27, 0.0  ;;  %v5777_v29 = vsel %vm4734_vm0, %v4706_v46, 0.0 }
 0x2d9   :  { %v4462_v0 = vmax.f32 %v3136_v13, 0.0  ;;  %v3139_v17 = vadd.f32 %v3138_v50, %v8033_v61  ;;  %v10022_v63 = vadd.f32 %v10380_v19, %v9776_v52  ;;  %v4464_v45 = vmax.f32 %v3144_v56, 0.0 }
 0x2da   :  { %v5248_v48 = vadd.f32 %v5247_v25, %v5246_v39  ;;  %v5776_v11 = vadd.f32 %v5775_v31, %v5774_v62  ;;  %v10381_v43 = vrot.slane %v9864_v28, 2  ;;  %v10032_v54 = vadd.f32 %v5214_v59, %v9958_v47 }
 0x2db   :  { %v5249_v6 = vsel %vm4734_vm0, %v4462_v0, 0.0  ;;  %v4463_v33 = vmax.f32 %v3139_v17, 0.0  ;;  %v4115_v52 = vadd.f32 %v9889_v60, %v8033_v61  ;;  %v4465_v27 = vmax.f32 %v3147_v58, 0.0 }
 0x2dc   :  { %v10029_v13 = vadd.f32 %v10381_v43, %v9864_v28  ;;  %v5250_v40 = vadd.f32 %v5249_v6, %v5248_v48  ;;  %v5778_v46 = vadd.f32 %v5777_v29, %v5776_v11  ;;  %v4709_v25 = vmax.f32 %v4123_v18, 0.0 }
 0x2dd   :  { %v5251_v9 = vsel %vm4734_vm0, %v4463_v33, 0.0  ;;  %v6996_v56 = vpop.f32.mrb[244].mxu0  ;;  %v10037_v39 = vpop.f32.mrb[244].mxu1  ;;  %v4707_v0 = vmax.f32 %v4115_v52, 0.0  ;;  %v4136_v47 = vadd.f32 %v9911_v3, %v8033_v61  ;;  %v5253_v60 = vsel %vm4734_vm0, %v4464_v45, 0.0 }
 0x2de   :  { %v5252_v50 = vadd.f32 %v5251_v9, %v5250_v40  ;;  %v3160_v31 = vadd.f32 %v6996_v56, %v8033_v61  ;;  %v3151_v28 = vpop.f32.mrb[245].mxu0  ;;  %v10042_v59 = vpop.f32.mrb[245].mxu1  ;;  %v5781_v62 = vsel %vm4734_vm0, %v4708_v38, 0.0  ;;  %v4128_v18 = vadd.f32 %v9916_v20, %v8033_v61 }
 0x2df   :  { %v3152_v58 = vadd.f32 %v3151_v28, %v8033_v61  ;;  %v6997_v17 = vpop.f32.mrb[246].mxu0  ;;  %v10049_v19 = vpop.f32.mrb[246].mxu1  ;;  %v5779_v3 = vsel %vm4734_vm0, %v4707_v0, 0.0  ;;  %v5255_v45 = vsel %vm4734_vm0, %v4465_v27, 0.0  ;;  %v5783_v9 = vsel %vm4734_vm0, %v4709_v25, 0.0 }
 0x2e0   :  { %v5254_v48 = vadd.f32 %v5253_v60, %v5252_v50  ;;  %v4468_v29 = vmax.f32 %v3160_v31, 0.0  ;;  %v3163_v6 = vadd.f32 %v6997_v17, %v8033_v61  ;;  %v3154_v33 = vpop.f32.mrb[247].mxu0  ;;  %v10053_v11 = vpop.f32.mrb[247].mxu1  ;;  %v5780_v38 = vadd.f32 %v5779_v3, %v5778_v46 }
 0x2e1   :  { %v4466_v43 = vmax.f32 %v3152_v58, 0.0  ;;  %v3155_v40 = vadd.f32 %v3154_v33, %v8033_v61  ;;  %v4712_v56 = vmax.f32 %v4136_v47, 0.0  ;;  %v4710_v60 = vmax.f32 %v4128_v18, 0.0 }
 0x2e2   :  { %v5261_v52 = vsel %vm4734_vm0, %v4468_v29, 0.0  ;;  %v5256_v20 = vadd.f32 %v5255_v45, %v5254_v48  ;;  %v5782_v28 = vadd.f32 %v5781_v62, %v5780_v38  ;;  %v4469_v17 = vmax.f32 %v3163_v6, 0.0 }
 0x2e3   :  { %v5257_v50 = vsel %vm4734_vm0, %v4466_v43, 0.0  ;;  %v4467_v31 = vmax.f32 %v3155_v40, 0.0  ;;  %v4139_v27 = vadd.f32 %v9921_v15, %v8033_v61  ;;  %v4131_v58 = vadd.f32 %v9926_v12, %v8033_v61 }
 0x2e4   :  { %v5258_v0 = vadd.f32 %v5257_v50, %v5256_v20  ;;  %v5784_v48 = vadd.f32 %v5783_v9, %v5782_v28  ;;  %v5785_v25 = vsel %vm4734_vm0, %v4710_v60, 0.0  ;;  %v4152_v47 = vadd.f32 %v9939_v34, %v8033_v61 }
 0x2e5   :  { %v5259_v46 = vsel %vm4734_vm0, %v4467_v31, 0.0  ;;  %v7000_v29 = vpop.f32.mrb[248].mxu0  ;;  %v10068_v33 = vpop.f32.mrb[248].mxu1  ;;  %v4713_v3 = vmax.f32 %v4139_v27, 0.0  ;;  %v4711_v15 = vmax.f32 %v4131_v58, 0.0  ;;  %v5789_v40 = vsel %vm4734_vm0, %v4712_v56, 0.0 }
 0x2e6   :  { %v5260_v62 = vadd.f32 %v5259_v46, %v5258_v0  ;;  %v3176_v18 = vadd.f32 %v7000_v29, %v8033_v61  ;;  %v3167_v6 = vpop.f32.mrb[249].mxu0  ;;  %v10071_v45 = vpop.f32.mrb[249].mxu1  ;;  %v5786_v38 = vadd.f32 %v5785_v25, %v5784_v48  ;;  %v4144_v20 = vadd.f32 %v9944_v41, %v8033_v61 }
 0x2e7   :  { %v3168_v12 = vadd.f32 %v3167_v6, %v8033_v61  ;;  %v7001_v43 = vpop.f32.mrb[250].mxu0  ;;  %v10077_v34 = vpop.f32.mrb[250].mxu1  ;;  %v5263_v9 = vsel %vm4734_vm0, %v4469_v17, 0.0  ;;  %v4716_v60 = vmax.f32 %v4152_v47, 0.0  ;;  %v5787_v56 = vsel %vm4734_vm0, %v4711_v15, 0.0 }
 0x2e8   :  { %v5262_v50 = vadd.f32 %v5261_v52, %v5260_v62  ;;  %v3179_v31 = vadd.f32 %v7001_v43, %v8033_v61  ;;  %v3170_v28 = vpop.f32.mrb[251].mxu0  ;;  %v10081_v0 = vpop.f32.mrb[251].mxu1  ;;  %v4472_v27 = vmax.f32 %v3176_v18, 0.0  ;;  %v5791_v41 = vsel %vm4734_vm0, %v4713_v3, 0.0 }
 0x2e9   :  { %v4470_v58 = vmax.f32 %v3168_v12, 0.0  ;;  %v3171_v46 = vadd.f32 %v3170_v28, %v8033_v61  ;;  %v5788_v25 = vadd.f32 %v5787_v56, %v5786_v38  ;;  %v4714_v62 = vmax.f32 %v4144_v20, 0.0 }
 0x2ea   :  { %v5264_v29 = vadd.f32 %v5263_v9, %v5262_v50  ;;  %v4473_v48 = vmax.f32 %v3179_v31, 0.0  ;;  %v4155_v47 = vadd.f32 %v9948_v51, %v8033_v61  ;;  %v5147_v6 = vrot.slane %v10029_v13, 1 }
 0x2eb   :  { %v5265_v17 = vsel %vm4734_vm0, %v4470_v58, 0.0  ;;  %v4471_v52 = vmax.f32 %v3171_v46, 0.0  ;;  %v5790_v12 = vadd.f32 %v5789_v40, %v5788_v25  ;;  %v4147_v43 = vadd.f32 %v9953_v8, %v8033_v61 }
 0x2ec   :  { %v5266_v18 = vadd.f32 %v5265_v17, %v5264_v29  ;;  %v5269_v15 = vsel %vm4734_vm0, %v4472_v27, 0.0  ;;  %v5797_v38 = vsel %vm4734_vm0, %v4716_v60, 0.0  ;;  %v5793_v50 = vsel %vm4734_vm0, %v4714_v62, 0.0 }
 0x2ed   :  { %v5267_v9 = vsel %vm4734_vm0, %v4471_v52, 0.0  ;;  %v7004_v3 = vpop.f32.mrb[252].mxu0  ;;  %v5792_v28 = vadd.f32 %v5791_v41, %v5790_v12  ;;  %v4715_v58 = vmax.f32 %v4147_v43, 0.0  ;;  %v5271_v40 = vsel %vm4734_vm0, %v4473_v48, 0.0 }
 0x2ee   :  { %v5268_v20 = vadd.f32 %v5267_v9, %v5266_v18  ;;  %v3192_v31 = vadd.f32 %v7004_v3, %v8033_v61  ;;  %v3183_v51 = vpop.f32.mrb[253].mxu0  ;;  %v4717_v56 = vmax.f32 %v4155_v47, 0.0  ;;  %v5216_v27 = vrot.slane %v10032_v54, 1 }
 0x2ef   :  { %v3184_v46 = vadd.f32 %v3183_v51, %v8033_v61  ;;  %v7005_v8 = vpop.f32.mrb[254].mxu0  ;;  %v5794_v17 = vadd.f32 %v5793_v50, %v5792_v28  ;;  %v5795_v41 = vsel %vm4734_vm0, %v4715_v58, 0.0  ;;  %v5148_v18 = vadd.f32 %v5147_v6, %v10029_v13 }
 0x2f0   :  { %v5270_v29 = vadd.f32 %v5269_v15, %v5268_v20  ;;  %v3195_v25 = vadd.f32 %v7005_v8, %v8033_v61  ;;  %v3186_v60 = vpop.f32.mrb[255].mxu0  ;;  %v4476_v48 = vmax.f32 %v3192_v31, 0.0  ;;  %v5217_v47 = vadd.f32 %v5216_v27, %v10032_v54 }
 0x2f1   :  { %v4474_v52 = vmax.f32 %v3184_v46, 0.0  ;;  %v3187_v62 = vadd.f32 %v3186_v60, %v8033_v61  ;;  %v5796_v43 = vadd.f32 %v5795_v41, %v5794_v17  ;;  %v5860_v3 = vsel %vm5859_vm1, %v9654_v44, %v9438_v2 }
 0x2f2   :  { %v5272_v12 = vadd.f32 %v5271_v40, %v5270_v29  ;;  %v4477_v20 = vmax.f32 %v3195_v25, 0.0  ;;  %v5862_v28 = vsel %vm5861_vm2, %v9660_v37, %v5860_v3  ;;  %v5277_v54 = vsel %vm4734_vm0, %v4476_v48, 0.0 }
 0x2f3   :  { %v5273_v9 = vsel %vm4734_vm0, %v4474_v52, 0.0  ;;  %v4475_v15 = vmax.f32 %v3187_v62, 0.0  ;;  %v5798_v51 = vadd.f32 %v5797_v38, %v5796_v43  ;;  %v5864_v2 = vsel %vm5863_vm3, %v9897_v7, %v5862_v28 }
 0x2f4   :  { %v5274_v50 = vadd.f32 %v5273_v9, %v5272_v12  ;;  %v5866_v37 = vsel %vm5865_vm4, %v10022_v63, %v5864_v2  ;;  %v4168_v46 = vadd.f32 %v9970_v1, %v8033_v61  ;;  %v5799_v25 = vsel %vm4734_vm0, %v4717_v56, 0.0 }
 0x2f5   :  { %v5275_v13 = vsel %vm4734_vm0, %v4475_v15, 0.0  ;;  %v7008_v6 = vpop.f32.mrb[0].mxu0  ;;  %v5868_v7 = vsel %vm5867_vm5, %v5148_v18, %v5866_v37  ;;  %v5279_v60 = vsel %vm4734_vm0, %v4477_v20, 0.0  ;;  %v10382_v63 = vmax.f32 %v8859_v10, 0.0 }
 0x2f6   :  { %v5276_v31 = vadd.f32 %v5275_v13, %v5274_v50  ;;  %v3199_v58 = vpop.f32.mrb[1].mxu0  ;;  %v3208_v44 = vadd.f32 %v7008_v6, %v8033_v61  ;;  %v5870_v62 = vsel %vm5869_vm6, %v5217_v47, %v5868_v7  ;;  %v4483_v1 = vmax.f32 %v9121_v42, 0.0 }
 0x2f7   :  { %v3200_v38 = vadd.f32 %v3199_v58, %v8033_v61  ;;  %v7009_v40 = vpop.f32.mrb[2].mxu0  ;;  %v5294_v41 = vsel %vm4734_vm0, %v10382_v63, 0.0  ;;  %v4160_v12 = vadd.f32 %v9974_v23, %v8033_v61  ;;  %v4720_v18 = vmax.f32 %v4168_v46, 0.0 }
 0x2f8   :  { %v5278_v8 = vadd.f32 %v5277_v54, %v5276_v31  ;;  %v3211_v27 = vadd.f32 %v7009_v40, %v8033_v61  ;;  %v3202_v29 = vpop.f32.mrb[3].mxu0  ;;  %v4480_v56 = vmax.f32 %v3208_v44, 0.0  ;;  %v5800_v9 = vadd.f32 %v5799_v25, %v5798_v51 }
 0x2f9   :  { %v4478_v17 = vmax.f32 %v3200_v38, 0.0  ;;  %v3203_v52 = vadd.f32 %v3202_v29, %v8033_v61  ;;  %v4718_v50 = vmax.f32 %v4160_v12, 0.0  ;;  %v4171_v47 = vadd.f32 %v9980_v14, %v8033_v61 }
 0x2fa   :  { %v5280_v48 = vadd.f32 %v5279_v60, %v5278_v8  ;;  %v4481_v3 = vmax.f32 %v3211_v27, 0.0  ;;  %v4163_v42 = vadd.f32 %v9986_v22, %v8033_v61  ;;  %v4176_v23 = vadd.f32 %v10005_v35, %v8033_v61 }
 0x2fb   :  { %v4479_v43 = vmax.f32 %v3203_v52, 0.0  ;;  %v5287_v10 = vsel %vm4734_vm0, %v4478_v17, 0.0  ;;  %v5296_v28 = vsel %vm4734_vm0, %v4483_v1, 0.0  ;;  %v5801_v6 = vsel %vm4734_vm0, %v4718_v50, 0.0 }
 0x2fc   :  { %v5281_v15 = vrot.slane %v5280_v48, 4  ;;  %v5290_v54 = vsel %vm4734_vm0, %v4480_v56, 0.0  ;;  %v5802_v31 = vadd.f32 %v5801_v6, %v5800_v9  ;;  %v4721_v14 = vmax.f32 %v4171_v47, 0.0 }
 0x2fd   :  { %v5288_v20 = vsel %vm4734_vm0, %v4479_v43, 0.0  ;;  %v4719_v58 = vmax.f32 %v4163_v42, 0.0  ;;  %v5292_v2 = vsel %vm4734_vm0, %v4481_v3, 0.0  ;;  %v5805_v22 = vsel %vm4734_vm0, %v4720_v18, 0.0 }
 0x2fe   :  { %v5282_v13 = vadd.f32 %v5281_v15, %v5280_v48  ;;  %v5289_v51 = vadd.f32 %v5288_v20, %v5287_v10  ;;  %v4184_v35 = vadd.f32 %v9999_v30, %v8033_v61  ;;  %v4722_v37 = vmax.f32 %v4176_v23, 0.0 }
 0x2ff   :  { %v5803_v40 = vsel %vm4734_vm0, %v4719_v58, 0.0  ;;  %v4179_v46 = vadd.f32 %v10015_v24, %v8033_v61  ;;  %v3232_v8 = vadd.f32 %v8069_v26, %v8033_v61  ;;  %v3240_v7 = vadd.f32 %v8061_v21, %v8033_v61 }
 0x300   :  { %v5291_v44 = vadd.f32 %v5290_v54, %v5289_v51  ;;  %v5283_v38 = vrot.slane %v5282_v13, 2  ;;  %v5804_v25 = vadd.f32 %v5803_v40, %v5802_v31  ;;  %v5807_v60 = vsel %vm4734_vm0, %v4721_v14, 0.0 }
 0x301   :  { %v4187_v17 = vadd.f32 %v10009_v5, %v8033_v61  ;;  %v4723_v52 = vmax.f32 %v4179_v46, 0.0  ;;  %v3235_v30 = vadd.f32 %v8082_v36, %v8033_v61  ;;  %v4724_v26 = vmax.f32 %v4184_v35, 0.0 }
 0x302   :  { %v5293_v27 = vadd.f32 %v5292_v2, %v5291_v44  ;;  %v5284_v29 = vadd.f32 %v5283_v38, %v5282_v13  ;;  %v5806_v1 = vadd.f32 %v5805_v22, %v5804_v25  ;;  %v5809_v48 = vsel %vm4734_vm0, %v4722_v37, 0.0 }
 0x303   :  { %v4192_v12 = vadd.f32 %v10042_v59, %v8033_v61  ;;  %v4486_v21 = vmax.f32 %v3232_v8, 0.0  ;;  %v3243_v5 = vadd.f32 %v8077_v32, %v8033_v61  ;;  %v4725_v9 = vmax.f32 %v4187_v17, 0.0  ;;  %v10384_v8 = vld [vmem:[#allocation6_spill] sm:$0xff] }
 0x304   :  { %v5295_v63 = vadd.f32 %v5294_v41, %v5293_v27  ;;  %v5285_v24 = vrot.slane %v5284_v29, 1  ;;  %v5808_v18 = vadd.f32 %v5807_v60, %v5806_v1  ;;  %v5811_v36 = vsel %vm4734_vm0, %v4723_v52, 0.0 }
 0x305   :  { %v4195_v41 = vadd.f32 %v10053_v11, %v8033_v61  ;;  %v4487_v15 = vmax.f32 %v3235_v30, 0.0  ;;  %v10383_v59 = vmax.f32 %v8863_v53, 0.0  ;;  %v5813_v32 = vsel %vm4734_vm0, %v4724_v26, 0.0 }
 0x306   :  { %v5297_v56 = vadd.f32 %v5296_v28, %v5295_v63  ;;  %v5286_v43 = vadd.f32 %v5285_v24, %v5284_v29  ;;  %v5810_v47 = vadd.f32 %v5809_v48, %v5808_v18  ;;  %v4200_v20 = vadd.f32 %v10037_v39, %v8033_v61 }
 0x307   :  { %v5300_v10 = vsel %vm4734_vm0, %v10383_v59, 0.0  ;;  %v4726_v42 = vmax.f32 %v4192_v12, 0.0  ;;  %v4488_v23 = vmax.f32 %v3240_v7, 0.0  ;;  %v3248_v11 = vadd.f32 %v8097_v55, %v8033_v61 }
 0x308   :  { %v5299_v3 = vadd.f32 %v9205_v57, %v5297_v56  ;;  %v5872_v50 = vsel %vm5871_vm7, %v5286_v43, %v5870_v62  ;;  %v5812_v28 = vadd.f32 %v5811_v36, %v5810_v47  ;;  %v5302_v62 = vsel %vm4734_vm0, %v4486_v21, 0.0  ;;  %v10386_v43 = vld [vmem:[#allocation10_spill] sm:$0xff] }
 0x309   :  { %7270 = vmatprep.mubr.msk.f32.mxu1 %vm4734_vm0, %v5872_v50  ;;  %v5815_v53 = vsel %vm4734_vm0, %v4725_v9, 0.0  ;;  %v4203_v13 = vadd.f32 %v10049_v19, %v8033_v61  ;;  %v4727_v51 = vmax.f32 %v4195_v41, 0.0  ;;  %v4489_v6 = vmax.f32 %v3243_v5, 0.0 }
 0x30a   :  { %v5301_v57 = vadd.f32 %v5300_v10, %v5299_v3  ;;  %v5304_v54 = vsel %vm4734_vm0, %v4487_v15, 0.0  ;;  %v5814_v39 = vadd.f32 %v5813_v32, %v5812_v28  ;;  %v3251_v14 = vadd.f32 %v8110_v4, %v8033_v61  ;;  %v10387_v3 = vld [vmem:[#allocation7_spill] sm:$0xff] }
 0x30b   :  { %v4728_v58 = vmax.f32 %v4200_v20, 0.0  ;;  %v5817_v55 = vsel %vm4734_vm0, %v4726_v42, 0.0  ;;  %v4208_v2 = vadd.f32 %v10071_v45, %v8033_v61  ;;  %v3256_v44 = vadd.f32 %v8089_v49, %v8033_v61  ;;  %v10388_v42 = vld [vmem:[#allocation9_spill] sm:$0xff] }
 0x30c   :  { %v5303_v31 = vadd.f32 %v5302_v62, %v5301_v57  ;;  %v4490_v38 = vmax.f32 %v3248_v11, 0.0  ;;  %v5816_v22 = vadd.f32 %v5815_v53, %v5814_v39  ;;  %v5306_v40 = vsel %vm4734_vm0, %v4488_v23, 0.0 }
 0x30d   :  { %v4729_v35 = vmax.f32 %v4203_v13, 0.0  ;;  %v5819_v37 = vsel %vm4734_vm0, %v4727_v51, 0.0  ;;  %v4211_v4 = vadd.f32 %v10081_v0, %v8033_v61  ;;  %v5308_v46 = vsel %vm4734_vm0, %v4489_v6, 0.0  ;;  %v10385_v0 = vld [vmem:[#allocation8_spill] sm:$0xff] }
 0x30e   :  { %v5305_v19 = vadd.f32 %v5304_v54, %v5303_v31  ;;  %v3259_v27 = vadd.f32 %v10384_v8, %v8033_v61  ;;  %v5818_v29 = vadd.f32 %v5817_v55, %v5816_v22  ;;  %v4491_v25 = vmax.f32 %v3251_v14, 0.0  ;;  %v10389_v51 = vld [vmem:[#allocation12_spill] sm:$0xff]  ;;  %v10390_v55 = vld [vmem:[#allocation14_spill] sm:$0xff]  ;;  %v10391_v22 = vld [vmem:[#allocation11_spill] sm:$0xff] }
 0x30f   :  { %v5821_v49 = vsel %vm4734_vm0, %v4728_v58, 0.0  ;;  %v4216_v7 = vadd.f32 %v10068_v33, %v8033_v61  ;;  %v4730_v60 = vmax.f32 %v4208_v2, 0.0  ;;  %v4492_v17 = vmax.f32 %v3256_v44, 0.0 }
 0x310   :  { %v5307_v45 = vadd.f32 %v5306_v40, %v5305_v19  ;;  %v5310_v52 = vsel %vm4734_vm0, %v4490_v38, 0.0  ;;  %v5820_v63 = vadd.f32 %v5819_v37, %v5818_v29  ;;  %v3264_v24 = vadd.f32 %v10385_v0, %v8033_v61 }
 0x311   :  { %v5823_v1 = vsel %vm4734_vm0, %v4729_v35, 0.0  ;;  %v4219_v26 = vadd.f32 %v10077_v34, %v8033_v61  ;;  %v4731_v48 = vmax.f32 %v4211_v4, 0.0  ;;  %v4493_v12 = vmax.f32 %v3259_v27, 0.0 }
 0x312   :  { %v5309_v30 = vadd.f32 %v5308_v46, %v5307_v45  ;;  %v5822_v56 = vadd.f32 %v5821_v49, %v5820_v63  ;;  %v5312_v33 = vsel %vm4734_vm0, %v4491_v25, 0.0  ;;  %v3267_v18 = vadd.f32 %v10386_v43, %v8033_v61  ;;  %v10392_v46 = vld [vmem:[#allocation13_spill] sm:$0xff]  ;;  %v10393_v49 = vld [vmem:[#allocation16_spill] sm:$0xff] }
 0x313   :  { %v4732_v5 = vmax.f32 %v4216_v7, 0.0  ;;  %v5825_v9 = vsel %vm4734_vm0, %v4730_v60, 0.0  ;;  %v5314_v36 = vsel %vm4734_vm0, %v4492_v17, 0.0  ;;  %v3272_v50 = vadd.f32 %v10387_v3, %v8033_v61 }
 0x314   :  { %v5311_v21 = vadd.f32 %v5310_v52, %v5309_v30  ;;  %v5824_v15 = vadd.f32 %v5823_v1, %v5822_v56  ;;  %v4494_v34 = vmax.f32 %v3264_v24, 0.0  ;;  %v4733_v47 = vmax.f32 %v4219_v26, 0.0  ;;  %v10394_v30 = vld [vmem:[#allocation18_spill] sm:$0xff]  ;;  %v10395_v1 = vld [vmem:[#allocation15_spill] sm:$0xff]  ;;  %v10396_v56 = vld [vmem:[#allocation17_spill] sm:$0xff] }
 0x315   :  { %v5827_v59 = vsel %vm4734_vm0, %v4731_v48, 0.0  ;;  %v5316_v20 = vsel %vm4734_vm0, %v4493_v12, 0.0  ;;  %v3275_v23 = vadd.f32 %v10388_v42, %v8033_v61  ;;  %v4495_v11 = vmax.f32 %v3267_v18, 0.0 }
 0x316   :  { %v5313_v41 = vadd.f32 %v5312_v33, %v5311_v21  ;;  %v5826_v32 = vadd.f32 %v5825_v9, %v5824_v15  ;;  %v5829_v57 = vsel %vm4734_vm0, %v4732_v5, 0.0  ;;  %v4496_v53 = vmax.f32 %v3272_v50, 0.0 }
 0x317   :  { %v5318_v13 = vsel %vm4734_vm0, %v4494_v34, 0.0  ;;  %v3280_v6 = vadd.f32 %v10389_v51, %v8033_v61  ;;  %v5831_v54 = vsel %vm4734_vm0, %v4733_v47, 0.0  ;;  %v4497_v14 = vmax.f32 %v3275_v23, 0.0  ;;  %v10398_v34 = vld [vmem:[#allocation22_spill] sm:$0xff] }
 0x318   :  { %v5315_v10 = vadd.f32 %v5314_v36, %v5313_v41  ;;  %v5828_v62 = vadd.f32 %v5827_v59, %v5826_v32  ;;  %v5320_v58 = vsel %vm4734_vm0, %v4495_v11, 0.0  ;;  %v3283_v2 = vadd.f32 %v10390_v55, %v8033_v61  ;;  %v10397_v36 = vld [vmem:[#allocation20_spill] sm:$0xff]  ;;  %v10399_v32 = vld [vmem:[#allocation19_spill] sm:$0xff] }
 0x319   :  { %v5322_v19 = vsel %vm4734_vm0, %v4496_v53, 0.0  ;;  %v3288_v40 = vadd.f32 %v10391_v22, %v8033_v61  ;;  %v4498_v35 = vmax.f32 %v3280_v6, 0.0  ;;  %v5324_v4 = vsel %vm4734_vm0, %v4497_v14, 0.0  ;;  %v10401_v53 = vld [vmem:[#allocation23_spill] sm:$0xff]  ;;  %v10403_v14 = vld [vmem:[#allocation25_spill] sm:$0xff] }
 0x31a   :  { %v5317_v28 = vadd.f32 %v5316_v20, %v5315_v10  ;;  %v5830_v39 = vadd.f32 %v5829_v57, %v5828_v62  ;;  %v3291_v8 = vadd.f32 %v10392_v46, %v8033_v61  ;;  %v4499_v27 = vmax.f32 %v3283_v2, 0.0  ;;  %v10400_v57 = vld [vmem:[#allocation21_spill] sm:$0xff] }
 0x31b   :  { %v4500_v29 = vmax.f32 %v3288_v40, 0.0  ;;  %v5326_v25 = vsel %vm4734_vm0, %v4498_v35, 0.0  ;;  %v3296_v7 = vadd.f32 %v10393_v49, %v8033_v61  ;;  %v3299_v63 = vadd.f32 %v10394_v30, %v8033_v61 }
 0x31c   :  { %v5319_v31 = vadd.f32 %v5318_v13, %v5317_v28  ;;  %v10226_v38 = vadd.f32 %v5831_v54, %v5830_v39  ;;  %v4501_v17 = vmax.f32 %v3291_v8, 0.0  ;;  %v5328_v52 = vsel %vm4734_vm0, %v4499_v27, 0.0 }
 0x31d   :  { %v5330_v24 = vsel %vm4734_vm0, %v4500_v29, 0.0  ;;  %v3304_v26 = vadd.f32 %v10395_v1, %v8033_v61  ;;  %v4502_v48 = vmax.f32 %v3296_v7, 0.0  ;;  %v3307_v33 = vadd.f32 %v10396_v56, %v8033_v61 }
 0x31e   :  { %v5321_v44 = vadd.f32 %v5320_v58, %v5319_v31  ;;  %v5332_v21 = vsel %vm4734_vm0, %v4501_v17, 0.0  ;;  %v4503_v43 = vmax.f32 %v3299_v63, 0.0  ;;  %v3312_v41 = vadd.f32 %v10397_v36, %v8033_v61  ;;  %v10402_v31 = vld [vmem:[#allocation24_spill] sm:$0xff] }
 0x31f   :  { %v4504_v5 = vmax.f32 %v3304_v26, 0.0  ;;  %v5334_v9 = vsel %vm4734_vm0, %v4502_v48, 0.0  ;;  %v4505_v3 = vmax.f32 %v3307_v33, 0.0  ;;  %v3315_v47 = vadd.f32 %v10398_v34, %v8033_v61 }
 0x320   :  { %v5323_v37 = vadd.f32 %v5322_v19, %v5321_v44  ;;  %v5336_v50 = vsel %vm4734_vm0, %v4503_v43, 0.0  ;;  %v3320_v20 = vadd.f32 %v10399_v32, %v8033_v61  ;;  %v4506_v42 = vmax.f32 %v3312_v41, 0.0  ;;  %v10404_v19 = vld [vmem:[#allocation26_spill] sm:$0xff] }
 0x321   :  { %v5338_v10 = vsel %vm4734_vm0, %v4504_v5, 0.0  ;;  %v5340_v11 = vsel %vm4734_vm0, %v4505_v3, 0.0  ;;  %v3323_v28 = vadd.f32 %v10400_v57, %v8033_v61  ;;  %v4507_v62 = vmax.f32 %v3315_v47, 0.0  ;;  %v10405_v61 = vld [vmem:[#allocation27_spill] sm:$0xff] }
 0x322   :  { %v5325_v45 = vadd.f32 %v5324_v4, %v5323_v37  ;;  %v5419_v13 = vrot.slane %v10401_v53, 4  ;;  %v4508_v6 = vmax.f32 %v3320_v20, 0.0  ;;  %v5342_v54 = vsel %vm4734_vm0, %v4506_v42, 0.0 }
 0x323   :  { %v5488_v39 = vrot.slane %v10402_v31, 4  ;;  %v5557_v58 = vrot.slane %v10403_v14, 4  ;;  %v4509_v2 = vmax.f32 %v3323_v28, 0.0  ;;  %v5344_v44 = vsel %vm4734_vm0, %v4507_v62, 0.0 }
 0x324   :  { %v5327_v60 = vadd.f32 %v5326_v25, %v5325_v45  ;;  %v5626_v22 = vrot.slane %v10404_v19, 4  ;;  %v5420_v40 = vadd.f32 %v5419_v13, %v10401_v53  ;;  %v5695_v35 = vrot.slane %v10405_v61, 4 }
 0x325   :  { %v5346_v4 = vsel %vm4734_vm0, %v4508_v6, 0.0  ;;  %v5489_v46 = vadd.f32 %v5488_v39, %v10402_v31  ;;  %v5764_v8 = vrot.slane %v9994_v16, 4  ;;  %v5558_v27 = vadd.f32 %v5557_v58, %v10403_v14  ;;  %v10406_v14 = vld [vmem:[#allocation5_spill] sm:$0xff] }
 0x326   :  { %v5329_v0 = vadd.f32 %v5328_v52, %v5327_v60  ;;  %v5833_v29 = vrot.slane %v10226_v38, 4  ;;  %v5348_v25 = vsel %vm4734_vm0, %v4509_v2, 0.0  ;;  %v5627_v49 = vadd.f32 %v5626_v22, %v10404_v19 }
 0x327   :  { %v5421_v7 = vrot.slane %v5420_v40, 2  ;;  %v5696_v60 = vadd.f32 %v5695_v35, %v10405_v61  ;;  %v5490_v52 = vrot.slane %v5489_v46, 2  ;;  %v5765_v30 = vadd.f32 %v5764_v8, %v9994_v16 }
 0x328   :  { %v5331_v12 = vadd.f32 %v5330_v24, %v5329_v0  ;;  %v5559_v63 = vrot.slane %v5558_v27, 2  ;;  %v5834_v24 = vadd.f32 %v5833_v29, %v10226_v38  ;;  %v5628_v1 = vrot.slane %v5627_v49, 2 }
 0x329   :  { %v5422_v26 = vadd.f32 %v5421_v7, %v5420_v40  ;;  %v5697_v48 = vrot.slane %v5696_v60, 2  ;;  %v5766_v56 = vrot.slane %v5765_v30, 2  ;;  %v5841_v58 = vsub.s32 1, %v10406_v14 }
 0x32a   :  { %v5333_v18 = vadd.f32 %v5332_v21, %v5331_v12  ;;  %v5491_v21 = vadd.f32 %v5490_v52, %v5489_v46  ;;  %v5560_v33 = vadd.f32 %v5559_v63, %v5558_v27  ;;  %v5629_v5 = vadd.f32 %v5628_v1, %v5627_v49 }
 0x32b   :  { %v5698_v36 = vadd.f32 %v5697_v48, %v5696_v60  ;;  %v5767_v3 = vadd.f32 %v5766_v56, %v5765_v30  ;;  %v5997_v35 = vsub.s32 2, %v10406_v14 }
 0x32c   :  { %v5335_v15 = vadd.f32 %v5334_v9, %v5333_v18  ;;  %v5835_v18 = vrot.slane %v5834_v24, 2  ;;  %v5423_v9 = vrot.slane %v5422_v26, 1  ;;  %v5561_v16 = vrot.slane %v5560_v33, 1 }
 0x32d   :  { %v5630_v47 = vrot.slane %v5629_v5, 1  ;;  %v5768_v20 = vrot.slane %v5767_v3, 1 }
 0x32e   :  { %v5337_v59 = vadd.f32 %v5336_v50, %v5335_v15  ;;  %v5492_v15 = vrot.slane %v5491_v21, 1  ;;  %v5836_v34 = vadd.f32 %v5835_v18, %v5834_v24  ;;  %v5424_v38 = vadd.f32 %v5423_v9, %v5422_v26 }
 0x32f   :  { %v5562_v42 = vadd.f32 %v5561_v16, %v5560_v33  ;;  %v5631_v57 = vadd.f32 %v5630_v47, %v5629_v5  ;;  %v5769_v13 = vadd.f32 %v5768_v20, %v5767_v3  ;;  %v7642_v9 = vmov 0  }
 0x330   :  { %v5339_v23 = vadd.f32 %v5338_v10, %v5337_v59  ;;  %v5699_v59 = vrot.slane %v5698_v36, 1  ;;  %v5493_v32 = vadd.f32 %v5492_v15, %v5491_v21  ;;  %7321 = vset.pattern.permute.xlu0 %v7642_v9  ;;  %7322 = vset.pattern.permute.xlu1 %v7642_v9 }
 0x332   :  { %v5341_v51 = vadd.f32 %v5340_v11, %v5339_v23  ;;  %v5837_v11 = vrot.slane %v5836_v34, 1  ;;  %v5700_v62 = vadd.f32 %v5699_v59, %v5698_v36  ;;  %v6021_v36 = vsub.s32 4, %v10406_v14 }
 0x334   :  { %v5343_v55 = vadd.f32 %v5342_v54, %v5341_v51  ;;  %v5838_v54 = vadd.f32 %v5837_v11, %v5836_v34 }
 0x336   :  { %v5345_v37 = vadd.f32 %v5344_v44, %v5343_v55  ;;  %v10288_v55 = vld [vmem:[%s10345_s2 + $0x40] sm:$0x1f] }
 0x337   :  { %v5842_v2 = vrot.slane %v10288_v55, %v5841_v58 }
 0x338   :  { %v5347_v45 = vadd.f32 %v5346_v4, %v5345_v37  ;;  %v5998_v4 = vrot.slane %v10288_v55, %v5997_v35 }
 0x33a   :  { %v5349_v17 = vadd.f32 %v5348_v25, %v5347_v45 }
 0x33c   :  { %v5350_v0 = vrot.slane %v5349_v17, 4 }
 0x33e   :  { %v5351_v12 = vadd.f32 %v5350_v0, %v5349_v17 }
 0x340   :  { %v5352_v43 = vrot.slane %v5351_v12, 2 }
 0x342   :  { %v5353_v41 = vadd.f32 %v5352_v43, %v5351_v12 }
 0x344   :  { %v5354_v50 = vrot.slane %v5353_v41, 1 }
 0x346   :  { %v5355_v10 = vadd.f32 %v5354_v50, %v5353_v41  ;;  %v6022_v41 = vrot.slane %v10288_v55, %v6021_v36 }
 0x348   :  { %v5873_v23 = vsel %vm5859_vm1, %v5424_v38, %v5355_v10 }
 0x349   :  { %v5874_v28 = vsel %vm5861_vm2, %v5493_v32, %v5873_v23 }
 0x34a   :  { %v5875_v53 = vsel %vm5863_vm3, %v5562_v42, %v5874_v28 }
 0x34b   :  { %v5876_v51 = vsel %vm5865_vm4, %v5631_v57, %v5875_v53 }
 0x34c   :  { %v5877_v6 = vsel %vm5867_vm5, %v5700_v62, %v5876_v51 }
 0x34d   :  { %v5878_v31 = vsel %vm5869_vm6, %v5769_v13, %v5877_v6 }
 0x34e   :  { %v5879_v39 = vsel %vm5871_vm7, %v5838_v54, %v5878_v31 }
 0x34f   :  { %7271 = vmatmul.mubr.msk.f32.vlgmr.msra.gmra.mrb[252].mxu1 %vm4734_vm0, %v5879_v39 }
 0x422   :  { %v7272_v44 = vpop.f32.mrb[252].mxu1 }
 0x423   :  { %v5950_v19 = vpop.f32.mrb[253].mxu1  ;;  %v5956_v40 = vadd.f32 %v7272_v44, %v5842_v2 }
 0x424   :  { %v5951_v22 = vadd.f32 %v5950_v19, %v5842_v2 }
 0x425   :  { %v6457_v8 = vmul.f32 -1.442695, %v5956_v40 }
 0x426   :  { %7587 = vtanh.f32 %v5951_v22  ;;  %v6456_v46 = vmul.f32 -1.442695, %v5951_v22 }
 0x427   :  { %7589 = vtanh.f32 %v5956_v40 }
 0x428   :  { %7591 = vpow2.f32 %v6456_v46 }
 0x429   :  { %7593 = vpow2.f32 %v6457_v8 }
 0x430   :  { %v7588_v61 = vpop.eup %7587 }
 0x431   :  { %5975 = vrot.lane.b32.xlu0 %v7588_v61, %s7640_s19  ;;  %v7590_v37 = vpop.eup %7589 }
 0x432   :  { %v7592_v27 = vpop.eup %7591 }
 0x433   :  { %v5965_v45 = vadd.f32 1.0, %v7592_v27  ;;  %v7594_v29 = vpop.eup %7593 }
 0x434   :  { %v5966_v25 = vadd.f32 1.0, %v7594_v29 }
 0x435   :  { %5977 = vrot.lane.b32.xlu0 %v7590_v37, %s7640_s19  ;;  %7595 = vrcp.f32 %v5965_v45 }
 0x436   :  { %7597 = vrcp.f32 %v5966_v25 }
 0x439   :  { %6000 = vrot.lane.b32.xlu0 %v5998_v4, %s7641_s20 }
 0x43f   :  { %v7596_v49 = vpop.eup %7595 }
 0x440   :  { %v7598_v17 = vpop.eup %7597 }
 0x4a3   :  { %v5976_v7 = vpop.permute.xlu0 %5975 }
 0x4a4   :  { %v5981_v60 = vmul.f32 %v7596_v49, %v5976_v7 }
 0x4a6   :  { %7599 = vtanh.f32 %v5981_v60 }
 0x4a7   :  { %v5978_v52 = vpop.permute.xlu0 %5977 }
 0x4a8   :  { %v5982_v30 = vmul.f32 %v7598_v17, %v5978_v52  ;;  %v20_v52 = vld [vmem:[%s10345_s2 + $0x20] sm:$0xff] }
 0x4aa   :  { %7601 = vtanh.f32 %v5982_v30  ;;  %v21_v30 = vld [vmem:[%s10345_s2 + $0x28] sm:$0xff] }
 0x4ab   :  { %v6001_v1 = vpop.permute.xlu0 %6000 }
 0x4b0   :  { %v7600_v63 = vpop.eup %7599 }
 0x4b1   :  { %5987 = vrot.lane.b32.xlu1 %v7600_v63, %s7641_s20  ;;  %v22_v63 = vld [vmem:[%s10345_s2 + $0x30] sm:$0xff] }
 0x4b4   :  { %v7602_v0 = vpop.eup %7601 }
 0x4b5   :  { %5989 = vrot.lane.b32.xlu1 %v7602_v0, %s7641_s20  ;;  %v7643_v0 = vmov 0.0|0.0  }
 0x4b6   :  { %7292 = vmatprep.subr.bf16.mxu1 %v7643_v0 }
 0x523   :  { %v5988_v24 = vpop.permute.xlu1 %5987 }
 0x524   :  { %v10296_v26 = vmul.f32 %v7596_v49, %v5988_v24  ;;  %v7293_v24 = vpack.c.bf16 %v21_v30, %v20_v52 }
 0x526   :  { %v6003_v48 = vmul.f32 %v6001_v1, %v10296_v26  ;;  %7294 = vmatpush3.bf16.msra.mxu1 %v7293_v24 }
 0x527   :  { %v5990_v12 = vpop.permute.xlu1 %5989  ;;  %7295 = vmatprep.subr.bf16.mxu1 %v7643_v0 }
 0x528   :  { %v10299_v21 = vmul.f32 %v7598_v17, %v5990_v12  ;;  %6007 = vrot.lane.b32.xlu1 %v6003_v48, %s7641_s20  ;;  %v7645_v48 = vmov 0.0  }
 0x529   :  { %7281 = vmatprep.mubr.msk.f32.mxu1 %vm7644_vm9, %v7645_v48 }
 0x52a   :  { %v6004_v56 = vmul.f32 %v6001_v1, %v10299_v21  ;;  %v23_v1 = vld [vmem:[%s10345_s2 + $0x38] sm:$0xff]  ;;  %s7646_s2 = smov [#allocation2]  }
 0x52b   :  { %v7296_v12 = vpack.c.bf16 %v23_v1, %v22_v63  ;;  %s6182_s29 = sshll.u32 %s7646_s2, 4  ;;  %s6183_s29 = int_to_ptr.vmem [resolvable:$true] %s6182_s29 }
 0x52c   :  { %6009 = vrot.lane.b32.xlu0 %v6004_v56, %s7641_s20  ;;  %s7616_s30 = scalar_lea.vmem %s6183_s29, 32  ;;  %p7621_p1 = scmp.lt.s32.totalorder %s6183_s29, %s6183_s29 }
 0x52d   :  { %7297 = vmatpush3.bf16.msra.mxu1 %v7296_v12  ;;  %p7617_p0 = scmp.ne.s32.totalorder %s6183_s29, %s7616_s30  ;;  %p7622_p2 = scmp.lt.s32.totalorder %s7616_s30, %s7616_s30 }
 0x52f   :  { %p7623_p3 = por %p7622_p2, %p7621_p1 }
 0x531   :  { %p7624_p4 = pnand %p7623_p3, %p7617_p0 }
 0x59a   :  { %v6008_v33 = vpop.permute.xlu1 %6007 }
 0x59b   :  { %v6013_v43 = vsel %vm4734_vm0, %v6008_v33, 0.0 }
 0x59c   :  { %6014 = vadd.xlane.f32.xlu1 %v6013_v43 }
 0x59e   :  { %v6010_v18 = vpop.permute.xlu0 %6009 }
 0x59f   :  { %v6016_v5 = vsel %vm4734_vm0, %v6010_v18, 0.0 }
 0x5a0   :  { %6017 = vadd.xlane.f32.xlu0 %v6016_v5 }
 0x629   :  { %v6015_v15 = vpop.xlane.xlu1 %6014 }
 0x62a   :  { %v6023_v3 = vadd.f32 %v6022_v41, %v6015_v15 }
 0x62c   :  { %7603 = vtanh.f32 %v6023_v3 }
 0x62d   :  { %v6018_v16 = vpop.xlane.xlu0 %6017 }
 0x62e   :  { %v6024_v50 = vadd.f32 %v6022_v41, %v6018_v16 }
 0x630   :  { %7605 = vtanh.f32 %v6024_v50 }
 0x636   :  { %v7604_v34 = vpop.eup %7603 }
 0x637   :  { %v6028_v47 = vsel %vm6027_vm8, %v7604_v34, -inf }
 0x638   :  { %v6029_v38 = vrot.slane %v6028_v47, 4 }
 0x63a   :  { %v7606_v59 = vpop.eup %7605  ;;  %v6030_v10 = vmax.f32 %v6028_v47, %v6029_v38 }
 0x63b   :  { %v6035_v32 = vsel %vm6027_vm8, %v7606_v59, -inf }
 0x63c   :  { %v6031_v20 = vrot.slane %v6030_v10, 2  ;;  %v6036_v42 = vrot.slane %v6035_v32, 4 }
 0x63e   :  { %v6032_v23 = vmax.f32 %v6030_v10, %v6031_v20  ;;  %v6037_v11 = vmax.f32 %v6035_v32, %v6036_v42 }
 0x640   :  { %v6033_v57 = vrot.slane %v6032_v23, 1  ;;  %v6038_v28 = vrot.slane %v6037_v11, 2 }
 0x642   :  { %v6034_v62 = vmax.f32 %v6032_v23, %v6033_v57  ;;  %v6039_v53 = vmax.f32 %v6037_v11, %v6038_v28 }
 0x644   :  { %v6042_v13 = vsub.f32 %v7604_v34, %v6034_v62  ;;  %v6040_v51 = vrot.slane %v6039_v53, 1 }
 0x646   :  { %v6044_v6 = vmul.f32 1.442695, %v6042_v13  ;;  %v6041_v54 = vmax.f32 %v6039_v53, %v6040_v51 }
 0x648   :  { %7607 = vpow2.f32 %v6044_v6  ;;  %v6043_v31 = vsub.f32 %v7606_v59, %v6041_v54 }
 0x64a   :  { %v6046_v39 = vmul.f32 1.442695, %v6043_v31 }
 0x64c   :  { %7609 = vpow2.f32 %v6046_v39 }
 0x652   :  { %v7608_v58 = vpop.eup %7607 }
 0x653   :  { %v6048_v2 = vsel %vm6027_vm8, %v7608_v58, 0.0 }
 0x654   :  { %v6049_v44 = vrot.slane %v6048_v2, 4 }
 0x656   :  { %v7610_v19 = vpop.eup %7609  ;;  %v6050_v22 = vadd.f32 %v6049_v44, %v6048_v2 }
 0x657   :  { %v6055_v40 = vsel %vm6027_vm8, %v7610_v19, 0.0 }
 0x658   :  { %v6051_v61 = vrot.slane %v6050_v22, 2  ;;  %v6056_v35 = vrot.slane %v6055_v40, 4 }
 0x65a   :  { %v6052_v37 = vadd.f32 %v6051_v61, %v6050_v22  ;;  %v6057_v4 = vadd.f32 %v6056_v35, %v6055_v40 }
 0x65c   :  { %v6053_v46 = vrot.slane %v6052_v37, 1  ;;  %v6058_v8 = vrot.slane %v6057_v4, 2 }
 0x65e   :  { %v6054_v27 = vadd.f32 %v6053_v46, %v6052_v37  ;;  %v6059_v45 = vadd.f32 %v6058_v8, %v6057_v4 }
 0x660   :  { %7611 = vrcp.f32 %v6054_v27  ;;  %v6060_v29 = vrot.slane %v6059_v45, 1 }
 0x662   :  { %v6061_v25 = vadd.f32 %v6060_v29, %v6059_v45 }
 0x664   :  { %7613 = vrcp.f32 %v6061_v25 }
 0x66a   :  { %v7612_v49 = vpop.eup %7611 }
 0x66b   :  { %v6063_v7 = vmul.f32 %v7612_v49, %v7608_v58 }
 0x66d   :  { %6068 = vperm.xlu0 %7321, %v6063_v7  }
 0x66e   :  { %v7614_v60 = vpop.eup %7613 }
 0x66f   :  { %v6065_v17 = vmul.f32 %v7614_v60, %v7610_v19 }
 0x671   :  { %6073 = vperm.xlu1 %7322, %v6065_v17  }
 0x6ec   :  { %v6069_v56 = vpop.permute.xlu0 %6068 }
 0x6ed   :  { %v6076_v33 = vmul.f32 %v6069_v56, %v10296_v26 }
 0x6ef   :  { %v6079_v43 = vsel %vm6078_vm10, %v6076_v33, 0.0 }
 0x6f0   :  { %v6080_v18 = vrot.slane %v6079_v43, 4  ;;  %v6074_v5 = vpop.permute.xlu1 %6073 }
 0x6f1   :  { %v6077_v9 = vmul.f32 %v6074_v5, %v10299_v21  ;;  %v6095_v21 = vsub.s32 3, %v10406_v14 }
 0x6f2   :  { %v6081_v36 = vadd.f32 %v6080_v18, %v6079_v43 }
 0x6f3   :  { %v6086_v41 = vsel %vm6078_vm10, %v6077_v9, 0.0  ;;  %v6096_v42 = vrot.slane %v10288_v55, %v6095_v21 }
 0x6f4   :  { %v6082_v15 = vrot.slane %v6081_v36, 2  ;;  %v6087_v3 = vrot.slane %v6086_v41, 4 }
 0x6f6   :  { %v6083_v16 = vadd.f32 %v6082_v15, %v6081_v36  ;;  %v6088_v50 = vadd.f32 %v6087_v3, %v6086_v41 }
 0x6f8   :  { %v6089_v34 = vrot.slane %v6088_v50, 2  ;;  %v6084_v47 = vrot.slane %v6083_v16, 1 }
 0x6fa   :  { %v6090_v38 = vadd.f32 %v6089_v34, %v6088_v50  ;;  %v6085_v10 = vadd.f32 %v6084_v47, %v6083_v16 }
 0x6fc   :  { %v6091_v59 = vrot.slane %v6090_v38, 1 }
 0x6fe   :  { %v6092_v32 = vadd.f32 %v6091_v59, %v6090_v38 }
 0x700   :  { %v6099_v20 = vsel %vm5859_vm1, %v6092_v32, %v6085_v10 }
 0x701   :  { %6100 = vrot.lane.b32.xlu1 %v6099_v20, %s7641_s20 }
 0x773   :  { %v6101_v26 = vpop.permute.xlu1 %6100 }
 0x774   :  { %7282 = vmatmul.mubr.msk.f32.vlgmr.msra.gmra.mrb[254].mxu1 %vm4734_vm0, %v6101_v26 }
 0x847   :  { %v6170_v23 = vpop.f32.mrb[254].mxu1 }
 0x848   :  { %v6171_v11 = vadd.f32 %v6170_v23, %v6096_v42  ;;  %v7283_v57 = vpop.f32.mrb[255].mxu1 }
 0x84a   :  { %6175 = vst.msk [vmem:[#allocation2] sm:$0x3] %vm6174_vm11, %v6171_v11 }
 0x84b   :  { %7627 = shalt.err (!%p7624_p4)
}
 0x84c   :  { %s7628_s6 = scalar_lea.hbm %s10346_s3, 32 }
 0x84d   :  { %p7629_p5 = scmp.ne.s32.totalorder %s10346_s3, %s7628_s6  ;;  %p7632_p6 = scmp.lt.u32.totalorder %s7628_s6, %s10346_s3 }
 0x84f   :  { %p7634_p7 = pnand %p7632_p6, %p7629_p5 }
 0x851   :  { %7637 = shalt.err (!%p7634_p7)
}
 0x852   :  { %6185 = dma.vmem_to_hbm [thread:$0]  %s6183_s29, 32, %s10346_s3, [#allocation3]  }
 0x853   :  { %7638 = dma.done.wait [#allocation3], 32  }
 0x854   :  { %7639 = vsyncadd [#allocation3], 4294967264 }
 0x855   :  { %6189 = vsyncpa [#allocation3], 1 }

</bundles_post_ra>
